<compile_context>
chip_gen: v7x
topology: tpu7x:2x2x1
jax: 0.10.0
libtpu: 0.0.40
codegen_flags: <defaults>
</compile_context>

<pallas_src>
import math

import jax
import jax.numpy as jnp
from jax.experimental import pallas as pl
from jax.experimental.pallas import tpu as pltpu


# --------------------------------------------------------------------------
# Plain-JAX glue (parameter-free shape/permutation work)
# --------------------------------------------------------------------------
def positional_encoding_1d(d_model, length):
    if d_model % 2 != 0:
        raise ValueError("Cannot use sin/cos positional encoding with odd dim")
    position = jnp.arange(length, dtype=jnp.float32)[:, None]             # (L, 1)
    div_term = jnp.exp(jnp.arange(0, d_model, 2, dtype=jnp.float32)
                       * -(math.log(10000.0) / d_model))                  # (d/2,)
    ang = position * div_term                                             # (L, d/2)
    pe = jnp.stack([jnp.sin(ang), jnp.cos(ang)], axis=-1).reshape(length, d_model)
    return pe


def _preprocess(features, lengths, d_pe):
    """Masked PE sequence, mask and sorted/masked features, sequence-major.

    The sequence length is the *static* K (no device->host sync on
    lengths.max()); positions beyond each sample's length are fully masked,
    which reproduces the original semantics for every surviving position.
    """
    B, K, D = features.shape
    L = K

    pe = positional_encoding_1d(d_pe, L)                                  # (L, P)
    mask_bl = (jnp.arange(L)[None, :] < lengths[:, None]).astype(jnp.float32)  # (B, L)
    pes_blp = pe[None] * mask_bl[:, :, None]                              # (B, L, P)

    mbool = mask_bl[:, :, None] > 0.5
    masked = jnp.where(mbool, features, -10000.0)
    sorted_desc = jnp.flip(jnp.sort(masked, axis=1), axis=1)              # sort(dim=1, desc)
    sorted_feats = jnp.where(mbool, sorted_desc, 0.0)

    # sequence-major layout for the kernel
    pes_lbp = jnp.transpose(pes_blp, (1, 0, 2)).astype(jnp.float32)       # (L, B, P)
    mask_lb1 = jnp.transpose(mask_bl, (1, 0))[:, :, None].astype(jnp.float32)  # (L, B, 1)
    sf_lbd = jnp.transpose(sorted_feats, (1, 0, 2)).astype(jnp.float32)   # (L, B, D)
    return pes_lbp, mask_lb1, sf_lbd, L


# --------------------------------------------------------------------------
# Pallas kernel: bi-GRU over PEs + linear scores + masked softmax + pooling
# --------------------------------------------------------------------------
def _gpo2_kernel(pes_ref, mask_ref, sf_ref,
                 wih_f_t_ref, whh_f_t_ref, bih_f_ref, bhh_f_ref,
                 wih_b_t_ref, whh_b_t_ref, bih_b_ref, bhh_b_ref,
                 linw_ref,
                 weights_ref, pooled_ref,
                 hf_scr, hb_scr):
    L, B, P = pes_ref.shape
    H = whh_f_t_ref.shape[0]

    # ---- Hoisted input-to-hidden matmuls: one big MXU call per direction ----
    pes2d = pes_ref[...].reshape(L * B, P)
    gi_f = (jnp.dot(pes2d, wih_f_t_ref[...], preferred_element_type=jnp.float32)
            + bih_f_ref[...]).reshape(L, B, 3 * H)                        # (L, B, 3H)
    gi_b = (jnp.dot(pes2d, wih_b_t_ref[...], preferred_element_type=jnp.float32)
            + bih_b_ref[...]).reshape(L, B, 3 * H)                        # (L, B, 3H)

    mask = mask_ref[...]                                                  # (L, B, 1)
    whh_f_t = whh_f_t_ref[...]                                            # (H, 3H)
    whh_b_t = whh_b_t_ref[...]
    bhh_f = bhh_f_ref[...]                                                # (1, 3H)
    bhh_b = bhh_b_ref[...]

    def gru_step(gi, h, m, whh_t, bhh):
        # Only the recurrent h @ whh dot remains on the serial chain.
        gh = jnp.dot(h, whh_t, preferred_element_type=jnp.float32) + bhh  # (B, 3H)
        r = jax.nn.sigmoid(gi[:, :H] + gh[:, :H])
        z = jax.nn.sigmoid(gi[:, H:2 * H] + gh[:, H:2 * H])
        n = jnp.tanh(gi[:, 2 * H:] + r * gh[:, 2 * H:])
        h_new = (1.0 - z) * n + z * h
        # packed-sequence semantics: padded steps leave h unchanged
        return m * h_new + (1.0 - m) * h

    h_f = jnp.zeros((B, H), jnp.float32)
    h_b = jnp.zeros((B, H), jnp.float32)

    # Fused forward + backward recurrence, fully unrolled (L is static & small),
    # so the two independent chains hide each other's MXU / EUP latency.
    for t in range(L):
        tb = L - 1 - t
        h_f = gru_step(gi_f[t], h_f, mask[t], whh_f_t, bhh_f)
        h_b = gru_step(gi_b[tb], h_b, mask[tb], whh_b_t, bhh_b)
        hf_scr[t] = h_f
        hb_scr[tb] = h_b

    # (fwd + bwd) / 2 -> N=1 linear as a VPU multiply + lane reduce (no MXU,
    # no (L*B, H) reshape) -> masked temperature softmax over L.
    out_emb = (hf_scr[...] + hb_scr[...]) * 0.5                           # (L, B, H)
    scores = jnp.sum(out_emb * linw_ref[...][None, :, :],
                     axis=-1, keepdims=True)                              # (L, B, 1)
    scores = jnp.where(mask > 0.5, scores, -10000.0) * 10.0               # temperature 0.1
    s_max = jnp.max(scores, axis=0, keepdims=True)
    e = jnp.exp(scores - s_max)
    w = e * pl.reciprocal(jnp.sum(e, axis=0, keepdims=True), approx=True)  # (L, B, 1)

    weights_ref[...] = w                                                  # (L, B, 1)
    pooled_ref[...] = jnp.sum(sf_ref[...] * w, axis=0)                    # (B, D)


# --------------------------------------------------------------------------
# Wrapper
# --------------------------------------------------------------------------
def gpo2_pallas(features, lengths, params, d_pe, d_hidden):
    B, K, D = features.shape
    H = d_hidden
    pes_lbp, mask_lb1, sf_lbd, L = _preprocess(features, lengths, d_pe)

    # Pad batch to a multiple of 8 sublanes (padded rows are fully masked).
    B_pad = max(8, ((B + 7) // 8) * 8)
    pad = B_pad - B
    if pad:
        pes_lbp = jnp.pad(pes_lbp, ((0, 0), (0, pad), (0, 0)))
        mask_lb1 = jnp.pad(mask_lb1, ((0, 0), (0, pad), (0, 0)))
        sf_lbd = jnp.pad(sf_lbd, ((0, 0), (0, pad), (0, 0)))

    # Pre-transpose weights once in plain JAX (no in-kernel XLU transposes).
    wih_f_t = jnp.transpose(params["wih_f"])      # (P, 3H)
    whh_f_t = jnp.transpose(params["whh_f"])      # (H, 3H)
    wih_b_t = jnp.transpose(params["wih_b"])      # (P, 3H)
    whh_b_t = jnp.transpose(params["whh_b"])      # (H, 3H)
    linw_t = jnp.transpose(params["linw"])        # (1, H)

    # Problem is tiny (single (8,8,*) slab): a gridless single invocation is
    # the right shape for v5e/v6e; a batch-parallel grid only pays off once B
    # grows (v7x dual-TC).  Everything fits trivially in VMEM.
    weights_lb1, pooled = pl.pallas_call(
        _gpo2_kernel,
        out_shape=(jax.ShapeDtypeStruct((L, B_pad, 1), jnp.float32),
                   jax.ShapeDtypeStruct((B_pad, D), jnp.float32)),
        scratch_shapes=[pltpu.VMEM((L, B_pad, H), jnp.float32),
                        pltpu.VMEM((L, B_pad, H), jnp.float32)],
    )(pes_lbp, mask_lb1, sf_lbd,
      wih_f_t, whh_f_t, params["bih_f"], params["bhh_f"],
      wih_b_t, whh_b_t, params["bih_b"], params["bhh_b"],
      linw_t)

    pool_weights = jnp.transpose(weights_lb1[:, :B, 0], (1, 0))[:, :, None]  # (B, L, 1)
    # TODO(synk): InteractionModule class is not provided in the reference source; pooled features are returned unchanged.
    return pooled[:B], pool_weights


# --------------------------------------------------------------------------
# Pure-JAX reference (mirrors the kernel math for a correctness check)
# --------------------------------------------------------------------------
def gpo2_reference(features, lengths, params, d_pe, d_hidden):
    pes_lbp, mask_lb1, sf_lbd, L = _preprocess(features, lengths, d_pe)
    B = features.shape[0]
    H = d_hidden

    def cell(x, h, wih, whh, bih, bhh):
        gi = x @ wih.T + bih
        gh = h @ whh.T + bhh
        r = jax.nn.sigmoid(gi[:, :H] + gh[:, :H])
        z = jax.nn.sigmoid(gi[:, H:2 * H] + gh[:, H:2 * H])
        n = jnp.tanh(gi[:, 2 * H:] + r * gh[:, 2 * H:])
        return (1.0 - z) * n + z * h

    hf = []
    h = jnp.zeros((B, H), jnp.float32)
    for t in range(L):
        m = mask_lb1[t]
        hn = cell(pes_lbp[t], h, params["wih_f"], params["whh_f"],
                  params["bih_f"], params["bhh_f"])
        h = m * hn + (1.0 - m) * h
        hf.append(h)
    hb = [None] * L
    h = jnp.zeros((B, H), jnp.float32)
    for i in range(L):
        t = L - 1 - i
        m = mask_lb1[t]
        hn = cell(pes_lbp[t], h, params["wih_b"], params["whh_b"],
                  params["bih_b"], params["bhh_b"])
        h = m * hn + (1.0 - m) * h
        hb[t] = h
    hf = jnp.stack(hf, 0)
    hb = jnp.stack(hb, 0)

    out_emb = (hf + hb) * 0.5
    scores = (out_emb.reshape(L * B, H) @ params["linw"]).reshape(L, B, 1)
    scores = jnp.where(mask_lb1 > 0.5, scores, -10000.0) / 0.1
    w = jax.nn.softmax(scores, axis=0)
    pooled = jnp.sum(sf_lbd * w, axis=0)
    pool_weights = jnp.transpose(w[:, :, 0], (1, 0))[:, :, None]
    return pooled, pool_weights


# --------------------------------------------------------------------------
# Deterministic parameter init (PyTorch GRU/Linear default: U(-1/sqrt(H), 1/sqrt(H)))
# --------------------------------------------------------------------------
def init_params(key, d_pe, d_hidden):
    stdv = 1.0 / math.sqrt(d_hidden)
    ks = jax.random.split(key, 9)
    u = lambda k, shape: jax.random.uniform(k, shape, jnp.float32, -stdv, stdv)
    return dict(
        wih_f=u(ks[0], (3 * d_hidden, d_pe)),
        whh_f=u(ks[1], (3 * d_hidden, d_hidden)),
        bih_f=u(ks[2], (1, 3 * d_hidden)),
        bhh_f=u(ks[3], (1, 3 * d_hidden)),
        wih_b=u(ks[4], (3 * d_hidden, d_pe)),
        whh_b=u(ks[5], (3 * d_hidden, d_hidden)),
        bih_b=u(ks[6], (1, 3 * d_hidden)),
        bhh_b=u(ks[7], (1, 3 * d_hidden)),
        linw=u(ks[8], (d_hidden, 1)),
    )


if __name__ == "__main__":
    d_pe, d_hidden = 32, 32
    B, K, D = 4, 8, 32

    key = jax.random.PRNGKey(0)
    kf, kp = jax.random.split(key)
    features = jax.random.normal(kf, (B, K, D), dtype=jnp.float32)   # B x K x D
    lengths = jnp.array([8, 5, 7, 3], dtype=jnp.int32)               # B

    params = init_params(kp, d_pe, d_hidden)

    pooled, pool_weights = gpo2_pallas(features, lengths, params, d_pe, d_hidden)
    jax.block_until_ready((pooled, pool_weights))

    pooled_ref, weights_ref = gpo2_reference(features, lengths, params, d_pe, d_hidden)
    assert pooled.shape == (B, D) and pool_weights.shape == (B, K, 1)
    assert jnp.allclose(pooled, pooled_ref, atol=2e-3, rtol=2e-2), "pooled mismatch"
    assert jnp.allclose(pool_weights, weights_ref, atol=2e-3, rtol=2e-2), "weights mismatch"

    print("KERNEL_OK")
</pallas_src>

<mosaic_0001>
module attributes {stable_mosaic.version = 11 : i64} {
  func.func @_gpo2_kernel(%arg0: memref<8x8x32xf32, #tpu.memory_space<vmem>>, %arg1: memref<8x8x1xf32, #tpu.memory_space<vmem>>, %arg2: memref<8x8x32xf32, #tpu.memory_space<vmem>>, %arg3: memref<32x96xf32, #tpu.memory_space<vmem>>, %arg4: memref<32x96xf32, #tpu.memory_space<vmem>>, %arg5: memref<1x96xf32, #tpu.memory_space<vmem>>, %arg6: memref<1x96xf32, #tpu.memory_space<vmem>>, %arg7: memref<32x96xf32, #tpu.memory_space<vmem>>, %arg8: memref<32x96xf32, #tpu.memory_space<vmem>>, %arg9: memref<1x96xf32, #tpu.memory_space<vmem>>, %arg10: memref<1x96xf32, #tpu.memory_space<vmem>>, %arg11: memref<1x32xf32, #tpu.memory_space<vmem>>, %arg12: memref<8x8x1xf32, #tpu.memory_space<vmem>>, %arg13: memref<8x32xf32, #tpu.memory_space<vmem>>, %arg14: memref<8x8x32xf32, #tpu.memory_space<vmem>>, %arg15: memref<8x8x32xf32, #tpu.memory_space<vmem>>) attributes {dimension_semantics = [], scalar_prefetch = 0 : i64, scratch_operands = 2 : i64, tpu.core_type = #tpu.core_type<tc>} {
    %c0 = arith.constant 0 : index
    %c0_0 = arith.constant 0 : index
    %c0_1 = arith.constant 0 : index
    %0 = vector.load %arg0[%c0, %c0_0, %c0_1] : memref<8x8x32xf32, #tpu.memory_space<vmem>>, vector<8x8x32xf32>
    %1 = vector.shape_cast %0 : vector<8x8x32xf32> to vector<64x32xf32>
    %c0_2 = arith.constant 0 : index
    %c0_3 = arith.constant 0 : index
    %2 = vector.load %arg3[%c0_2, %c0_3] : memref<32x96xf32, #tpu.memory_space<vmem>>, vector<32x96xf32>
    %cst = arith.constant dense<0.000000e+00> : vector<64x96xf32>
    %3 = tpu.matmul %1, %2, %cst {dimension_numbers = #tpu.dot_dimension_numbers<[1], [0], [0], [1], [0, 0, 1, 1], [], []>} : vector<64x32xf32>, vector<32x96xf32>, vector<64x96xf32> -> vector<64x96xf32>
    %c0_4 = arith.constant 0 : index
    %c0_5 = arith.constant 0 : index
    %4 = vector.load %arg5[%c0_4, %c0_5] : memref<1x96xf32, #tpu.memory_space<vmem>>, vector<1x96xf32>
    %5 = vector.broadcast %4 : vector<1x96xf32> to vector<64x96xf32>
    %6 = arith.addf %3, %5 : vector<64x96xf32>
    %7 = vector.shape_cast %6 : vector<64x96xf32> to vector<8x8x96xf32>
    %c0_6 = arith.constant 0 : index
    %c0_7 = arith.constant 0 : index
    %8 = vector.load %arg7[%c0_6, %c0_7] : memref<32x96xf32, #tpu.memory_space<vmem>>, vector<32x96xf32>
    %cst_8 = arith.constant dense<0.000000e+00> : vector<64x96xf32>
    %9 = tpu.matmul %1, %8, %cst_8 {dimension_numbers = #tpu.dot_dimension_numbers<[1], [0], [0], [1], [0, 0, 1, 1], [], []>} : vector<64x32xf32>, vector<32x96xf32>, vector<64x96xf32> -> vector<64x96xf32>
    %c0_9 = arith.constant 0 : index
    %c0_10 = arith.constant 0 : index
    %10 = vector.load %arg9[%c0_9, %c0_10] : memref<1x96xf32, #tpu.memory_space<vmem>>, vector<1x96xf32>
    %11 = vector.broadcast %10 : vector<1x96xf32> to vector<64x96xf32>
    %12 = arith.addf %9, %11 : vector<64x96xf32>
    %13 = vector.shape_cast %12 : vector<64x96xf32> to vector<8x8x96xf32>
    %c0_11 = arith.constant 0 : index
    %c0_12 = arith.constant 0 : index
    %c0_13 = arith.constant 0 : index
    %14 = vector.load %arg1[%c0_11, %c0_12, %c0_13] : memref<8x8x1xf32, #tpu.memory_space<vmem>>, vector<8x8x1xf32>
    %c0_14 = arith.constant 0 : index
    %c0_15 = arith.constant 0 : index
    %15 = vector.load %arg4[%c0_14, %c0_15] : memref<32x96xf32, #tpu.memory_space<vmem>>, vector<32x96xf32>
    %c0_16 = arith.constant 0 : index
    %c0_17 = arith.constant 0 : index
    %16 = vector.load %arg8[%c0_16, %c0_17] : memref<32x96xf32, #tpu.memory_space<vmem>>, vector<32x96xf32>
    %c0_18 = arith.constant 0 : index
    %c0_19 = arith.constant 0 : index
    %17 = vector.load %arg6[%c0_18, %c0_19] : memref<1x96xf32, #tpu.memory_space<vmem>>, vector<1x96xf32>
    %c0_20 = arith.constant 0 : index
    %c0_21 = arith.constant 0 : index
    %18 = vector.load %arg10[%c0_20, %c0_21] : memref<1x96xf32, #tpu.memory_space<vmem>>, vector<1x96xf32>
    %cst_22 = arith.constant 0.000000e+00 : f32
    %19 = vector.broadcast %cst_22 : f32 to vector<8x32xf32>
    %cst_23 = arith.constant 0.000000e+00 : f32
    %20 = vector.broadcast %cst_23 : f32 to vector<8x32xf32>
    %21 = vector.extract_strided_slice %7 {offsets = [0, 0, 0], sizes = [1, 8, 96], strides = [1, 1, 1]} : vector<8x8x96xf32> to vector<1x8x96xf32>
    %22 = vector.shape_cast %21 : vector<1x8x96xf32> to vector<8x96xf32>
    %23 = vector.extract_strided_slice %14 {offsets = [0, 0, 0], sizes = [1, 8, 1], strides = [1, 1, 1]} : vector<8x8x1xf32> to vector<1x8x1xf32>
    %24 = vector.shape_cast %23 : vector<1x8x1xf32> to vector<8x1xf32>
    %cst_24 = arith.constant dense<0.000000e+00> : vector<8x96xf32>
    %25 = tpu.matmul %19, %15, %cst_24 {dimension_numbers = #tpu.dot_dimension_numbers<[1], [0], [0], [1], [0, 0, 1, 1], [], []>} : vector<8x32xf32>, vector<32x96xf32>, vector<8x96xf32> -> vector<8x96xf32>
    %26 = vector.broadcast %17 : vector<1x96xf32> to vector<8x96xf32>
    %27 = arith.addf %25, %26 : vector<8x96xf32>
    %28 = vector.extract_strided_slice %22 {offsets = [0, 0], sizes = [8, 32], strides = [1, 1]} : vector<8x96xf32> to vector<8x32xf32>
    %29 = vector.extract_strided_slice %27 {offsets = [0, 0], sizes = [8, 32], strides = [1, 1]} : vector<8x96xf32> to vector<8x32xf32>
    %30 = arith.addf %28, %29 : vector<8x32xf32>
    %31 = arith.negf %30 : vector<8x32xf32>
    %32 = math.exp %31 : vector<8x32xf32>
    %cst_25 = arith.constant 1.000000e+00 : f32
    %33 = vector.broadcast %cst_25 : f32 to vector<8x32xf32>
    %34 = arith.addf %33, %32 : vector<8x32xf32>
    %35 = arith.divf %33, %34 : vector<8x32xf32>
    %36 = vector.extract_strided_slice %22 {offsets = [0, 32], sizes = [8, 32], strides = [1, 1]} : vector<8x96xf32> to vector<8x32xf32>
    %37 = vector.extract_strided_slice %27 {offsets = [0, 32], sizes = [8, 32], strides = [1, 1]} : vector<8x96xf32> to vector<8x32xf32>
    %38 = arith.addf %36, %37 : vector<8x32xf32>
    %39 = arith.negf %38 : vector<8x32xf32>
    %40 = math.exp %39 : vector<8x32xf32>
    %cst_26 = arith.constant 1.000000e+00 : f32
    %41 = vector.broadcast %cst_26 : f32 to vector<8x32xf32>
    %42 = arith.addf %41, %40 : vector<8x32xf32>
    %43 = arith.divf %41, %42 : vector<8x32xf32>
    %44 = vector.extract_strided_slice %22 {offsets = [0, 64], sizes = [8, 32], strides = [1, 1]} : vector<8x96xf32> to vector<8x32xf32>
    %45 = vector.extract_strided_slice %27 {offsets = [0, 64], sizes = [8, 32], strides = [1, 1]} : vector<8x96xf32> to vector<8x32xf32>
    %46 = arith.mulf %35, %45 : vector<8x32xf32>
    %47 = arith.addf %44, %46 : vector<8x32xf32>
    %48 = math.tanh %47 : vector<8x32xf32>
    %cst_27 = arith.constant 1.000000e+00 : f32
    %49 = vector.broadcast %cst_27 : f32 to vector<8x32xf32>
    %50 = arith.subf %49, %43 : vector<8x32xf32>
    %51 = arith.mulf %50, %48 : vector<8x32xf32>
    %52 = arith.mulf %43, %19 : vector<8x32xf32>
    %53 = arith.addf %51, %52 : vector<8x32xf32>
    %54 = vector.broadcast %24 : vector<8x1xf32> to vector<8x32xf32>
    %55 = arith.mulf %54, %53 : vector<8x32xf32>
    %cst_28 = arith.constant 1.000000e+00 : f32
    %56 = vector.broadcast %cst_28 : f32 to vector<8x1xf32>
    %57 = arith.subf %56, %24 : vector<8x1xf32>
    %58 = vector.broadcast %57 : vector<8x1xf32> to vector<8x32xf32>
    %59 = arith.mulf %58, %19 : vector<8x32xf32>
    %60 = arith.addf %55, %59 : vector<8x32xf32>
    %61 = vector.extract_strided_slice %13 {offsets = [7, 0, 0], sizes = [1, 8, 96], strides = [1, 1, 1]} : vector<8x8x96xf32> to vector<1x8x96xf32>
    %62 = vector.shape_cast %61 : vector<1x8x96xf32> to vector<8x96xf32>
    %63 = vector.extract_strided_slice %14 {offsets = [7, 0, 0], sizes = [1, 8, 1], strides = [1, 1, 1]} : vector<8x8x1xf32> to vector<1x8x1xf32>
    %64 = vector.shape_cast %63 : vector<1x8x1xf32> to vector<8x1xf32>
    %cst_29 = arith.constant dense<0.000000e+00> : vector<8x96xf32>
    %65 = tpu.matmul %20, %16, %cst_29 {dimension_numbers = #tpu.dot_dimension_numbers<[1], [0], [0], [1], [0, 0, 1, 1], [], []>} : vector<8x32xf32>, vector<32x96xf32>, vector<8x96xf32> -> vector<8x96xf32>
    %66 = vector.broadcast %18 : vector<1x96xf32> to vector<8x96xf32>
    %67 = arith.addf %65, %66 : vector<8x96xf32>
    %68 = vector.extract_strided_slice %62 {offsets = [0, 0], sizes = [8, 32], strides = [1, 1]} : vector<8x96xf32> to vector<8x32xf32>
    %69 = vector.extract_strided_slice %67 {offsets = [0, 0], sizes = [8, 32], strides = [1, 1]} : vector<8x96xf32> to vector<8x32xf32>
    %70 = arith.addf %68, %69 : vector<8x32xf32>
    %71 = arith.negf %70 : vector<8x32xf32>
    %72 = math.exp %71 : vector<8x32xf32>
    %cst_30 = arith.constant 1.000000e+00 : f32
    %73 = vector.broadcast %cst_30 : f32 to vector<8x32xf32>
    %74 = arith.addf %73, %72 : vector<8x32xf32>
    %75 = arith.divf %73, %74 : vector<8x32xf32>
    %76 = vector.extract_strided_slice %62 {offsets = [0, 32], sizes = [8, 32], strides = [1, 1]} : vector<8x96xf32> to vector<8x32xf32>
    %77 = vector.extract_strided_slice %67 {offsets = [0, 32], sizes = [8, 32], strides = [1, 1]} : vector<8x96xf32> to vector<8x32xf32>
    %78 = arith.addf %76, %77 : vector<8x32xf32>
    %79 = arith.negf %78 : vector<8x32xf32>
    %80 = math.exp %79 : vector<8x32xf32>
    %cst_31 = arith.constant 1.000000e+00 : f32
    %81 = vector.broadcast %cst_31 : f32 to vector<8x32xf32>
    %82 = arith.addf %81, %80 : vector<8x32xf32>
    %83 = arith.divf %81, %82 : vector<8x32xf32>
    %84 = vector.extract_strided_slice %62 {offsets = [0, 64], sizes = [8, 32], strides = [1, 1]} : vector<8x96xf32> to vector<8x32xf32>
    %85 = vector.extract_strided_slice %67 {offsets = [0, 64], sizes = [8, 32], strides = [1, 1]} : vector<8x96xf32> to vector<8x32xf32>
    %86 = arith.mulf %75, %85 : vector<8x32xf32>
    %87 = arith.addf %84, %86 : vector<8x32xf32>
    %88 = math.tanh %87 : vector<8x32xf32>
    %cst_32 = arith.constant 1.000000e+00 : f32
    %89 = vector.broadcast %cst_32 : f32 to vector<8x32xf32>
    %90 = arith.subf %89, %83 : vector<8x32xf32>
    %91 = arith.mulf %90, %88 : vector<8x32xf32>
    %92 = arith.mulf %83, %20 : vector<8x32xf32>
    %93 = arith.addf %91, %92 : vector<8x32xf32>
    %94 = vector.broadcast %64 : vector<8x1xf32> to vector<8x32xf32>
    %95 = arith.mulf %94, %93 : vector<8x32xf32>
    %cst_33 = arith.constant 1.000000e+00 : f32
    %96 = vector.broadcast %cst_33 : f32 to vector<8x1xf32>
    %97 = arith.subf %96, %64 : vector<8x1xf32>
    %98 = vector.broadcast %97 : vector<8x1xf32> to vector<8x32xf32>
    %99 = arith.mulf %98, %20 : vector<8x32xf32>
    %100 = arith.addf %95, %99 : vector<8x32xf32>
    %c0_34 = arith.constant 0 : index
    %c0_35 = arith.constant 0 : index
    %c0_36 = arith.constant 0 : index
    %101 = vector.load %arg14[%c0_34, %c0_35, %c0_36] : memref<8x8x32xf32, #tpu.memory_space<vmem>>, vector<1x8x32xf32>
    %102 = vector.shape_cast %101 : vector<1x8x32xf32> to vector<8x32xf32>
    %103 = vector.shape_cast %60 : vector<8x32xf32> to vector<1x8x32xf32>
    tpu.vector_store %arg14[%c0_34, %c0_35, %c0_36], %103 {strides = array<i32>} : memref<8x8x32xf32, #tpu.memory_space<vmem>>, vector<1x8x32xf32>,
    %c7 = arith.constant 7 : index
    %c0_37 = arith.constant 0 : index
    %c0_38 = arith.constant 0 : index
    %104 = vector.load %arg15[%c7, %c0_37, %c0_38] : memref<8x8x32xf32, #tpu.memory_space<vmem>>, vector<1x8x32xf32>
    %105 = vector.shape_cast %104 : vector<1x8x32xf32> to vector<8x32xf32>
    %106 = vector.shape_cast %100 : vector<8x32xf32> to vector<1x8x32xf32>
    tpu.vector_store %arg15[%c7, %c0_37, %c0_38], %106 {strides = array<i32>} : memref<8x8x32xf32, #tpu.memory_space<vmem>>, vector<1x8x32xf32>,
    %107 = vector.extract_strided_slice %7 {offsets = [1, 0, 0], sizes = [1, 8, 96], strides = [1, 1, 1]} : vector<8x8x96xf32> to vector<1x8x96xf32>
    %108 = vector.shape_cast %107 : vector<1x8x96xf32> to vector<8x96xf32>
    %109 = vector.extract_strided_slice %14 {offsets = [1, 0, 0], sizes = [1, 8, 1], strides = [1, 1, 1]} : vector<8x8x1xf32> to vector<1x8x1xf32>
    %110 = vector.shape_cast %109 : vector<1x8x1xf32> to vector<8x1xf32>
    %cst_39 = arith.constant dense<0.000000e+00> : vector<8x96xf32>
    %111 = tpu.matmul %60, %15, %cst_39 {dimension_numbers = #tpu.dot_dimension_numbers<[1], [0], [0], [1], [0, 0, 1, 1], [], []>} : vector<8x32xf32>, vector<32x96xf32>, vector<8x96xf32> -> vector<8x96xf32>
    %112 = vector.broadcast %17 : vector<1x96xf32> to vector<8x96xf32>
    %113 = arith.addf %111, %112 : vector<8x96xf32>
    %114 = vector.extract_strided_slice %108 {offsets = [0, 0], sizes = [8, 32], strides = [1, 1]} : vector<8x96xf32> to vector<8x32xf32>
    %115 = vector.extract_strided_slice %113 {offsets = [0, 0], sizes = [8, 32], strides = [1, 1]} : vector<8x96xf32> to vector<8x32xf32>
    %116 = arith.addf %114, %115 : vector<8x32xf32>
    %117 = arith.negf %116 : vector<8x32xf32>
    %118 = math.exp %117 : vector<8x32xf32>
    %cst_40 = arith.constant 1.000000e+00 : f32
    %119 = vector.broadcast %cst_40 : f32 to vector<8x32xf32>
    %120 = arith.addf %119, %118 : vector<8x32xf32>
    %121 = arith.divf %119, %120 : vector<8x32xf32>
    %122 = vector.extract_strided_slice %108 {offsets = [0, 32], sizes = [8, 32], strides = [1, 1]} : vector<8x96xf32> to vector<8x32xf32>
    %123 = vector.extract_strided_slice %113 {offsets = [0, 32], sizes = [8, 32], strides = [1, 1]} : vector<8x96xf32> to vector<8x32xf32>
    %124 = arith.addf %122, %123 : vector<8x32xf32>
    %125 = arith.negf %124 : vector<8x32xf32>
    %126 = math.exp %125 : vector<8x32xf32>
    %cst_41 = arith.constant 1.000000e+00 : f32
    %127 = vector.broadcast %cst_41 : f32 to vector<8x32xf32>
    %128 = arith.addf %127, %126 : vector<8x32xf32>
    %129 = arith.divf %127, %128 : vector<8x32xf32>
    %130 = vector.extract_strided_slice %108 {offsets = [0, 64], sizes = [8, 32], strides = [1, 1]} : vector<8x96xf32> to vector<8x32xf32>
    %131 = vector.extract_strided_slice %113 {offsets = [0, 64], sizes = [8, 32], strides = [1, 1]} : vector<8x96xf32> to vector<8x32xf32>
    %132 = arith.mulf %121, %131 : vector<8x32xf32>
    %133 = arith.addf %130, %132 : vector<8x32xf32>
    %134 = math.tanh %133 : vector<8x32xf32>
    %cst_42 = arith.constant 1.000000e+00 : f32
    %135 = vector.broadcast %cst_42 : f32 to vector<8x32xf32>
    %136 = arith.subf %135, %129 : vector<8x32xf32>
    %137 = arith.mulf %136, %134 : vector<8x32xf32>
    %138 = arith.mulf %129, %60 : vector<8x32xf32>
    %139 = arith.addf %137, %138 : vector<8x32xf32>
    %140 = vector.broadcast %110 : vector<8x1xf32> to vector<8x32xf32>
    %141 = arith.mulf %140, %139 : vector<8x32xf32>
    %cst_43 = arith.constant 1.000000e+00 : f32
    %142 = vector.broadcast %cst_43 : f32 to vector<8x1xf32>
    %143 = arith.subf %142, %110 : vector<8x1xf32>
    %144 = vector.broadcast %143 : vector<8x1xf32> to vector<8x32xf32>
    %145 = arith.mulf %144, %60 : vector<8x32xf32>
    %146 = arith.addf %141, %145 : vector<8x32xf32>
    %147 = vector.extract_strided_slice %13 {offsets = [6, 0, 0], sizes = [1, 8, 96], strides = [1, 1, 1]} : vector<8x8x96xf32> to vector<1x8x96xf32>
    %148 = vector.shape_cast %147 : vector<1x8x96xf32> to vector<8x96xf32>
    %149 = vector.extract_strided_slice %14 {offsets = [6, 0, 0], sizes = [1, 8, 1], strides = [1, 1, 1]} : vector<8x8x1xf32> to vector<1x8x1xf32>
    %150 = vector.shape_cast %149 : vector<1x8x1xf32> to vector<8x1xf32>
    %cst_44 = arith.constant dense<0.000000e+00> : vector<8x96xf32>
    %151 = tpu.matmul %100, %16, %cst_44 {dimension_numbers = #tpu.dot_dimension_numbers<[1], [0], [0], [1], [0, 0, 1, 1], [], []>} : vector<8x32xf32>, vector<32x96xf32>, vector<8x96xf32> -> vector<8x96xf32>
    %152 = vector.broadcast %18 : vector<1x96xf32> to vector<8x96xf32>
    %153 = arith.addf %151, %152 : vector<8x96xf32>
    %154 = vector.extract_strided_slice %148 {offsets = [0, 0], sizes = [8, 32], strides = [1, 1]} : vector<8x96xf32> to vector<8x32xf32>
    %155 = vector.extract_strided_slice %153 {offsets = [0, 0], sizes = [8, 32], strides = [1, 1]} : vector<8x96xf32> to vector<8x32xf32>
    %156 = arith.addf %154, %155 : vector<8x32xf32>
    %157 = arith.negf %156 : vector<8x32xf32>
    %158 = math.exp %157 : vector<8x32xf32>
    %cst_45 = arith.constant 1.000000e+00 : f32
    %159 = vector.broadcast %cst_45 : f32 to vector<8x32xf32>
    %160 = arith.addf %159, %158 : vector<8x32xf32>
    %161 = arith.divf %159, %160 : vector<8x32xf32>
    %162 = vector.extract_strided_slice %148 {offsets = [0, 32], sizes = [8, 32], strides = [1, 1]} : vector<8x96xf32> to vector<8x32xf32>
    %163 = vector.extract_strided_slice %153 {offsets = [0, 32], sizes = [8, 32], strides = [1, 1]} : vector<8x96xf32> to vector<8x32xf32>
    %164 = arith.addf %162, %163 : vector<8x32xf32>
    %165 = arith.negf %164 : vector<8x32xf32>
    %166 = math.exp %165 : vector<8x32xf32>
    %cst_46 = arith.constant 1.000000e+00 : f32
    %167 = vector.broadcast %cst_46 : f32 to vector<8x32xf32>
    %168 = arith.addf %167, %166 : vector<8x32xf32>
    %169 = arith.divf %167, %168 : vector<8x32xf32>
    %170 = vector.extract_strided_slice %148 {offsets = [0, 64], sizes = [8, 32], strides = [1, 1]} : vector<8x96xf32> to vector<8x32xf32>
    %171 = vector.extract_strided_slice %153 {offsets = [0, 64], sizes = [8, 32], strides = [1, 1]} : vector<8x96xf32> to vector<8x32xf32>
    %172 = arith.mulf %161, %171 : vector<8x32xf32>
    %173 = arith.addf %170, %172 : vector<8x32xf32>
    %174 = math.tanh %173 : vector<8x32xf32>
    %cst_47 = arith.constant 1.000000e+00 : f32
    %175 = vector.broadcast %cst_47 : f32 to vector<8x32xf32>
    %176 = arith.subf %175, %169 : vector<8x32xf32>
    %177 = arith.mulf %176, %174 : vector<8x32xf32>
    %178 = arith.mulf %169, %100 : vector<8x32xf32>
    %179 = arith.addf %177, %178 : vector<8x32xf32>
    %180 = vector.broadcast %150 : vector<8x1xf32> to vector<8x32xf32>
    %181 = arith.mulf %180, %179 : vector<8x32xf32>
    %cst_48 = arith.constant 1.000000e+00 : f32
    %182 = vector.broadcast %cst_48 : f32 to vector<8x1xf32>
    %183 = arith.subf %182, %150 : vector<8x1xf32>
    %184 = vector.broadcast %183 : vector<8x1xf32> to vector<8x32xf32>
    %185 = arith.mulf %184, %100 : vector<8x32xf32>
    %186 = arith.addf %181, %185 : vector<8x32xf32>
    %c1 = arith.constant 1 : index
    %c0_49 = arith.constant 0 : index
    %c0_50 = arith.constant 0 : index
    %187 = vector.load %arg14[%c1, %c0_49, %c0_50] : memref<8x8x32xf32, #tpu.memory_space<vmem>>, vector<1x8x32xf32>
    %188 = vector.shape_cast %187 : vector<1x8x32xf32> to vector<8x32xf32>
    %189 = vector.shape_cast %146 : vector<8x32xf32> to vector<1x8x32xf32>
    tpu.vector_store %arg14[%c1, %c0_49, %c0_50], %189 {strides = array<i32>} : memref<8x8x32xf32, #tpu.memory_space<vmem>>, vector<1x8x32xf32>,
    %c6 = arith.constant 6 : index
    %c0_51 = arith.constant 0 : index
    %c0_52 = arith.constant 0 : index
    %190 = vector.load %arg15[%c6, %c0_51, %c0_52] : memref<8x8x32xf32, #tpu.memory_space<vmem>>, vector<1x8x32xf32>
    %191 = vector.shape_cast %190 : vector<1x8x32xf32> to vector<8x32xf32>
    %192 = vector.shape_cast %186 : vector<8x32xf32> to vector<1x8x32xf32>
    tpu.vector_store %arg15[%c6, %c0_51, %c0_52], %192 {strides = array<i32>} : memref<8x8x32xf32, #tpu.memory_space<vmem>>, vector<1x8x32xf32>,
    %193 = vector.extract_strided_slice %7 {offsets = [2, 0, 0], sizes = [1, 8, 96], strides = [1, 1, 1]} : vector<8x8x96xf32> to vector<1x8x96xf32>
    %194 = vector.shape_cast %193 : vector<1x8x96xf32> to vector<8x96xf32>
    %195 = vector.extract_strided_slice %14 {offsets = [2, 0, 0], sizes = [1, 8, 1], strides = [1, 1, 1]} : vector<8x8x1xf32> to vector<1x8x1xf32>
    %196 = vector.shape_cast %195 : vector<1x8x1xf32> to vector<8x1xf32>
    %cst_53 = arith.constant dense<0.000000e+00> : vector<8x96xf32>
    %197 = tpu.matmul %146, %15, %cst_53 {dimension_numbers = #tpu.dot_dimension_numbers<[1], [0], [0], [1], [0, 0, 1, 1], [], []>} : vector<8x32xf32>, vector<32x96xf32>, vector<8x96xf32> -> vector<8x96xf32>
    %198 = vector.broadcast %17 : vector<1x96xf32> to vector<8x96xf32>
    %199 = arith.addf %197, %198 : vector<8x96xf32>
    %200 = vector.extract_strided_slice %194 {offsets = [0, 0], sizes = [8, 32], strides = [1, 1]} : vector<8x96xf32> to vector<8x32xf32>
    %201 = vector.extract_strided_slice %199 {offsets = [0, 0], sizes = [8, 32], strides = [1, 1]} : vector<8x96xf32> to vector<8x32xf32>
    %202 = arith.addf %200, %201 : vector<8x32xf32>
    %203 = arith.negf %202 : vector<8x32xf32>
    %204 = math.exp %203 : vector<8x32xf32>
    %cst_54 = arith.constant 1.000000e+00 : f32
    %205 = vector.broadcast %cst_54 : f32 to vector<8x32xf32>
    %206 = arith.addf %205, %204 : vector<8x32xf32>
    %207 = arith.divf %205, %206 : vector<8x32xf32>
    %208 = vector.extract_strided_slice %194 {offsets = [0, 32], sizes = [8, 32], strides = [1, 1]} : vector<8x96xf32> to vector<8x32xf32>
    %209 = vector.extract_strided_slice %199 {offsets = [0, 32], sizes = [8, 32], strides = [1, 1]} : vector<8x96xf32> to vector<8x32xf32>
    %210 = arith.addf %208, %209 : vector<8x32xf32>
    %211 = arith.negf %210 : vector<8x32xf32>
    %212 = math.exp %211 : vector<8x32xf32>
    %cst_55 = arith.constant 1.000000e+00 : f32
    %213 = vector.broadcast %cst_55 : f32 to vector<8x32xf32>
    %214 = arith.addf %213, %212 : vector<8x32xf32>
    %215 = arith.divf %213, %214 : vector<8x32xf32>
    %216 = vector.extract_strided_slice %194 {offsets = [0, 64], sizes = [8, 32], strides = [1, 1]} : vector<8x96xf32> to vector<8x32xf32>
    %217 = vector.extract_strided_slice %199 {offsets = [0, 64], sizes = [8, 32], strides = [1, 1]} : vector<8x96xf32> to vector<8x32xf32>
    %218 = arith.mulf %207, %217 : vector<8x32xf32>
    %219 = arith.addf %216, %218 : vector<8x32xf32>
    %220 = math.tanh %219 : vector<8x32xf32>
    %cst_56 = arith.constant 1.000000e+00 : f32
    %221 = vector.broadcast %cst_56 : f32 to vector<8x32xf32>
    %222 = arith.subf %221, %215 : vector<8x32xf32>
    %223 = arith.mulf %222, %220 : vector<8x32xf32>
    %224 = arith.mulf %215, %146 : vector<8x32xf32>
    %225 = arith.addf %223, %224 : vector<8x32xf32>
    %226 = vector.broadcast %196 : vector<8x1xf32> to vector<8x32xf32>
    %227 = arith.mulf %226, %225 : vector<8x32xf32>
    %cst_57 = arith.constant 1.000000e+00 : f32
    %228 = vector.broadcast %cst_57 : f32 to vector<8x1xf32>
    %229 = arith.subf %228, %196 : vector<8x1xf32>
    %230 = vector.broadcast %229 : vector<8x1xf32> to vector<8x32xf32>
    %231 = arith.mulf %230, %146 : vector<8x32xf32>
    %232 = arith.addf %227, %231 : vector<8x32xf32>
    %233 = vector.extract_strided_slice %13 {offsets = [5, 0, 0], sizes = [1, 8, 96], strides = [1, 1, 1]} : vector<8x8x96xf32> to vector<1x8x96xf32>
    %234 = vector.shape_cast %233 : vector<1x8x96xf32> to vector<8x96xf32>
    %235 = vector.extract_strided_slice %14 {offsets = [5, 0, 0], sizes = [1, 8, 1], strides = [1, 1, 1]} : vector<8x8x1xf32> to vector<1x8x1xf32>
    %236 = vector.shape_cast %235 : vector<1x8x1xf32> to vector<8x1xf32>
    %cst_58 = arith.constant dense<0.000000e+00> : vector<8x96xf32>
    %237 = tpu.matmul %186, %16, %cst_58 {dimension_numbers = #tpu.dot_dimension_numbers<[1], [0], [0], [1], [0, 0, 1, 1], [], []>} : vector<8x32xf32>, vector<32x96xf32>, vector<8x96xf32> -> vector<8x96xf32>
    %238 = vector.broadcast %18 : vector<1x96xf32> to vector<8x96xf32>
    %239 = arith.addf %237, %238 : vector<8x96xf32>
    %240 = vector.extract_strided_slice %234 {offsets = [0, 0], sizes = [8, 32], strides = [1, 1]} : vector<8x96xf32> to vector<8x32xf32>
    %241 = vector.extract_strided_slice %239 {offsets = [0, 0], sizes = [8, 32], strides = [1, 1]} : vector<8x96xf32> to vector<8x32xf32>
    %242 = arith.addf %240, %241 : vector<8x32xf32>
    %243 = arith.negf %242 : vector<8x32xf32>
    %244 = math.exp %243 : vector<8x32xf32>
    %cst_59 = arith.constant 1.000000e+00 : f32
    %245 = vector.broadcast %cst_59 : f32 to vector<8x32xf32>
    %246 = arith.addf %245, %244 : vector<8x32xf32>
    %247 = arith.divf %245, %246 : vector<8x32xf32>
    %248 = vector.extract_strided_slice %234 {offsets = [0, 32], sizes = [8, 32], strides = [1, 1]} : vector<8x96xf32> to vector<8x32xf32>
    %249 = vector.extract_strided_slice %239 {offsets = [0, 32], sizes = [8, 32], strides = [1, 1]} : vector<8x96xf32> to vector<8x32xf32>
    %250 = arith.addf %248, %249 : vector<8x32xf32>
    %251 = arith.negf %250 : vector<8x32xf32>
    %252 = math.exp %251 : vector<8x32xf32>
    %cst_60 = arith.constant 1.000000e+00 : f32
    %253 = vector.broadcast %cst_60 : f32 to vector<8x32xf32>
    %254 = arith.addf %253, %252 : vector<8x32xf32>
    %255 = arith.divf %253, %254 : vector<8x32xf32>
    %256 = vector.extract_strided_slice %234 {offsets = [0, 64], sizes = [8, 32], strides = [1, 1]} : vector<8x96xf32> to vector<8x32xf32>
    %257 = vector.extract_strided_slice %239 {offsets = [0, 64], sizes = [8, 32], strides = [1, 1]} : vector<8x96xf32> to vector<8x32xf32>
    %258 = arith.mulf %247, %257 : vector<8x32xf32>
    %259 = arith.addf %256, %258 : vector<8x32xf32>
    %260 = math.tanh %259 : vector<8x32xf32>
    %cst_61 = arith.constant 1.000000e+00 : f32
    %261 = vector.broadcast %cst_61 : f32 to vector<8x32xf32>
    %262 = arith.subf %261, %255 : vector<8x32xf32>
    %263 = arith.mulf %262, %260 : vector<8x32xf32>
    %264 = arith.mulf %255, %186 : vector<8x32xf32>
    %265 = arith.addf %263, %264 : vector<8x32xf32>
    %266 = vector.broadcast %236 : vector<8x1xf32> to vector<8x32xf32>
    %267 = arith.mulf %266, %265 : vector<8x32xf32>
    %cst_62 = arith.constant 1.000000e+00 : f32
    %268 = vector.broadcast %cst_62 : f32 to vector<8x1xf32>
    %269 = arith.subf %268, %236 : vector<8x1xf32>
    %270 = vector.broadcast %269 : vector<8x1xf32> to vector<8x32xf32>
    %271 = arith.mulf %270, %186 : vector<8x32xf32>
    %272 = arith.addf %267, %271 : vector<8x32xf32>
    %c2 = arith.constant 2 : index
    %c0_63 = arith.constant 0 : index
    %c0_64 = arith.constant 0 : index
    %273 = vector.load %arg14[%c2, %c0_63, %c0_64] : memref<8x8x32xf32, #tpu.memory_space<vmem>>, vector<1x8x32xf32>
    %274 = vector.shape_cast %273 : vector<1x8x32xf32> to vector<8x32xf32>
    %275 = vector.shape_cast %232 : vector<8x32xf32> to vector<1x8x32xf32>
    tpu.vector_store %arg14[%c2, %c0_63, %c0_64], %275 {strides = array<i32>} : memref<8x8x32xf32, #tpu.memory_space<vmem>>, vector<1x8x32xf32>,
    %c5 = arith.constant 5 : index
    %c0_65 = arith.constant 0 : index
    %c0_66 = arith.constant 0 : index
    %276 = vector.load %arg15[%c5, %c0_65, %c0_66] : memref<8x8x32xf32, #tpu.memory_space<vmem>>, vector<1x8x32xf32>
    %277 = vector.shape_cast %276 : vector<1x8x32xf32> to vector<8x32xf32>
    %278 = vector.shape_cast %272 : vector<8x32xf32> to vector<1x8x32xf32>
    tpu.vector_store %arg15[%c5, %c0_65, %c0_66], %278 {strides = array<i32>} : memref<8x8x32xf32, #tpu.memory_space<vmem>>, vector<1x8x32xf32>,
    %279 = vector.extract_strided_slice %7 {offsets = [3, 0, 0], sizes = [1, 8, 96], strides = [1, 1, 1]} : vector<8x8x96xf32> to vector<1x8x96xf32>
    %280 = vector.shape_cast %279 : vector<1x8x96xf32> to vector<8x96xf32>
    %281 = vector.extract_strided_slice %14 {offsets = [3, 0, 0], sizes = [1, 8, 1], strides = [1, 1, 1]} : vector<8x8x1xf32> to vector<1x8x1xf32>
    %282 = vector.shape_cast %281 : vector<1x8x1xf32> to vector<8x1xf32>
    %cst_67 = arith.constant dense<0.000000e+00> : vector<8x96xf32>
    %283 = tpu.matmul %232, %15, %cst_67 {dimension_numbers = #tpu.dot_dimension_numbers<[1], [0], [0], [1], [0, 0, 1, 1], [], []>} : vector<8x32xf32>, vector<32x96xf32>, vector<8x96xf32> -> vector<8x96xf32>
    %284 = vector.broadcast %17 : vector<1x96xf32> to vector<8x96xf32>
    %285 = arith.addf %283, %284 : vector<8x96xf32>
    %286 = vector.extract_strided_slice %280 {offsets = [0, 0], sizes = [8, 32], strides = [1, 1]} : vector<8x96xf32> to vector<8x32xf32>
    %287 = vector.extract_strided_slice %285 {offsets = [0, 0], sizes = [8, 32], strides = [1, 1]} : vector<8x96xf32> to vector<8x32xf32>
    %288 = arith.addf %286, %287 : vector<8x32xf32>
    %289 = arith.negf %288 : vector<8x32xf32>
    %290 = math.exp %289 : vector<8x32xf32>
    %cst_68 = arith.constant 1.000000e+00 : f32
    %291 = vector.broadcast %cst_68 : f32 to vector<8x32xf32>
    %292 = arith.addf %291, %290 : vector<8x32xf32>
    %293 = arith.divf %291, %292 : vector<8x32xf32>
    %294 = vector.extract_strided_slice %280 {offsets = [0, 32], sizes = [8, 32], strides = [1, 1]} : vector<8x96xf32> to vector<8x32xf32>
    %295 = vector.extract_strided_slice %285 {offsets = [0, 32], sizes = [8, 32], strides = [1, 1]} : vector<8x96xf32> to vector<8x32xf32>
    %296 = arith.addf %294, %295 : vector<8x32xf32>
    %297 = arith.negf %296 : vector<8x32xf32>
    %298 = math.exp %297 : vector<8x32xf32>
    %cst_69 = arith.constant 1.000000e+00 : f32
    %299 = vector.broadcast %cst_69 : f32 to vector<8x32xf32>
    %300 = arith.addf %299, %298 : vector<8x32xf32>
    %301 = arith.divf %299, %300 : vector<8x32xf32>
    %302 = vector.extract_strided_slice %280 {offsets = [0, 64], sizes = [8, 32], strides = [1, 1]} : vector<8x96xf32> to vector<8x32xf32>
    %303 = vector.extract_strided_slice %285 {offsets = [0, 64], sizes = [8, 32], strides = [1, 1]} : vector<8x96xf32> to vector<8x32xf32>
    %304 = arith.mulf %293, %303 : vector<8x32xf32>
    %305 = arith.addf %302, %304 : vector<8x32xf32>
    %306 = math.tanh %305 : vector<8x32xf32>
    %cst_70 = arith.constant 1.000000e+00 : f32
    %307 = vector.broadcast %cst_70 : f32 to vector<8x32xf32>
    %308 = arith.subf %307, %301 : vector<8x32xf32>
    %309 = arith.mulf %308, %306 : vector<8x32xf32>
    %310 = arith.mulf %301, %232 : vector<8x32xf32>
    %311 = arith.addf %309, %310 : vector<8x32xf32>
    %312 = vector.broadcast %282 : vector<8x1xf32> to vector<8x32xf32>
    %313 = arith.mulf %312, %311 : vector<8x32xf32>
    %cst_71 = arith.constant 1.000000e+00 : f32
    %314 = vector.broadcast %cst_71 : f32 to vector<8x1xf32>
    %315 = arith.subf %314, %282 : vector<8x1xf32>
    %316 = vector.broadcast %315 : vector<8x1xf32> to vector<8x32xf32>
    %317 = arith.mulf %316, %232 : vector<8x32xf32>
    %318 = arith.addf %313, %317 : vector<8x32xf32>
    %319 = vector.extract_strided_slice %13 {offsets = [4, 0, 0], sizes = [1, 8, 96], strides = [1, 1, 1]} : vector<8x8x96xf32> to vector<1x8x96xf32>
    %320 = vector.shape_cast %319 : vector<1x8x96xf32> to vector<8x96xf32>
    %321 = vector.extract_strided_slice %14 {offsets = [4, 0, 0], sizes = [1, 8, 1], strides = [1, 1, 1]} : vector<8x8x1xf32> to vector<1x8x1xf32>
    %322 = vector.shape_cast %321 : vector<1x8x1xf32> to vector<8x1xf32>
    %cst_72 = arith.constant dense<0.000000e+00> : vector<8x96xf32>
    %323 = tpu.matmul %272, %16, %cst_72 {dimension_numbers = #tpu.dot_dimension_numbers<[1], [0], [0], [1], [0, 0, 1, 1], [], []>} : vector<8x32xf32>, vector<32x96xf32>, vector<8x96xf32> -> vector<8x96xf32>
    %324 = vector.broadcast %18 : vector<1x96xf32> to vector<8x96xf32>
    %325 = arith.addf %323, %324 : vector<8x96xf32>
    %326 = vector.extract_strided_slice %320 {offsets = [0, 0], sizes = [8, 32], strides = [1, 1]} : vector<8x96xf32> to vector<8x32xf32>
    %327 = vector.extract_strided_slice %325 {offsets = [0, 0], sizes = [8, 32], strides = [1, 1]} : vector<8x96xf32> to vector<8x32xf32>
    %328 = arith.addf %326, %327 : vector<8x32xf32>
    %329 = arith.negf %328 : vector<8x32xf32>
    %330 = math.exp %329 : vector<8x32xf32>
    %cst_73 = arith.constant 1.000000e+00 : f32
    %331 = vector.broadcast %cst_73 : f32 to vector<8x32xf32>
    %332 = arith.addf %331, %330 : vector<8x32xf32>
    %333 = arith.divf %331, %332 : vector<8x32xf32>
    %334 = vector.extract_strided_slice %320 {offsets = [0, 32], sizes = [8, 32], strides = [1, 1]} : vector<8x96xf32> to vector<8x32xf32>
    %335 = vector.extract_strided_slice %325 {offsets = [0, 32], sizes = [8, 32], strides = [1, 1]} : vector<8x96xf32> to vector<8x32xf32>
    %336 = arith.addf %334, %335 : vector<8x32xf32>
    %337 = arith.negf %336 : vector<8x32xf32>
    %338 = math.exp %337 : vector<8x32xf32>
    %cst_74 = arith.constant 1.000000e+00 : f32
    %339 = vector.broadcast %cst_74 : f32 to vector<8x32xf32>
    %340 = arith.addf %339, %338 : vector<8x32xf32>
    %341 = arith.divf %339, %340 : vector<8x32xf32>
    %342 = vector.extract_strided_slice %320 {offsets = [0, 64], sizes = [8, 32], strides = [1, 1]} : vector<8x96xf32> to vector<8x32xf32>
    %343 = vector.extract_strided_slice %325 {offsets = [0, 64], sizes = [8, 32], strides = [1, 1]} : vector<8x96xf32> to vector<8x32xf32>
    %344 = arith.mulf %333, %343 : vector<8x32xf32>
    %345 = arith.addf %342, %344 : vector<8x32xf32>
    %346 = math.tanh %345 : vector<8x32xf32>
    %cst_75 = arith.constant 1.000000e+00 : f32
    %347 = vector.broadcast %cst_75 : f32 to vector<8x32xf32>
    %348 = arith.subf %347, %341 : vector<8x32xf32>
    %349 = arith.mulf %348, %346 : vector<8x32xf32>
    %350 = arith.mulf %341, %272 : vector<8x32xf32>
    %351 = arith.addf %349, %350 : vector<8x32xf32>
    %352 = vector.broadcast %322 : vector<8x1xf32> to vector<8x32xf32>
    %353 = arith.mulf %352, %351 : vector<8x32xf32>
    %cst_76 = arith.constant 1.000000e+00 : f32
    %354 = vector.broadcast %cst_76 : f32 to vector<8x1xf32>
    %355 = arith.subf %354, %322 : vector<8x1xf32>
    %356 = vector.broadcast %355 : vector<8x1xf32> to vector<8x32xf32>
    %357 = arith.mulf %356, %272 : vector<8x32xf32>
    %358 = arith.addf %353, %357 : vector<8x32xf32>
    %c3 = arith.constant 3 : index
    %c0_77 = arith.constant 0 : index
    %c0_78 = arith.constant 0 : index
    %359 = vector.load %arg14[%c3, %c0_77, %c0_78] : memref<8x8x32xf32, #tpu.memory_space<vmem>>, vector<1x8x32xf32>
    %360 = vector.shape_cast %359 : vector<1x8x32xf32> to vector<8x32xf32>
    %361 = vector.shape_cast %318 : vector<8x32xf32> to vector<1x8x32xf32>
    tpu.vector_store %arg14[%c3, %c0_77, %c0_78], %361 {strides = array<i32>} : memref<8x8x32xf32, #tpu.memory_space<vmem>>, vector<1x8x32xf32>,
    %c4 = arith.constant 4 : index
    %c0_79 = arith.constant 0 : index
    %c0_80 = arith.constant 0 : index
    %362 = vector.load %arg15[%c4, %c0_79, %c0_80] : memref<8x8x32xf32, #tpu.memory_space<vmem>>, vector<1x8x32xf32>
    %363 = vector.shape_cast %362 : vector<1x8x32xf32> to vector<8x32xf32>
    %364 = vector.shape_cast %358 : vector<8x32xf32> to vector<1x8x32xf32>
    tpu.vector_store %arg15[%c4, %c0_79, %c0_80], %364 {strides = array<i32>} : memref<8x8x32xf32, #tpu.memory_space<vmem>>, vector<1x8x32xf32>,
    %365 = vector.extract_strided_slice %7 {offsets = [4, 0, 0], sizes = [1, 8, 96], strides = [1, 1, 1]} : vector<8x8x96xf32> to vector<1x8x96xf32>
    %366 = vector.shape_cast %365 : vector<1x8x96xf32> to vector<8x96xf32>
    %367 = vector.extract_strided_slice %14 {offsets = [4, 0, 0], sizes = [1, 8, 1], strides = [1, 1, 1]} : vector<8x8x1xf32> to vector<1x8x1xf32>
    %368 = vector.shape_cast %367 : vector<1x8x1xf32> to vector<8x1xf32>
    %cst_81 = arith.constant dense<0.000000e+00> : vector<8x96xf32>
    %369 = tpu.matmul %318, %15, %cst_81 {dimension_numbers = #tpu.dot_dimension_numbers<[1], [0], [0], [1], [0, 0, 1, 1], [], []>} : vector<8x32xf32>, vector<32x96xf32>, vector<8x96xf32> -> vector<8x96xf32>
    %370 = vector.broadcast %17 : vector<1x96xf32> to vector<8x96xf32>
    %371 = arith.addf %369, %370 : vector<8x96xf32>
    %372 = vector.extract_strided_slice %366 {offsets = [0, 0], sizes = [8, 32], strides = [1, 1]} : vector<8x96xf32> to vector<8x32xf32>
    %373 = vector.extract_strided_slice %371 {offsets = [0, 0], sizes = [8, 32], strides = [1, 1]} : vector<8x96xf32> to vector<8x32xf32>
    %374 = arith.addf %372, %373 : vector<8x32xf32>
    %375 = arith.negf %374 : vector<8x32xf32>
    %376 = math.exp %375 : vector<8x32xf32>
    %cst_82 = arith.constant 1.000000e+00 : f32
    %377 = vector.broadcast %cst_82 : f32 to vector<8x32xf32>
    %378 = arith.addf %377, %376 : vector<8x32xf32>
    %379 = arith.divf %377, %378 : vector<8x32xf32>
    %380 = vector.extract_strided_slice %366 {offsets = [0, 32], sizes = [8, 32], strides = [1, 1]} : vector<8x96xf32> to vector<8x32xf32>
    %381 = vector.extract_strided_slice %371 {offsets = [0, 32], sizes = [8, 32], strides = [1, 1]} : vector<8x96xf32> to vector<8x32xf32>
    %382 = arith.addf %380, %381 : vector<8x32xf32>
    %383 = arith.negf %382 : vector<8x32xf32>
    %384 = math.exp %383 : vector<8x32xf32>
    %cst_83 = arith.constant 1.000000e+00 : f32
    %385 = vector.broadcast %cst_83 : f32 to vector<8x32xf32>
    %386 = arith.addf %385, %384 : vector<8x32xf32>
    %387 = arith.divf %385, %386 : vector<8x32xf32>
    %388 = vector.extract_strided_slice %366 {offsets = [0, 64], sizes = [8, 32], strides = [1, 1]} : vector<8x96xf32> to vector<8x32xf32>
    %389 = vector.extract_strided_slice %371 {offsets = [0, 64], sizes = [8, 32], strides = [1, 1]} : vector<8x96xf32> to vector<8x32xf32>
    %390 = arith.mulf %379, %389 : vector<8x32xf32>
    %391 = arith.addf %388, %390 : vector<8x32xf32>
    %392 = math.tanh %391 : vector<8x32xf32>
    %cst_84 = arith.constant 1.000000e+00 : f32
    %393 = vector.broadcast %cst_84 : f32 to vector<8x32xf32>
    %394 = arith.subf %393, %387 : vector<8x32xf32>
    %395 = arith.mulf %394, %392 : vector<8x32xf32>
    %396 = arith.mulf %387, %318 : vector<8x32xf32>
    %397 = arith.addf %395, %396 : vector<8x32xf32>
    %398 = vector.broadcast %368 : vector<8x1xf32> to vector<8x32xf32>
    %399 = arith.mulf %398, %397 : vector<8x32xf32>
    %cst_85 = arith.constant 1.000000e+00 : f32
    %400 = vector.broadcast %cst_85 : f32 to vector<8x1xf32>
    %401 = arith.subf %400, %368 : vector<8x1xf32>
    %402 = vector.broadcast %401 : vector<8x1xf32> to vector<8x32xf32>
    %403 = arith.mulf %402, %318 : vector<8x32xf32>
    %404 = arith.addf %399, %403 : vector<8x32xf32>
    %405 = vector.extract_strided_slice %13 {offsets = [3, 0, 0], sizes = [1, 8, 96], strides = [1, 1, 1]} : vector<8x8x96xf32> to vector<1x8x96xf32>
    %406 = vector.shape_cast %405 : vector<1x8x96xf32> to vector<8x96xf32>
    %407 = vector.extract_strided_slice %14 {offsets = [3, 0, 0], sizes = [1, 8, 1], strides = [1, 1, 1]} : vector<8x8x1xf32> to vector<1x8x1xf32>
    %408 = vector.shape_cast %407 : vector<1x8x1xf32> to vector<8x1xf32>
    %cst_86 = arith.constant dense<0.000000e+00> : vector<8x96xf32>
    %409 = tpu.matmul %358, %16, %cst_86 {dimension_numbers = #tpu.dot_dimension_numbers<[1], [0], [0], [1], [0, 0, 1, 1], [], []>} : vector<8x32xf32>, vector<32x96xf32>, vector<8x96xf32> -> vector<8x96xf32>
    %410 = vector.broadcast %18 : vector<1x96xf32> to vector<8x96xf32>
    %411 = arith.addf %409, %410 : vector<8x96xf32>
    %412 = vector.extract_strided_slice %406 {offsets = [0, 0], sizes = [8, 32], strides = [1, 1]} : vector<8x96xf32> to vector<8x32xf32>
    %413 = vector.extract_strided_slice %411 {offsets = [0, 0], sizes = [8, 32], strides = [1, 1]} : vector<8x96xf32> to vector<8x32xf32>
    %414 = arith.addf %412, %413 : vector<8x32xf32>
    %415 = arith.negf %414 : vector<8x32xf32>
    %416 = math.exp %415 : vector<8x32xf32>
    %cst_87 = arith.constant 1.000000e+00 : f32
    %417 = vector.broadcast %cst_87 : f32 to vector<8x32xf32>
    %418 = arith.addf %417, %416 : vector<8x32xf32>
    %419 = arith.divf %417, %418 : vector<8x32xf32>
    %420 = vector.extract_strided_slice %406 {offsets = [0, 32], sizes = [8, 32], strides = [1, 1]} : vector<8x96xf32> to vector<8x32xf32>
    %421 = vector.extract_strided_slice %411 {offsets = [0, 32], sizes = [8, 32], strides = [1, 1]} : vector<8x96xf32> to vector<8x32xf32>
    %422 = arith.addf %420, %421 : vector<8x32xf32>
    %423 = arith.negf %422 : vector<8x32xf32>
    %424 = math.exp %423 : vector<8x32xf32>
    %cst_88 = arith.constant 1.000000e+00 : f32
    %425 = vector.broadcast %cst_88 : f32 to vector<8x32xf32>
    %426 = arith.addf %425, %424 : vector<8x32xf32>
    %427 = arith.divf %425, %426 : vector<8x32xf32>
    %428 = vector.extract_strided_slice %406 {offsets = [0, 64], sizes = [8, 32], strides = [1, 1]} : vector<8x96xf32> to vector<8x32xf32>
    %429 = vector.extract_strided_slice %411 {offsets = [0, 64], sizes = [8, 32], strides = [1, 1]} : vector<8x96xf32> to vector<8x32xf32>
    %430 = arith.mulf %419, %429 : vector<8x32xf32>
    %431 = arith.addf %428, %430 : vector<8x32xf32>
    %432 = math.tanh %431 : vector<8x32xf32>
    %cst_89 = arith.constant 1.000000e+00 : f32
    %433 = vector.broadcast %cst_89 : f32 to vector<8x32xf32>
    %434 = arith.subf %433, %427 : vector<8x32xf32>
    %435 = arith.mulf %434, %432 : vector<8x32xf32>
    %436 = arith.mulf %427, %358 : vector<8x32xf32>
    %437 = arith.addf %435, %436 : vector<8x32xf32>
    %438 = vector.broadcast %408 : vector<8x1xf32> to vector<8x32xf32>
    %439 = arith.mulf %438, %437 : vector<8x32xf32>
    %cst_90 = arith.constant 1.000000e+00 : f32
    %440 = vector.broadcast %cst_90 : f32 to vector<8x1xf32>
    %441 = arith.subf %440, %408 : vector<8x1xf32>
    %442 = vector.broadcast %441 : vector<8x1xf32> to vector<8x32xf32>
    %443 = arith.mulf %442, %358 : vector<8x32xf32>
    %444 = arith.addf %439, %443 : vector<8x32xf32>
    %c4_91 = arith.constant 4 : index
    %c0_92 = arith.constant 0 : index
    %c0_93 = arith.constant 0 : index
    %445 = vector.load %arg14[%c4_91, %c0_92, %c0_93] : memref<8x8x32xf32, #tpu.memory_space<vmem>>, vector<1x8x32xf32>
    %446 = vector.shape_cast %445 : vector<1x8x32xf32> to vector<8x32xf32>
    %447 = vector.shape_cast %404 : vector<8x32xf32> to vector<1x8x32xf32>
    tpu.vector_store %arg14[%c4_91, %c0_92, %c0_93], %447 {strides = array<i32>} : memref<8x8x32xf32, #tpu.memory_space<vmem>>, vector<1x8x32xf32>,
    %c3_94 = arith.constant 3 : index
    %c0_95 = arith.constant 0 : index
    %c0_96 = arith.constant 0 : index
    %448 = vector.load %arg15[%c3_94, %c0_95, %c0_96] : memref<8x8x32xf32, #tpu.memory_space<vmem>>, vector<1x8x32xf32>
    %449 = vector.shape_cast %448 : vector<1x8x32xf32> to vector<8x32xf32>
    %450 = vector.shape_cast %444 : vector<8x32xf32> to vector<1x8x32xf32>
    tpu.vector_store %arg15[%c3_94, %c0_95, %c0_96], %450 {strides = array<i32>} : memref<8x8x32xf32, #tpu.memory_space<vmem>>, vector<1x8x32xf32>,
    %451 = vector.extract_strided_slice %7 {offsets = [5, 0, 0], sizes = [1, 8, 96], strides = [1, 1, 1]} : vector<8x8x96xf32> to vector<1x8x96xf32>
    %452 = vector.shape_cast %451 : vector<1x8x96xf32> to vector<8x96xf32>
    %453 = vector.extract_strided_slice %14 {offsets = [5, 0, 0], sizes = [1, 8, 1], strides = [1, 1, 1]} : vector<8x8x1xf32> to vector<1x8x1xf32>
    %454 = vector.shape_cast %453 : vector<1x8x1xf32> to vector<8x1xf32>
    %cst_97 = arith.constant dense<0.000000e+00> : vector<8x96xf32>
    %455 = tpu.matmul %404, %15, %cst_97 {dimension_numbers = #tpu.dot_dimension_numbers<[1], [0], [0], [1], [0, 0, 1, 1], [], []>} : vector<8x32xf32>, vector<32x96xf32>, vector<8x96xf32> -> vector<8x96xf32>
    %456 = vector.broadcast %17 : vector<1x96xf32> to vector<8x96xf32>
    %457 = arith.addf %455, %456 : vector<8x96xf32>
    %458 = vector.extract_strided_slice %452 {offsets = [0, 0], sizes = [8, 32], strides = [1, 1]} : vector<8x96xf32> to vector<8x32xf32>
    %459 = vector.extract_strided_slice %457 {offsets = [0, 0], sizes = [8, 32], strides = [1, 1]} : vector<8x96xf32> to vector<8x32xf32>
    %460 = arith.addf %458, %459 : vector<8x32xf32>
    %461 = arith.negf %460 : vector<8x32xf32>
    %462 = math.exp %461 : vector<8x32xf32>
    %cst_98 = arith.constant 1.000000e+00 : f32
    %463 = vector.broadcast %cst_98 : f32 to vector<8x32xf32>
    %464 = arith.addf %463, %462 : vector<8x32xf32>
    %465 = arith.divf %463, %464 : vector<8x32xf32>
    %466 = vector.extract_strided_slice %452 {offsets = [0, 32], sizes = [8, 32], strides = [1, 1]} : vector<8x96xf32> to vector<8x32xf32>
    %467 = vector.extract_strided_slice %457 {offsets = [0, 32], sizes = [8, 32], strides = [1, 1]} : vector<8x96xf32> to vector<8x32xf32>
    %468 = arith.addf %466, %467 : vector<8x32xf32>
    %469 = arith.negf %468 : vector<8x32xf32>
    %470 = math.exp %469 : vector<8x32xf32>
    %cst_99 = arith.constant 1.000000e+00 : f32
    %471 = vector.broadcast %cst_99 : f32 to vector<8x32xf32>
    %472 = arith.addf %471, %470 : vector<8x32xf32>
    %473 = arith.divf %471, %472 : vector<8x32xf32>
    %474 = vector.extract_strided_slice %452 {offsets = [0, 64], sizes = [8, 32], strides = [1, 1]} : vector<8x96xf32> to vector<8x32xf32>
    %475 = vector.extract_strided_slice %457 {offsets = [0, 64], sizes = [8, 32], strides = [1, 1]} : vector<8x96xf32> to vector<8x32xf32>
    %476 = arith.mulf %465, %475 : vector<8x32xf32>
    %477 = arith.addf %474, %476 : vector<8x32xf32>
    %478 = math.tanh %477 : vector<8x32xf32>
    %cst_100 = arith.constant 1.000000e+00 : f32
    %479 = vector.broadcast %cst_100 : f32 to vector<8x32xf32>
    %480 = arith.subf %479, %473 : vector<8x32xf32>
    %481 = arith.mulf %480, %478 : vector<8x32xf32>
    %482 = arith.mulf %473, %404 : vector<8x32xf32>
    %483 = arith.addf %481, %482 : vector<8x32xf32>
    %484 = vector.broadcast %454 : vector<8x1xf32> to vector<8x32xf32>
    %485 = arith.mulf %484, %483 : vector<8x32xf32>
    %cst_101 = arith.constant 1.000000e+00 : f32
    %486 = vector.broadcast %cst_101 : f32 to vector<8x1xf32>
    %487 = arith.subf %486, %454 : vector<8x1xf32>
    %488 = vector.broadcast %487 : vector<8x1xf32> to vector<8x32xf32>
    %489 = arith.mulf %488, %404 : vector<8x32xf32>
    %490 = arith.addf %485, %489 : vector<8x32xf32>
    %491 = vector.extract_strided_slice %13 {offsets = [2, 0, 0], sizes = [1, 8, 96], strides = [1, 1, 1]} : vector<8x8x96xf32> to vector<1x8x96xf32>
    %492 = vector.shape_cast %491 : vector<1x8x96xf32> to vector<8x96xf32>
    %493 = vector.extract_strided_slice %14 {offsets = [2, 0, 0], sizes = [1, 8, 1], strides = [1, 1, 1]} : vector<8x8x1xf32> to vector<1x8x1xf32>
    %494 = vector.shape_cast %493 : vector<1x8x1xf32> to vector<8x1xf32>
    %cst_102 = arith.constant dense<0.000000e+00> : vector<8x96xf32>
    %495 = tpu.matmul %444, %16, %cst_102 {dimension_numbers = #tpu.dot_dimension_numbers<[1], [0], [0], [1], [0, 0, 1, 1], [], []>} : vector<8x32xf32>, vector<32x96xf32>, vector<8x96xf32> -> vector<8x96xf32>
    %496 = vector.broadcast %18 : vector<1x96xf32> to vector<8x96xf32>
    %497 = arith.addf %495, %496 : vector<8x96xf32>
    %498 = vector.extract_strided_slice %492 {offsets = [0, 0], sizes = [8, 32], strides = [1, 1]} : vector<8x96xf32> to vector<8x32xf32>
    %499 = vector.extract_strided_slice %497 {offsets = [0, 0], sizes = [8, 32], strides = [1, 1]} : vector<8x96xf32> to vector<8x32xf32>
    %500 = arith.addf %498, %499 : vector<8x32xf32>
    %501 = arith.negf %500 : vector<8x32xf32>
    %502 = math.exp %501 : vector<8x32xf32>
    %cst_103 = arith.constant 1.000000e+00 : f32
    %503 = vector.broadcast %cst_103 : f32 to vector<8x32xf32>
    %504 = arith.addf %503, %502 : vector<8x32xf32>
    %505 = arith.divf %503, %504 : vector<8x32xf32>
    %506 = vector.extract_strided_slice %492 {offsets = [0, 32], sizes = [8, 32], strides = [1, 1]} : vector<8x96xf32> to vector<8x32xf32>
    %507 = vector.extract_strided_slice %497 {offsets = [0, 32], sizes = [8, 32], strides = [1, 1]} : vector<8x96xf32> to vector<8x32xf32>
    %508 = arith.addf %506, %507 : vector<8x32xf32>
    %509 = arith.negf %508 : vector<8x32xf32>
    %510 = math.exp %509 : vector<8x32xf32>
    %cst_104 = arith.constant 1.000000e+00 : f32
    %511 = vector.broadcast %cst_104 : f32 to vector<8x32xf32>
    %512 = arith.addf %511, %510 : vector<8x32xf32>
    %513 = arith.divf %511, %512 : vector<8x32xf32>
    %514 = vector.extract_strided_slice %492 {offsets = [0, 64], sizes = [8, 32], strides = [1, 1]} : vector<8x96xf32> to vector<8x32xf32>
    %515 = vector.extract_strided_slice %497 {offsets = [0, 64], sizes = [8, 32], strides = [1, 1]} : vector<8x96xf32> to vector<8x32xf32>
    %516 = arith.mulf %505, %515 : vector<8x32xf32>
    %517 = arith.addf %514, %516 : vector<8x32xf32>
    %518 = math.tanh %517 : vector<8x32xf32>
    %cst_105 = arith.constant 1.000000e+00 : f32
    %519 = vector.broadcast %cst_105 : f32 to vector<8x32xf32>
    %520 = arith.subf %519, %513 : vector<8x32xf32>
    %521 = arith.mulf %520, %518 : vector<8x32xf32>
    %522 = arith.mulf %513, %444 : vector<8x32xf32>
    %523 = arith.addf %521, %522 : vector<8x32xf32>
    %524 = vector.broadcast %494 : vector<8x1xf32> to vector<8x32xf32>
    %525 = arith.mulf %524, %523 : vector<8x32xf32>
    %cst_106 = arith.constant 1.000000e+00 : f32
    %526 = vector.broadcast %cst_106 : f32 to vector<8x1xf32>
    %527 = arith.subf %526, %494 : vector<8x1xf32>
    %528 = vector.broadcast %527 : vector<8x1xf32> to vector<8x32xf32>
    %529 = arith.mulf %528, %444 : vector<8x32xf32>
    %530 = arith.addf %525, %529 : vector<8x32xf32>
    %c5_107 = arith.constant 5 : index
    %c0_108 = arith.constant 0 : index
    %c0_109 = arith.constant 0 : index
    %531 = vector.load %arg14[%c5_107, %c0_108, %c0_109] : memref<8x8x32xf32, #tpu.memory_space<vmem>>, vector<1x8x32xf32>
    %532 = vector.shape_cast %531 : vector<1x8x32xf32> to vector<8x32xf32>
    %533 = vector.shape_cast %490 : vector<8x32xf32> to vector<1x8x32xf32>
    tpu.vector_store %arg14[%c5_107, %c0_108, %c0_109], %533 {strides = array<i32>} : memref<8x8x32xf32, #tpu.memory_space<vmem>>, vector<1x8x32xf32>,
    %c2_110 = arith.constant 2 : index
    %c0_111 = arith.constant 0 : index
    %c0_112 = arith.constant 0 : index
    %534 = vector.load %arg15[%c2_110, %c0_111, %c0_112] : memref<8x8x32xf32, #tpu.memory_space<vmem>>, vector<1x8x32xf32>
    %535 = vector.shape_cast %534 : vector<1x8x32xf32> to vector<8x32xf32>
    %536 = vector.shape_cast %530 : vector<8x32xf32> to vector<1x8x32xf32>
    tpu.vector_store %arg15[%c2_110, %c0_111, %c0_112], %536 {strides = array<i32>} : memref<8x8x32xf32, #tpu.memory_space<vmem>>, vector<1x8x32xf32>,
    %537 = vector.extract_strided_slice %7 {offsets = [6, 0, 0], sizes = [1, 8, 96], strides = [1, 1, 1]} : vector<8x8x96xf32> to vector<1x8x96xf32>
    %538 = vector.shape_cast %537 : vector<1x8x96xf32> to vector<8x96xf32>
    %539 = vector.extract_strided_slice %14 {offsets = [6, 0, 0], sizes = [1, 8, 1], strides = [1, 1, 1]} : vector<8x8x1xf32> to vector<1x8x1xf32>
    %540 = vector.shape_cast %539 : vector<1x8x1xf32> to vector<8x1xf32>
    %cst_113 = arith.constant dense<0.000000e+00> : vector<8x96xf32>
    %541 = tpu.matmul %490, %15, %cst_113 {dimension_numbers = #tpu.dot_dimension_numbers<[1], [0], [0], [1], [0, 0, 1, 1], [], []>} : vector<8x32xf32>, vector<32x96xf32>, vector<8x96xf32> -> vector<8x96xf32>
    %542 = vector.broadcast %17 : vector<1x96xf32> to vector<8x96xf32>
    %543 = arith.addf %541, %542 : vector<8x96xf32>
    %544 = vector.extract_strided_slice %538 {offsets = [0, 0], sizes = [8, 32], strides = [1, 1]} : vector<8x96xf32> to vector<8x32xf32>
    %545 = vector.extract_strided_slice %543 {offsets = [0, 0], sizes = [8, 32], strides = [1, 1]} : vector<8x96xf32> to vector<8x32xf32>
    %546 = arith.addf %544, %545 : vector<8x32xf32>
    %547 = arith.negf %546 : vector<8x32xf32>
    %548 = math.exp %547 : vector<8x32xf32>
    %cst_114 = arith.constant 1.000000e+00 : f32
    %549 = vector.broadcast %cst_114 : f32 to vector<8x32xf32>
    %550 = arith.addf %549, %548 : vector<8x32xf32>
    %551 = arith.divf %549, %550 : vector<8x32xf32>
    %552 = vector.extract_strided_slice %538 {offsets = [0, 32], sizes = [8, 32], strides = [1, 1]} : vector<8x96xf32> to vector<8x32xf32>
    %553 = vector.extract_strided_slice %543 {offsets = [0, 32], sizes = [8, 32], strides = [1, 1]} : vector<8x96xf32> to vector<8x32xf32>
    %554 = arith.addf %552, %553 : vector<8x32xf32>
    %555 = arith.negf %554 : vector<8x32xf32>
    %556 = math.exp %555 : vector<8x32xf32>
    %cst_115 = arith.constant 1.000000e+00 : f32
    %557 = vector.broadcast %cst_115 : f32 to vector<8x32xf32>
    %558 = arith.addf %557, %556 : vector<8x32xf32>
    %559 = arith.divf %557, %558 : vector<8x32xf32>
    %560 = vector.extract_strided_slice %538 {offsets = [0, 64], sizes = [8, 32], strides = [1, 1]} : vector<8x96xf32> to vector<8x32xf32>
    %561 = vector.extract_strided_slice %543 {offsets = [0, 64], sizes = [8, 32], strides = [1, 1]} : vector<8x96xf32> to vector<8x32xf32>
    %562 = arith.mulf %551, %561 : vector<8x32xf32>
    %563 = arith.addf %560, %562 : vector<8x32xf32>
    %564 = math.tanh %563 : vector<8x32xf32>
    %cst_116 = arith.constant 1.000000e+00 : f32
    %565 = vector.broadcast %cst_116 : f32 to vector<8x32xf32>
    %566 = arith.subf %565, %559 : vector<8x32xf32>
    %567 = arith.mulf %566, %564 : vector<8x32xf32>
    %568 = arith.mulf %559, %490 : vector<8x32xf32>
    %569 = arith.addf %567, %568 : vector<8x32xf32>
    %570 = vector.broadcast %540 : vector<8x1xf32> to vector<8x32xf32>
    %571 = arith.mulf %570, %569 : vector<8x32xf32>
    %cst_117 = arith.constant 1.000000e+00 : f32
    %572 = vector.broadcast %cst_117 : f32 to vector<8x1xf32>
    %573 = arith.subf %572, %540 : vector<8x1xf32>
    %574 = vector.broadcast %573 : vector<8x1xf32> to vector<8x32xf32>
    %575 = arith.mulf %574, %490 : vector<8x32xf32>
    %576 = arith.addf %571, %575 : vector<8x32xf32>
    %577 = vector.extract_strided_slice %13 {offsets = [1, 0, 0], sizes = [1, 8, 96], strides = [1, 1, 1]} : vector<8x8x96xf32> to vector<1x8x96xf32>
    %578 = vector.shape_cast %577 : vector<1x8x96xf32> to vector<8x96xf32>
    %579 = vector.extract_strided_slice %14 {offsets = [1, 0, 0], sizes = [1, 8, 1], strides = [1, 1, 1]} : vector<8x8x1xf32> to vector<1x8x1xf32>
    %580 = vector.shape_cast %579 : vector<1x8x1xf32> to vector<8x1xf32>
    %cst_118 = arith.constant dense<0.000000e+00> : vector<8x96xf32>
    %581 = tpu.matmul %530, %16, %cst_118 {dimension_numbers = #tpu.dot_dimension_numbers<[1], [0], [0], [1], [0, 0, 1, 1], [], []>} : vector<8x32xf32>, vector<32x96xf32>, vector<8x96xf32> -> vector<8x96xf32>
    %582 = vector.broadcast %18 : vector<1x96xf32> to vector<8x96xf32>
    %583 = arith.addf %581, %582 : vector<8x96xf32>
    %584 = vector.extract_strided_slice %578 {offsets = [0, 0], sizes = [8, 32], strides = [1, 1]} : vector<8x96xf32> to vector<8x32xf32>
    %585 = vector.extract_strided_slice %583 {offsets = [0, 0], sizes = [8, 32], strides = [1, 1]} : vector<8x96xf32> to vector<8x32xf32>
    %586 = arith.addf %584, %585 : vector<8x32xf32>
    %587 = arith.negf %586 : vector<8x32xf32>
    %588 = math.exp %587 : vector<8x32xf32>
    %cst_119 = arith.constant 1.000000e+00 : f32
    %589 = vector.broadcast %cst_119 : f32 to vector<8x32xf32>
    %590 = arith.addf %589, %588 : vector<8x32xf32>
    %591 = arith.divf %589, %590 : vector<8x32xf32>
    %592 = vector.extract_strided_slice %578 {offsets = [0, 32], sizes = [8, 32], strides = [1, 1]} : vector<8x96xf32> to vector<8x32xf32>
    %593 = vector.extract_strided_slice %583 {offsets = [0, 32], sizes = [8, 32], strides = [1, 1]} : vector<8x96xf32> to vector<8x32xf32>
    %594 = arith.addf %592, %593 : vector<8x32xf32>
    %595 = arith.negf %594 : vector<8x32xf32>
    %596 = math.exp %595 : vector<8x32xf32>
    %cst_120 = arith.constant 1.000000e+00 : f32
    %597 = vector.broadcast %cst_120 : f32 to vector<8x32xf32>
    %598 = arith.addf %597, %596 : vector<8x32xf32>
    %599 = arith.divf %597, %598 : vector<8x32xf32>
    %600 = vector.extract_strided_slice %578 {offsets = [0, 64], sizes = [8, 32], strides = [1, 1]} : vector<8x96xf32> to vector<8x32xf32>
    %601 = vector.extract_strided_slice %583 {offsets = [0, 64], sizes = [8, 32], strides = [1, 1]} : vector<8x96xf32> to vector<8x32xf32>
    %602 = arith.mulf %591, %601 : vector<8x32xf32>
    %603 = arith.addf %600, %602 : vector<8x32xf32>
    %604 = math.tanh %603 : vector<8x32xf32>
    %cst_121 = arith.constant 1.000000e+00 : f32
    %605 = vector.broadcast %cst_121 : f32 to vector<8x32xf32>
    %606 = arith.subf %605, %599 : vector<8x32xf32>
    %607 = arith.mulf %606, %604 : vector<8x32xf32>
    %608 = arith.mulf %599, %530 : vector<8x32xf32>
    %609 = arith.addf %607, %608 : vector<8x32xf32>
    %610 = vector.broadcast %580 : vector<8x1xf32> to vector<8x32xf32>
    %611 = arith.mulf %610, %609 : vector<8x32xf32>
    %cst_122 = arith.constant 1.000000e+00 : f32
    %612 = vector.broadcast %cst_122 : f32 to vector<8x1xf32>
    %613 = arith.subf %612, %580 : vector<8x1xf32>
    %614 = vector.broadcast %613 : vector<8x1xf32> to vector<8x32xf32>
    %615 = arith.mulf %614, %530 : vector<8x32xf32>
    %616 = arith.addf %611, %615 : vector<8x32xf32>
    %c6_123 = arith.constant 6 : index
    %c0_124 = arith.constant 0 : index
    %c0_125 = arith.constant 0 : index
    %617 = vector.load %arg14[%c6_123, %c0_124, %c0_125] : memref<8x8x32xf32, #tpu.memory_space<vmem>>, vector<1x8x32xf32>
    %618 = vector.shape_cast %617 : vector<1x8x32xf32> to vector<8x32xf32>
    %619 = vector.shape_cast %576 : vector<8x32xf32> to vector<1x8x32xf32>
    tpu.vector_store %arg14[%c6_123, %c0_124, %c0_125], %619 {strides = array<i32>} : memref<8x8x32xf32, #tpu.memory_space<vmem>>, vector<1x8x32xf32>,
    %c1_126 = arith.constant 1 : index
    %c0_127 = arith.constant 0 : index
    %c0_128 = arith.constant 0 : index
    %620 = vector.load %arg15[%c1_126, %c0_127, %c0_128] : memref<8x8x32xf32, #tpu.memory_space<vmem>>, vector<1x8x32xf32>
    %621 = vector.shape_cast %620 : vector<1x8x32xf32> to vector<8x32xf32>
    %622 = vector.shape_cast %616 : vector<8x32xf32> to vector<1x8x32xf32>
    tpu.vector_store %arg15[%c1_126, %c0_127, %c0_128], %622 {strides = array<i32>} : memref<8x8x32xf32, #tpu.memory_space<vmem>>, vector<1x8x32xf32>,
    %623 = vector.extract_strided_slice %7 {offsets = [7, 0, 0], sizes = [1, 8, 96], strides = [1, 1, 1]} : vector<8x8x96xf32> to vector<1x8x96xf32>
    %624 = vector.shape_cast %623 : vector<1x8x96xf32> to vector<8x96xf32>
    %625 = vector.extract_strided_slice %14 {offsets = [7, 0, 0], sizes = [1, 8, 1], strides = [1, 1, 1]} : vector<8x8x1xf32> to vector<1x8x1xf32>
    %626 = vector.shape_cast %625 : vector<1x8x1xf32> to vector<8x1xf32>
    %cst_129 = arith.constant dense<0.000000e+00> : vector<8x96xf32>
    %627 = tpu.matmul %576, %15, %cst_129 {dimension_numbers = #tpu.dot_dimension_numbers<[1], [0], [0], [1], [0, 0, 1, 1], [], []>} : vector<8x32xf32>, vector<32x96xf32>, vector<8x96xf32> -> vector<8x96xf32>
    %628 = vector.broadcast %17 : vector<1x96xf32> to vector<8x96xf32>
    %629 = arith.addf %627, %628 : vector<8x96xf32>
    %630 = vector.extract_strided_slice %624 {offsets = [0, 0], sizes = [8, 32], strides = [1, 1]} : vector<8x96xf32> to vector<8x32xf32>
    %631 = vector.extract_strided_slice %629 {offsets = [0, 0], sizes = [8, 32], strides = [1, 1]} : vector<8x96xf32> to vector<8x32xf32>
    %632 = arith.addf %630, %631 : vector<8x32xf32>
    %633 = arith.negf %632 : vector<8x32xf32>
    %634 = math.exp %633 : vector<8x32xf32>
    %cst_130 = arith.constant 1.000000e+00 : f32
    %635 = vector.broadcast %cst_130 : f32 to vector<8x32xf32>
    %636 = arith.addf %635, %634 : vector<8x32xf32>
    %637 = arith.divf %635, %636 : vector<8x32xf32>
    %638 = vector.extract_strided_slice %624 {offsets = [0, 32], sizes = [8, 32], strides = [1, 1]} : vector<8x96xf32> to vector<8x32xf32>
    %639 = vector.extract_strided_slice %629 {offsets = [0, 32], sizes = [8, 32], strides = [1, 1]} : vector<8x96xf32> to vector<8x32xf32>
    %640 = arith.addf %638, %639 : vector<8x32xf32>
    %641 = arith.negf %640 : vector<8x32xf32>
    %642 = math.exp %641 : vector<8x32xf32>
    %cst_131 = arith.constant 1.000000e+00 : f32
    %643 = vector.broadcast %cst_131 : f32 to vector<8x32xf32>
    %644 = arith.addf %643, %642 : vector<8x32xf32>
    %645 = arith.divf %643, %644 : vector<8x32xf32>
    %646 = vector.extract_strided_slice %624 {offsets = [0, 64], sizes = [8, 32], strides = [1, 1]} : vector<8x96xf32> to vector<8x32xf32>
    %647 = vector.extract_strided_slice %629 {offsets = [0, 64], sizes = [8, 32], strides = [1, 1]} : vector<8x96xf32> to vector<8x32xf32>
    %648 = arith.mulf %637, %647 : vector<8x32xf32>
    %649 = arith.addf %646, %648 : vector<8x32xf32>
    %650 = math.tanh %649 : vector<8x32xf32>
    %cst_132 = arith.constant 1.000000e+00 : f32
    %651 = vector.broadcast %cst_132 : f32 to vector<8x32xf32>
    %652 = arith.subf %651, %645 : vector<8x32xf32>
    %653 = arith.mulf %652, %650 : vector<8x32xf32>
    %654 = arith.mulf %645, %576 : vector<8x32xf32>
    %655 = arith.addf %653, %654 : vector<8x32xf32>
    %656 = vector.broadcast %626 : vector<8x1xf32> to vector<8x32xf32>
    %657 = arith.mulf %656, %655 : vector<8x32xf32>
    %cst_133 = arith.constant 1.000000e+00 : f32
    %658 = vector.broadcast %cst_133 : f32 to vector<8x1xf32>
    %659 = arith.subf %658, %626 : vector<8x1xf32>
    %660 = vector.broadcast %659 : vector<8x1xf32> to vector<8x32xf32>
    %661 = arith.mulf %660, %576 : vector<8x32xf32>
    %662 = arith.addf %657, %661 : vector<8x32xf32>
    %663 = vector.extract_strided_slice %13 {offsets = [0, 0, 0], sizes = [1, 8, 96], strides = [1, 1, 1]} : vector<8x8x96xf32> to vector<1x8x96xf32>
    %664 = vector.shape_cast %663 : vector<1x8x96xf32> to vector<8x96xf32>
    %665 = vector.extract_strided_slice %14 {offsets = [0, 0, 0], sizes = [1, 8, 1], strides = [1, 1, 1]} : vector<8x8x1xf32> to vector<1x8x1xf32>
    %666 = vector.shape_cast %665 : vector<1x8x1xf32> to vector<8x1xf32>
    %cst_134 = arith.constant dense<0.000000e+00> : vector<8x96xf32>
    %667 = tpu.matmul %616, %16, %cst_134 {dimension_numbers = #tpu.dot_dimension_numbers<[1], [0], [0], [1], [0, 0, 1, 1], [], []>} : vector<8x32xf32>, vector<32x96xf32>, vector<8x96xf32> -> vector<8x96xf32>
    %668 = vector.broadcast %18 : vector<1x96xf32> to vector<8x96xf32>
    %669 = arith.addf %667, %668 : vector<8x96xf32>
    %670 = vector.extract_strided_slice %664 {offsets = [0, 0], sizes = [8, 32], strides = [1, 1]} : vector<8x96xf32> to vector<8x32xf32>
    %671 = vector.extract_strided_slice %669 {offsets = [0, 0], sizes = [8, 32], strides = [1, 1]} : vector<8x96xf32> to vector<8x32xf32>
    %672 = arith.addf %670, %671 : vector<8x32xf32>
    %673 = arith.negf %672 : vector<8x32xf32>
    %674 = math.exp %673 : vector<8x32xf32>
    %cst_135 = arith.constant 1.000000e+00 : f32
    %675 = vector.broadcast %cst_135 : f32 to vector<8x32xf32>
    %676 = arith.addf %675, %674 : vector<8x32xf32>
    %677 = arith.divf %675, %676 : vector<8x32xf32>
    %678 = vector.extract_strided_slice %664 {offsets = [0, 32], sizes = [8, 32], strides = [1, 1]} : vector<8x96xf32> to vector<8x32xf32>
    %679 = vector.extract_strided_slice %669 {offsets = [0, 32], sizes = [8, 32], strides = [1, 1]} : vector<8x96xf32> to vector<8x32xf32>
    %680 = arith.addf %678, %679 : vector<8x32xf32>
    %681 = arith.negf %680 : vector<8x32xf32>
    %682 = math.exp %681 : vector<8x32xf32>
    %cst_136 = arith.constant 1.000000e+00 : f32
    %683 = vector.broadcast %cst_136 : f32 to vector<8x32xf32>
    %684 = arith.addf %683, %682 : vector<8x32xf32>
    %685 = arith.divf %683, %684 : vector<8x32xf32>
    %686 = vector.extract_strided_slice %664 {offsets = [0, 64], sizes = [8, 32], strides = [1, 1]} : vector<8x96xf32> to vector<8x32xf32>
    %687 = vector.extract_strided_slice %669 {offsets = [0, 64], sizes = [8, 32], strides = [1, 1]} : vector<8x96xf32> to vector<8x32xf32>
    %688 = arith.mulf %677, %687 : vector<8x32xf32>
    %689 = arith.addf %686, %688 : vector<8x32xf32>
    %690 = math.tanh %689 : vector<8x32xf32>
    %cst_137 = arith.constant 1.000000e+00 : f32
    %691 = vector.broadcast %cst_137 : f32 to vector<8x32xf32>
    %692 = arith.subf %691, %685 : vector<8x32xf32>
    %693 = arith.mulf %692, %690 : vector<8x32xf32>
    %694 = arith.mulf %685, %616 : vector<8x32xf32>
    %695 = arith.addf %693, %694 : vector<8x32xf32>
    %696 = vector.broadcast %666 : vector<8x1xf32> to vector<8x32xf32>
    %697 = arith.mulf %696, %695 : vector<8x32xf32>
    %cst_138 = arith.constant 1.000000e+00 : f32
    %698 = vector.broadcast %cst_138 : f32 to vector<8x1xf32>
    %699 = arith.subf %698, %666 : vector<8x1xf32>
    %700 = vector.broadcast %699 : vector<8x1xf32> to vector<8x32xf32>
    %701 = arith.mulf %700, %616 : vector<8x32xf32>
    %702 = arith.addf %697, %701 : vector<8x32xf32>
    %c7_139 = arith.constant 7 : index
    %c0_140 = arith.constant 0 : index
    %c0_141 = arith.constant 0 : index
    %703 = vector.load %arg14[%c7_139, %c0_140, %c0_141] : memref<8x8x32xf32, #tpu.memory_space<vmem>>, vector<1x8x32xf32>
    %704 = vector.shape_cast %703 : vector<1x8x32xf32> to vector<8x32xf32>
    %705 = vector.shape_cast %662 : vector<8x32xf32> to vector<1x8x32xf32>
    tpu.vector_store %arg14[%c7_139, %c0_140, %c0_141], %705 {strides = array<i32>} : memref<8x8x32xf32, #tpu.memory_space<vmem>>, vector<1x8x32xf32>,
    %c0_142 = arith.constant 0 : index
    %c0_143 = arith.constant 0 : index
    %c0_144 = arith.constant 0 : index
    %706 = vector.load %arg15[%c0_142, %c0_143, %c0_144] : memref<8x8x32xf32, #tpu.memory_space<vmem>>, vector<1x8x32xf32>
    %707 = vector.shape_cast %706 : vector<1x8x32xf32> to vector<8x32xf32>
    %708 = vector.shape_cast %702 : vector<8x32xf32> to vector<1x8x32xf32>
    tpu.vector_store %arg15[%c0_142, %c0_143, %c0_144], %708 {strides = array<i32>} : memref<8x8x32xf32, #tpu.memory_space<vmem>>, vector<1x8x32xf32>,
    %c0_145 = arith.constant 0 : index
    %c0_146 = arith.constant 0 : index
    %c0_147 = arith.constant 0 : index
    %709 = vector.load %arg14[%c0_145, %c0_146, %c0_147] : memref<8x8x32xf32, #tpu.memory_space<vmem>>, vector<8x8x32xf32>
    %c0_148 = arith.constant 0 : index
    %c0_149 = arith.constant 0 : index
    %c0_150 = arith.constant 0 : index
    %710 = vector.load %arg15[%c0_148, %c0_149, %c0_150] : memref<8x8x32xf32, #tpu.memory_space<vmem>>, vector<8x8x32xf32>
    %711 = arith.addf %709, %710 : vector<8x8x32xf32>
    %cst_151 = arith.constant 5.000000e-01 : f32
    %712 = vector.broadcast %cst_151 : f32 to vector<8x8x32xf32>
    %713 = arith.mulf %711, %712 : vector<8x8x32xf32>
    %c0_152 = arith.constant 0 : index
    %c0_153 = arith.constant 0 : index
    %714 = vector.load %arg11[%c0_152, %c0_153] : memref<1x32xf32, #tpu.memory_space<vmem>>, vector<1x32xf32>
    %715 = vector.shape_cast %714 : vector<1x32xf32> to vector<1x1x32xf32>
    %716 = vector.broadcast %715 : vector<1x1x32xf32> to vector<8x8x32xf32>
    %717 = arith.mulf %713, %716 : vector<8x8x32xf32>
    %cst_154 = arith.constant dense<0.000000e+00> : vector<8x8xf32>
    %718 = vector.multi_reduction <add>, %717, %cst_154 [2] : vector<8x8x32xf32> to vector<8x8xf32>
    %719 = vector.shape_cast %718 : vector<8x8xf32> to vector<8x8x1xf32>
    %cst_155 = arith.constant 5.000000e-01 : f32
    %720 = vector.broadcast %cst_155 : f32 to vector<8x8x1xf32>
    %721 = arith.cmpf ogt, %14, %720 : vector<8x8x1xf32>
    %cst_156 = arith.constant -1.000000e+04 : f32
    %722 = vector.broadcast %cst_156 : f32 to vector<8x8x1xf32>
    %723 = arith.select %721, %719, %722 : vector<8x8x1xi1>, vector<8x8x1xf32>
    %cst_157 = arith.constant 1.000000e+01 : f32
    %724 = vector.broadcast %cst_157 : f32 to vector<8x8x1xf32>
    %725 = arith.mulf %723, %724 : vector<8x8x1xf32>
    %cst_158 = arith.constant dense<0xFF800000> : vector<8x1xf32>
    %726 = vector.multi_reduction <maximumf>, %725, %cst_158 [0] : vector<8x8x1xf32> to vector<8x1xf32>
    %727 = vector.shape_cast %726 : vector<8x1xf32> to vector<1x8x1xf32>
    %728 = vector.broadcast %727 : vector<1x8x1xf32> to vector<8x8x1xf32>
    %729 = arith.subf %725, %728 : vector<8x8x1xf32>
    %730 = math.exp %729 : vector<8x8x1xf32>
    %cst_159 = arith.constant dense<0.000000e+00> : vector<8x1xf32>
    %731 = vector.multi_reduction <add>, %730, %cst_159 [0] : vector<8x8x1xf32> to vector<8x1xf32>
    %732 = vector.shape_cast %731 : vector<8x1xf32> to vector<1x8x1xf32>
    %733 = tpu.reciprocal %732 {approx = true} : vector<1x8x1xf32> -> vector<1x8x1xf32>
    %734 = vector.broadcast %733 : vector<1x8x1xf32> to vector<8x8x1xf32>
    %735 = arith.mulf %730, %734 : vector<8x8x1xf32>
    %c0_160 = arith.constant 0 : index
    %c0_161 = arith.constant 0 : index
    %c0_162 = arith.constant 0 : index
    %736 = vector.load %arg12[%c0_160, %c0_161, %c0_162] : memref<8x8x1xf32, #tpu.memory_space<vmem>>, vector<8x8x1xf32>
    tpu.vector_store %arg12[%c0_160, %c0_161, %c0_162], %735 {strides = array<i32>} : memref<8x8x1xf32, #tpu.memory_space<vmem>>, vector<8x8x1xf32>,
    %c0_163 = arith.constant 0 : index
    %c0_164 = arith.constant 0 : index
    %c0_165 = arith.constant 0 : index
    %737 = vector.load %arg2[%c0_163, %c0_164, %c0_165] : memref<8x8x32xf32, #tpu.memory_space<vmem>>, vector<8x8x32xf32>
    %738 = vector.broadcast %735 : vector<8x8x1xf32> to vector<8x8x32xf32>
    %739 = arith.mulf %737, %738 : vector<8x8x32xf32>
    %cst_166 = arith.constant dense<0.000000e+00> : vector<8x32xf32>
    %740 = vector.multi_reduction <add>, %739, %cst_166 [0] : vector<8x8x32xf32> to vector<8x32xf32>
    %c0_167 = arith.constant 0 : index
    %c0_168 = arith.constant 0 : index
    %741 = vector.load %arg13[%c0_167, %c0_168] : memref<8x32xf32, #tpu.memory_space<vmem>>, vector<8x32xf32>
    tpu.vector_store %arg13[%c0_167, %c0_168], %740 {strides = array<i32>} : memref<8x32xf32, #tpu.memory_space<vmem>>, vector<8x32xf32>,
    return
  }
}

</mosaic_0001>

<bundles_post_ra>
// kernel: tpu_custom_call.1
= control target key start
LH: loop header
LB: loop body
LE: loop exit
PB: predicated region body
PF: predicated region fallthrough
CT: control target
= control target key end

     0   :  { %19 = vsyncpa [#allocation5], 0  ;;  %s3953_s0 = inlined_call_operand.vmem [shape: f32[8,8,32], index: 0, kind: input, shape index: {}]   ;;  %s3954_s1 = inlined_call_operand.vmem [shape: f32[8,8,1], index: 1, kind: input, shape index: {}]   ;;  %s3955_s2 = inlined_call_operand.hbm [shape: f32[8,8,32], index: 2, kind: input, shape index: {}]   ;;  %s3956_s3 = inlined_call_operand.hbm [shape: f32[32,96], index: 3, kind: input, shape index: {}]   ;;  %s3957_s4 = inlined_call_operand.hbm [shape: f32[32,96], index: 4, kind: input, shape index: {}]   ;;  %s3958_s5 = inlined_call_operand.vmem [shape: f32[1,96], index: 5, kind: input, shape index: {}]   ;;  %s3959_s6 = inlined_call_operand.vmem [shape: f32[1,96], index: 6, kind: input, shape index: {}]   ;;  %s3960_s7 = inlined_call_operand.vmem [shape: f32[32,96], index: 7, kind: input, shape index: {}]   ;;  %s3961_s8 = inlined_call_operand.hbm [shape: f32[32,96], index: 8, kind: input, shape index: {}]   ;;  %s3962_s9 = inlined_call_operand.vmem [shape: f32[1,96], index: 9, kind: input, shape index: {}]   ;;  %s3963_s10 = inlined_call_operand.vmem [shape: f32[1,96], index: 10, kind: input, shape index: {}]   ;;  %s3964_s11 = inlined_call_operand.vmem [shape: f32[1,32], index: 11, kind: input, shape index: {}]   ;;  %s3965_s12 = inlined_call_operand.vmem [shape: f32[8,8,1], index: 12, kind: output, shape index: {0}]   ;;  %s3966_s13 = inlined_call_operand.hbm [shape: f32[8,32], index: 13, kind: output, shape index: {1}]  }
   0x1   :  { %20 = vsyncpa [#allocation8], 0 }
   0x2   :  { %21 = vsyncpa [#allocation11], 0 }
   0x3   :  { %22 = vsyncpa [#allocation6], 0  ;;  %s3187_s25 = smov [#allocation7]   ;;  %s3188_s27 = smov [#allocation4]  }
   0x4   :  { %s44_s26 = sshll.u32 %s3187_s25, 4  ;;  %s32_s28 = sshll.u32 %s3188_s27, 4  ;;  %s45_s26 = int_to_ptr.vmem [resolvable:$true] %s44_s26  ;;  %s3270_s28 = int_to_ptr.vmem [resolvable:$true] %s32_s28 }
   0x5   :  { %s3069_s14 = scalar_lea.hbm %s3956_s3, 512 }
   0x6   :  { %p3070_p0 = scmp.ne.s32.totalorder %s3956_s3, %s3069_s14  ;;  %p3073_p1 = scmp.lt.u32.totalorder %s3069_s14, %s3956_s3 }
   0x8   :  { %p3075_p2 = pnand %p3073_p1, %p3070_p0 }
   0xa   :  { %3078 = shalt.err (!%p3075_p2)
}
   0xb   :  { %s3079_s19 = scalar_lea.vmem %s45_s26, 512  ;;  %p3084_p4 = scmp.lt.s32.totalorder %s45_s26, %s45_s26 }
   0xc   :  { %p3080_p3 = scmp.ne.s32.totalorder %s45_s26, %s3079_s19  ;;  %p3085_p5 = scmp.lt.s32.totalorder %s3079_s19, %s3079_s19 }
   0xe   :  { %p3086_p6 = por %p3085_p5, %p3084_p4 }
  0x10   :  { %p3087_p7 = pnand %p3086_p6, %p3080_p3 }
  0x12   :  { %3090 = shalt.err (!%p3087_p7)
}
  0x13   :  { %s3189_s20 = smov 128   ;;  %s3190_s21 = smov 8  }
  0x14   :  { %50 = dma.hbm_to_vmem [thread:$0]  %s3956_s3, 512, %s45_s26, [#allocation8], %s3189_s20, %s3189_s20, %s3190_s21  }
  0x15   :  { %s3091_s27 = scalar_lea.hbm %s3955_s2, 1024 }
  0x16   :  { %p3092_p8 = scmp.ne.s32.totalorder %s3955_s2, %s3091_s27  ;;  %p3095_p9 = scmp.lt.u32.totalorder %s3091_s27, %s3955_s2 }
  0x18   :  { %p3097_p10 = pnand %p3095_p9, %p3092_p8 }
  0x1a   :  { %3100 = shalt.err (!%p3097_p10)
}
  0x1b   :  { %s3101_s16 = scalar_lea.vmem %s3270_s28, 1024  ;;  %p3106_p12 = scmp.lt.s32.totalorder %s3270_s28, %s3270_s28 }
  0x1c   :  { %p3102_p11 = scmp.ne.s32.totalorder %s3270_s28, %s3101_s16  ;;  %p3107_p13 = scmp.lt.s32.totalorder %s3101_s16, %s3101_s16 }
  0x1e   :  { %p3108_p0 = por %p3107_p13, %p3106_p12 }
  0x20   :  { %p3109_p1 = pnand %p3108_p0, %p3102_p11 }
  0x22   :  { %3112 = shalt.err (!%p3109_p1)
}
  0x23   :  { %38 = dma.hbm_to_vmem [thread:$0]  %s3955_s2, 1024, %s3270_s28, [#allocation5], %s3189_s20, %s3189_s20, %s3190_s21  }
  0x24   :  { %s3191_s17 = smov [#allocation9]   ;;  %s3192_s19 = smov [#allocation10]  }
  0x25   :  { %s56_s18 = sshll.u32 %s3191_s17, 4  ;;  %s74_s22 = sshll.u32 %s3192_s19, 4  ;;  %s57_s18 = int_to_ptr.vmem [resolvable:$true] %s56_s18  ;;  %s3307_s22 = int_to_ptr.vmem [resolvable:$true] %s74_s22 }
  0x26   :  { %s3113_s25 = scalar_lea.hbm %s3957_s4, 512 }
  0x27   :  { %p3114_p2 = scmp.ne.s32.totalorder %s3957_s4, %s3113_s25  ;;  %p3117_p3 = scmp.lt.u32.totalorder %s3113_s25, %s3957_s4 }
  0x29   :  { %p3119_p4 = pnand %p3117_p3, %p3114_p2 }
  0x2b   :  { %3122 = shalt.err (!%p3119_p4)
}
  0x2c   :  { %s3123_s2 = scalar_lea.vmem %s57_s18, 512  ;;  %p3128_p6 = scmp.lt.s32.totalorder %s57_s18, %s57_s18 }
  0x2d   :  { %p3124_p5 = scmp.ne.s32.totalorder %s57_s18, %s3123_s2  ;;  %p3129_p7 = scmp.lt.s32.totalorder %s3123_s2, %s3123_s2 }
  0x2f   :  { %p3130_p8 = por %p3129_p7, %p3128_p6 }
  0x31   :  { %p3131_p9 = pnand %p3130_p8, %p3124_p5 }
  0x33   :  { %3134 = shalt.err (!%p3131_p9)
}
  0x34   :  { %62 = dma.hbm_to_vmem [thread:$0]  %s3957_s4, 512, %s57_s18, [#allocation8], %s3189_s20, %s3189_s20, %s3190_s21  }
  0x35   :  { %s3135_s26 = scalar_lea.hbm %s3961_s8, 512 }
  0x36   :  { %p3136_p10 = scmp.ne.s32.totalorder %s3961_s8, %s3135_s26  ;;  %p3139_p11 = scmp.lt.u32.totalorder %s3135_s26, %s3961_s8 }
  0x38   :  { %p3141_p12 = pnand %p3139_p11, %p3136_p10 }
  0x3a   :  { %3144 = shalt.err (!%p3141_p12)
}
  0x3b   :  { %s3145_s25 = scalar_lea.vmem %s3307_s22, 512  ;;  %p3150_p0 = scmp.lt.s32.totalorder %s3307_s22, %s3307_s22 }
  0x3c   :  { %p3146_p13 = scmp.ne.s32.totalorder %s3307_s22, %s3145_s25  ;;  %p3151_p1 = scmp.lt.s32.totalorder %s3145_s25, %s3145_s25 }
  0x3e   :  { %p3152_p2 = por %p3151_p1, %p3150_p0 }
  0x40   :  { %p3153_p3 = pnand %p3152_p2, %p3146_p13 }
  0x42   :  { %3156 = shalt.err (!%p3153_p3)
}
  0x43   :  { %80 = dma.hbm_to_vmem [thread:$0]  %s3961_s8, 512, %s3307_s22, [#allocation11], %s3189_s20, %s3189_s20, %s3190_s21  }
  0x44   :  { %3179 = dma.done.wait [#allocation5], 1024  }
  0x45   :  { %3180 = vsyncadd [#allocation5], 4294966272 }
  0x46   :  { %3181 = dma.done.wait [#allocation8], 1024  }
  0x47   :  { %3182 = vsyncadd [#allocation8], 4294966272 }
  0x48   :  { %3183 = dma.done.wait [#allocation11], 512  }
  0x49   :  { %3184 = vsyncadd [#allocation11], 4294966784  ;;  %v107_v0 = vld [vmem:[#allocation7] sm:$0xff]  ;;  %v108_v1 = vld [vmem:[#allocation7 + $0x8] sm:$0xff]  ;;  %vm118_vm0 = vcmask 261120   ;;  %v3193_v19 = vmov 0.0|0.0  }
  0x4a   :  { %v248_v2 = vld [vmem:[%s3960_s7] sm:$0xff]  ;;  %v2822_v3 = vpack.c.bf16 %v108_v1, %v107_v0  ;;  %v249_v4 = vld [vmem:[%s3960_s7 + $0x8] sm:$0xff]  ;;  %v109_v5 = vld [vmem:[#allocation7 + $0x10] sm:$0xff]  ;;  %vm3194_vm1 = vmmov 0   ;;  %v3195_v33 = vmov 0.0   ;;  %v3196_v63 = vmov 0  }
  0x4b   :  { %v110_v6 = vld [vmem:[#allocation7 + $0x18] sm:$0xff]  ;;  %v2830_v7 = vpack.c.bf16 %v249_v4, %v248_v2  ;;  %v250_v9 = vld [vmem:[%s3960_s7 + $0x10] sm:$0xff]  ;;  %v99_v11 = vld [vmem:[%s3953_s0] sm:$0xff]  ;;  %2948 = vset.pattern.permute.xlu1 %v3196_v63  ;;  %2947 = vset.pattern.permute.xlu0 %v3196_v63  ;;  %s3197_s22 = smov 64   ;;  %s3198_s16 = smov 96   ;;  %vm2286_vm10 = vcmask 7168  }
  0x4c   :  { %v2826_v8 = vpack.c.bf16 %v110_v6, %v109_v5  ;;  %v251_v10 = vld [vmem:[%s3960_s7 + $0x18] sm:$0xff]  ;;  %2823 = vmatprep.subr.bf16.mxu0 %v2822_v3  ;;  %2614 = vmatprep.mubr.msk.f32.mxu0 %vm118_vm0, %v99_v11  ;;  %v372_v13 = vld [vmem:[#allocation9] sm:$0xff]  ;;  %v373_v14 = vld [vmem:[#allocation9 + $0x8] sm:$0xff] }
  0x4d   :  { %v2834_v12 = vpack.c.bf16 %v251_v10, %v250_v9  ;;  %2825 = vmatpush3.bf16.msra.mxu0 %v2822_v3  ;;  %2831 = vmatprep.subr.bf16.mxu1 %v2830_v7  ;;  %v376_v15 = vld [vmem:[#allocation10] sm:$0xff]  ;;  %v377_v16 = vld [vmem:[#allocation10 + $0x8] sm:$0xff]  ;;  %v3364_v18 = vpack.c.bf16 %v373_v14, %v372_v13  ;;  %v101_v20 = vld [vmem:[%s3953_s0 + $0x10] sm:$0xff] }
  0x4e   :  { %2833 = vmatpush3.bf16.msra.mxu1 %v2830_v7  ;;  %2827 = vmatprep.subr.bf16.mxu0 %v2826_v8  ;;  %v100_v17 = vld [vmem:[%s3953_s0 + $0x8] sm:$0xff]  ;;  %v3371_v21 = vpack.c.bf16 %v377_v16, %v376_v15  ;;  %v374_v22 = vld [vmem:[#allocation9 + $0x10] sm:$0xff]  ;;  %v375_v23 = vld [vmem:[#allocation9 + $0x18] sm:$0xff] }
  0x4f   :  { %2835 = vmatprep.subr.bf16.mxu1 %v2834_v12  ;;  %2634 = vmatprep.mubr.msk.f32.mxu1 %vm118_vm0, %v99_v11  ;;  %v378_v24 = vld [vmem:[#allocation10 + $0x10] sm:$0xff]  ;;  %v379_v25 = vld [vmem:[#allocation10 + $0x18] sm:$0xff]  ;;  %v103_v27 = vld [vmem:[%s3953_s0 + $0x20] sm:$0xff]  ;;  %v3384_v28 = vpack.c.bf16 %v375_v23, %v374_v22 }
  0x50   :  { %v102_v26 = vld [vmem:[%s3953_s0 + $0x18] sm:$0xff]  ;;  %v3388_v29 = vpack.c.bf16 %v379_v25, %v378_v24  ;;  %v104_v30 = vld [vmem:[%s3953_s0 + $0x28] sm:$0xff]  ;;  %v105_v31 = vld [vmem:[%s3953_s0 + $0x30] sm:$0xff] }
  0x51   :  { %2829 = vmatpush3.bf16.msra.mxu0 %v2826_v8  ;;  %v106_v32 = vld [vmem:[%s3953_s0 + $0x38] sm:$0xff]  ;;  %v2451_v34 = vld [vmem:[%s3958_s5] ss:$0 sm:$0xff] }
  0x52   :  { %2837 = vmatpush3.bf16.msra.mxu1 %v2834_v12  ;;  %2838 = vmatprep.subr.bf16.mxu0 %v3193_v19  ;;  %v2460_v35 = vld [vmem:[%s3962_s9] ss:$0 sm:$0xff]  ;;  %v371_v11 = vld [vmem:[%s3954_s1 + $0x38] sm:$0xff] }
  0x53   :  { %2844 = vmatprep.subr.bf16.mxu1 %v3193_v19  ;;  %v3467_v2 = vld [vmem:[%s3959_s6] ss:$0 sm:$0xff]  ;;  %v609_v13 = vsub.f32 1.0, %v371_v11 }
  0x54   :  { %2615 = vmatmul.mubr.msk.f32.vlgmr.msra.gmra.mrb[0].mxu0 %vm118_vm0, %v100_v17  ;;  %v3475_v8 = vld [vmem:[%s3963_s10] ss:$0 sm:$0xff] }
  0x55   :  { %2635 = vmatmul.mubr.msk.f32.vlgmr.msra.gmra.mrb[0].mxu1 %vm118_vm0, %v100_v17  ;;  %2840 = vmatpush3.bf16.msra.mxu0 %v3364_v18  ;;  %v364_v12 = vld [vmem:[%s3954_s1] sm:$0xff] }
  0x56   :  { %2617 = vmatprep.mubr.msk.f32.mxu0 %vm118_vm0, %v101_v20  ;;  %2637 = vmatprep.mubr.msk.f32.mxu1 %vm118_vm0, %v101_v20 }
  0x57   :  { %2846 = vmatpush3.bf16.msra.mxu1 %v3371_v21  ;;  %2841 = vmatprep.subr.bf16.mxu0 %v3193_v19 }
  0x58   :  { %2618 = vmatmul.mubr.msk.f32.gmra.mrb[2].mxu0 %vm118_vm0, %v102_v26  ;;  %2847 = vmatprep.subr.bf16.mxu1 %v3193_v19 }
  0x59   :  { %2638 = vmatmul.mubr.msk.f32.gmra.mrb[2].mxu1 %vm118_vm0, %v102_v26  ;;  %2620 = vmatprep.mubr.msk.f32.mxu0 %vm118_vm0, %v103_v27 }
  0x5a   :  { %2640 = vmatprep.mubr.msk.f32.mxu1 %vm118_vm0, %v103_v27  ;;  %2843 = vmatpush3.bf16.msra.mxu0 %v3384_v28 }
  0x5b   :  { %2849 = vmatpush3.bf16.msra.mxu1 %v3388_v29  ;;  %2850 = vmatprep.subr.bf16.mxu0 %v3193_v19 }
  0x5c   :  { %2621 = vmatmul.mubr.msk.f32.gmra.mrb[4].mxu0 %vm118_vm0, %v104_v30  ;;  %2856 = vmatprep.subr.bf16.mxu1 %v3193_v19 }
  0x5d   :  { %2641 = vmatmul.mubr.msk.f32.gmra.mrb[4].mxu1 %vm118_vm0, %v104_v30  ;;  %2623 = vmatprep.mubr.msk.f32.mxu0 %vm118_vm0, %v105_v31 }
  0x5e   :  { %2643 = vmatprep.mubr.msk.f32.mxu1 %vm118_vm0, %v105_v31 }
  0x60   :  { %2624 = vmatmul.mubr.msk.f32.gmra.mrb[6].mxu0 %vm118_vm0, %v106_v32 }
  0x61   :  { %2644 = vmatmul.mubr.msk.f32.gmra.mrb[6].mxu1 %vm118_vm0, %v106_v32  ;;  %2654 = vmatprep.mubr.msk.f32.mxu0 %vm3194_vm1, %v3195_v33 }
  0x62   :  { %2665 = vmatprep.mubr.msk.f32.mxu1 %vm3194_vm1, %v3195_v33 }
  0x64   :  { %2655 = vmatmul.mubr.f32.vlgmr.msra.gmra.mrb[8].mxu0 %v3195_v33 }
  0x65   :  { %2666 = vmatmul.mubr.f32.vlgmr.msra.gmra.mrb[8].mxu1 %v3195_v33  ;;  %2852 = vmatpush3.bf16.msra.mxu0 %v3364_v18 }
  0x66   :  { %2853 = vmatprep.subr.bf16.mxu0 %v3193_v19  ;;  %2858 = vmatpush3.bf16.msra.mxu1 %v3371_v21 }
  0x67   :  { %2676 = vmatprep.mubr.msk.f32.mxu0 %vm3194_vm1, %v3195_v33  ;;  %2859 = vmatprep.subr.bf16.mxu1 %v3193_v19 }
  0x68   :  { %2687 = vmatprep.mubr.msk.f32.mxu1 %vm3194_vm1, %v3195_v33 }
  0x69   :  { %2855 = vmatpush3.bf16.msra.mxu0 %v3384_v28 }
  0x6a   :  { %2861 = vmatpush3.bf16.msra.mxu1 %v3388_v29  ;;  %2862 = vmatprep.subr.bf16.mxu0 %v3193_v19 }
  0x6b   :  { %2868 = vmatprep.subr.bf16.mxu1 %v3193_v19 }
 0x127   :  { %v2616_v36 = vpop.f32.mrb[0].mxu0 }
 0x128   :  { %v3438_v37 = vadd.f32 %v2616_v36, %v2451_v34  ;;  %v209_v38 = vpop.f32.mrb[1].mxu0  ;;  %v2636_v39 = vpop.f32.mrb[0].mxu1  ;;  %v493_v36 = vsub.f32 1.0, %v364_v12 }
 0x129   :  { %v3440_v40 = vadd.f32 %v2636_v39, %v2460_v35  ;;  %v325_v41 = vpop.f32.mrb[1].mxu1  ;;  %v210_v14 = vadd.f32 %v2451_v34, %v209_v38 }
 0x12a   :  { %v3442_v42 = vadd.f32 %v2460_v35, %v325_v41 }
 0x12b   :  { %v2619_v43 = vpop.f32.mrb[2].mxu0 }
 0x12c   :  { %v3444_v44 = vadd.f32 %v2619_v43, %v2451_v34  ;;  %v219_v45 = vpop.f32.mrb[3].mxu0  ;;  %v2639_v46 = vpop.f32.mrb[2].mxu1 }
 0x12d   :  { %v3446_v47 = vadd.f32 %v2451_v34, %v219_v45  ;;  %v3448_v48 = vadd.f32 %v2639_v46, %v2460_v35  ;;  %v335_v49 = vpop.f32.mrb[3].mxu1 }
 0x12e   :  { %v3450_v50 = vadd.f32 %v2460_v35, %v335_v49 }
 0x12f   :  { %v2622_v51 = vpop.f32.mrb[4].mxu0 }
 0x130   :  { %v3452_v52 = vadd.f32 %v2622_v51, %v2451_v34  ;;  %v229_v53 = vpop.f32.mrb[5].mxu0  ;;  %v2642_v54 = vpop.f32.mrb[4].mxu1 }
 0x131   :  { %v3454_v55 = vadd.f32 %v2451_v34, %v229_v53  ;;  %v3456_v56 = vadd.f32 %v2642_v54, %v2460_v35  ;;  %v345_v57 = vpop.f32.mrb[5].mxu1 }
 0x132   :  { %v3458_v58 = vadd.f32 %v2460_v35, %v345_v57 }
 0x133   :  { %v2625_v59 = vpop.f32.mrb[6].mxu0 }
 0x134   :  { %v3460_v60 = vadd.f32 %v2625_v59, %v2451_v34  ;;  %v239_v61 = vpop.f32.mrb[7].mxu0  ;;  %v2645_v62 = vpop.f32.mrb[6].mxu1 }
 0x135   :  { %v3462_v0 = vadd.f32 %v2451_v34, %v239_v61  ;;  %v355_v1 = vpop.f32.mrb[7].mxu1  ;;  %v361_v15 = vadd.f32 %v2645_v62, %v2460_v35 }
 0x136   :  { %v3469_v3 = vadd.f32 %v2460_v35, %v355_v1 }
 0x137   :  { %v457_v4 = vpop.f32.mrb[8].mxu0 }
 0x138   :  { %v458_v5 = vadd.f32 %v3467_v2, %v457_v4  ;;  %v2656_v6 = vpop.f32.mrb[9].mxu0  ;;  %v573_v7 = vpop.f32.mrb[8].mxu1 }
 0x139   :  { %v2667_v9 = vpop.f32.mrb[9].mxu1  ;;  %v574_v10 = vadd.f32 %v3475_v8, %v573_v7 }
 0x13a   :  { %469 = vrot.lane.b32.xlu0 %v458_v5, %s3197_s22  ;;  %v461_v16 = vadd.f32 %v458_v5, %v210_v14 }
 0x13b   :  { %v577_v20 = vadd.f32 %v574_v10, %v361_v15 }
 0x13c   :  { %v2470_v17 = vmul.f32 -1.442695, %v461_v16 }
 0x13d   :  { %v2472_v22 = vmul.f32 -1.442695, %v577_v20 }
 0x13e   :  { %585 = vrot.lane.b32.xlu0 %v574_v10, %s3197_s22  ;;  %2949 = vpow2.f32 %v2470_v17 }
 0x13f   :  { %2951 = vpow2.f32 %v2472_v22 }
 0x142   :  { %489 = vperm.xlu0 %2947, %v364_v12  }
 0x146   :  { %612 = vperm.xlu0 %2947, %v609_v13  }
 0x148   :  { %v2950_v23 = vpop.eup %2949 }
 0x149   :  { %v465_v24 = vadd.f32 1.0, %v2950_v23  ;;  %v2952_v25 = vpop.eup %2951 }
 0x14a   :  { %v581_v26 = vadd.f32 1.0, %v2952_v25 }
 0x14b   :  { %2953 = vrcp.f32 %v465_v24 }
 0x14c   :  { %2955 = vrcp.f32 %v581_v26 }
 0x155   :  { %v2954_v27 = vpop.eup %2953 }
 0x156   :  { %v2956_v32 = vpop.eup %2955  ;;  %v479_v54 = vsub.f32 1.0, %v2954_v27  ;;  %v485_v61 = vmul.f32 0.0, %v2954_v27 }
 0x157   :  { %v595_v1 = vsub.f32 1.0, %v2956_v32  ;;  %v601_v7 = vmul.f32 0.0, %v2956_v32 }
 0x1ac   :  { %v470_v30 = vpop.permute.xlu0 %469 }
 0x1ad   :  { %v472_v31 = vmul.f32 %v2954_v27, %v470_v30 }
 0x1af   :  { %474 = vrot.lane.b32.xlu1 %v472_v31, %s3197_s22 }
 0x1b0   :  { %v586_v34 = vpop.permute.xlu0 %585 }
 0x1b1   :  { %v588_v35 = vmul.f32 %v2956_v32, %v586_v34 }
 0x1b3   :  { %590 = vrot.lane.b32.xlu1 %v588_v35, %s3197_s22 }
 0x1b7   :  { %496 = vperm.xlu1 %2948, %v493_v36  }
 0x1bb   :  { %605 = vperm.xlu1 %2948, %v371_v11  }
 0x1c1   :  { %v3492_v51 = vpop.permute.xlu0 %489 }
 0x1c5   :  { %v3496_v57 = vpop.permute.xlu0 %612 }
 0x1c6   :  { %v615_v12 = vmul.f32 0.0, %v3496_v57 }
 0x221   :  { %v475_v38 = vpop.permute.xlu1 %474 }
 0x222   :  { %v477_v39 = vadd.f32 %v475_v38, %v210_v14 }
 0x224   :  { %2957 = vtanh.f32 %v477_v39 }
 0x225   :  { %v591_v41 = vpop.permute.xlu1 %590 }
 0x226   :  { %v593_v43 = vadd.f32 %v591_v41, %v361_v15 }
 0x228   :  { %2959 = vtanh.f32 %v593_v43 }
 0x22e   :  { %v2958_v45 = vpop.eup %2957 }
 0x22f   :  { %481 = vrot.lane.b32.xlu1 %v2958_v45, %s3198_s16 }
 0x232   :  { %v2960_v46 = vpop.eup %2959 }
 0x233   :  { %597 = vrot.lane.b32.xlu0 %v2960_v46, %s3198_s16  ;;  %v365_v46 = vld [vmem:[%s3954_s1 + $0x8] sm:$0xff] }
 0x236   :  { %v3490_v49 = vpop.permute.xlu1 %496 }
 0x237   :  { %v499_v5 = vmul.f32 0.0, %v3490_v49 }
 0x23a   :  { %v3494_v53 = vpop.permute.xlu1 %605 }
 0x2a1   :  { %v482_v59 = vpop.permute.xlu1 %481 }
 0x2a2   :  { %v484_v62 = vmul.f32 %v482_v59, %v479_v54  ;;  %v732_v59 = vsub.f32 1.0, %v365_v46 }
 0x2a4   :  { %v486_v63 = vadd.f32 %v485_v61, %v484_v62  ;;  %v370_v61 = vld [vmem:[%s3954_s1 + $0x30] sm:$0xff] }
 0x2a5   :  { %v598_v4 = vpop.permute.xlu0 %597  ;;  %v844_v62 = vsub.f32 1.0, %v370_v61 }
 0x2a6   :  { %v492_v6 = vmul.f32 %v3492_v51, %v486_v63  ;;  %v600_v9 = vmul.f32 %v598_v4, %v595_v1 }
 0x2a8   :  { %v602_v10 = vadd.f32 %v601_v7, %v600_v9  ;;  %v3500_v11 = vadd.f32 %v499_v5, %v492_v6 }
 0x2aa   :  { %v608_v13 = vmul.f32 %v3494_v53, %v602_v10  ;;  %618 = vrot.lane.b32.xlu1 %v3500_v11, %s3198_s16 }
 0x2ac   :  { %v3506_v14 = vadd.f32 %v615_v12, %v608_v13 }
 0x2ae   :  { %623 = vrot.lane.b32.xlu0 %v3506_v14, %s3198_s16 }
 0x31c   :  { %v619_v15 = vpop.permute.xlu1 %618 }
 0x31d   :  { %621 = vst.msk [vmem:[#allocation2] sm:$0xff] %vm118_vm0, %v619_v15  ;;  %2677 = vmatmul.mubr.msk.f32.vlgmr.msra.gmra.mrb[10].mxu0 %vm118_vm0, %v619_v15 }
 0x31e   :  { %2864 = vmatpush3.bf16.msra.mxu0 %v3364_v18  ;;  %2698 = vmatprep.mubr.msk.f32.mxu0 %vm3194_vm1, %v3195_v33 }
 0x31f   :  { %2865 = vmatprep.subr.bf16.mxu0 %v3193_v19 }
 0x320   :  { %v624_v16 = vpop.permute.xlu0 %623 }
 0x321   :  { %627 = vst.msk [vmem:[#allocation3 + $0x38] sm:$0xff] %vm118_vm0, %v624_v16  ;;  %2688 = vmatmul.mubr.msk.f32.vlgmr.msra.gmra.mrb[10].mxu1 %vm118_vm0, %v624_v16 }
 0x322   :  { %2867 = vmatpush3.bf16.msra.mxu0 %v3384_v28  ;;  %2870 = vmatpush3.bf16.msra.mxu1 %v3371_v21 }
 0x323   :  { %2871 = vmatprep.subr.bf16.mxu1 %v3193_v19  ;;  %2709 = vmatprep.mubr.msk.f32.mxu1 %vm3194_vm1, %v3195_v33 }
 0x324   :  { %2874 = vmatprep.subr.bf16.mxu0 %v3193_v19 }
 0x326   :  { %2873 = vmatpush3.bf16.msra.mxu1 %v3388_v29 }
 0x327   :  { %2880 = vmatprep.subr.bf16.mxu1 %v3193_v19 }
 0x3f0   :  { %v696_v17 = vpop.f32.mrb[10].mxu0 }
 0x3f1   :  { %v697_v20 = vadd.f32 %v3467_v2, %v696_v17  ;;  %v2678_v22 = vpop.f32.mrb[11].mxu0 }
 0x3f3   :  { %708 = vrot.lane.b32.xlu1 %v697_v20, %s3197_s22  ;;  %v700_v26 = vadd.f32 %v697_v20, %v3438_v37 }
 0x3f4   :  { %v808_v23 = vpop.f32.mrb[10].mxu1 }
 0x3f5   :  { %v809_v24 = vadd.f32 %v3475_v8, %v808_v23  ;;  %v2689_v25 = vpop.f32.mrb[11].mxu1  ;;  %v2474_v27 = vmul.f32 -1.442695, %v700_v26 }
 0x3f7   :  { %820 = vrot.lane.b32.xlu0 %v809_v24, %s3197_s22  ;;  %v812_v30 = vadd.f32 %v809_v24, %v3469_v3  ;;  %2961 = vpow2.f32 %v2474_v27 }
 0x3f9   :  { %v2476_v31 = vmul.f32 -1.442695, %v812_v30 }
 0x3fb   :  { %2963 = vpow2.f32 %v2476_v31 }
 0x401   :  { %v2962_v32 = vpop.eup %2961 }
 0x402   :  { %v704_v34 = vadd.f32 1.0, %v2962_v32 }
 0x404   :  { %2965 = vrcp.f32 %v704_v34 }
 0x405   :  { %v2964_v35 = vpop.eup %2963 }
 0x406   :  { %v816_v36 = vadd.f32 1.0, %v2964_v35 }
 0x408   :  { %2967 = vrcp.f32 %v816_v36 }
 0x40e   :  { %v2966_v38 = vpop.eup %2965 }
 0x40f   :  { %v718_v13 = vsub.f32 1.0, %v2966_v38  ;;  %v724_v16 = vmul.f32 %v2966_v38, %v3500_v11 }
 0x412   :  { %v2968_v43 = vpop.eup %2967 }
 0x413   :  { %v830_v20 = vsub.f32 1.0, %v2968_v43  ;;  %v836_v25 = vmul.f32 %v2968_v43, %v3506_v14 }
 0x465   :  { %v709_v39 = vpop.permute.xlu1 %708 }
 0x466   :  { %v711_v41 = vmul.f32 %v2966_v38, %v709_v39 }
 0x468   :  { %713 = vrot.lane.b32.xlu1 %v711_v41, %s3197_s22 }
 0x469   :  { %v821_v45 = vpop.permute.xlu0 %820 }
 0x46a   :  { %v823_v54 = vmul.f32 %v2968_v43, %v821_v45 }
 0x46c   :  { %825 = vrot.lane.b32.xlu0 %v823_v54, %s3197_s22  ;;  %728 = vperm.xlu1 %2948, %v365_v46  }
 0x470   :  { %735 = vperm.xlu0 %2947, %v732_v59   ;;  %840 = vperm.xlu1 %2948, %v370_v61  }
 0x474   :  { %847 = vperm.xlu0 %2947, %v844_v62  }
 0x4da   :  { %v714_v63 = vpop.permute.xlu1 %713 }
 0x4db   :  { %v716_v1 = vadd.f32 %v714_v63, %v3438_v37 }
 0x4dd   :  { %2969 = vtanh.f32 %v716_v1 }
 0x4de   :  { %v826_v4 = vpop.permute.xlu0 %825 }
 0x4df   :  { %v828_v5 = vadd.f32 %v826_v4, %v3469_v3 }
 0x4e1   :  { %2971 = vtanh.f32 %v828_v5 }
 0x4e7   :  { %v2970_v6 = vpop.eup %2969 }
 0x4e8   :  { %720 = vrot.lane.b32.xlu1 %v2970_v6, %s3198_s16 }
 0x4eb   :  { %v2972_v7 = vpop.eup %2971  ;;  %v3544_v9 = vpop.permute.xlu1 %728 }
 0x4ec   :  { %832 = vrot.lane.b32.xlu0 %v2972_v7, %s3198_s16 }
 0x4ef   :  { %v3546_v10 = vpop.permute.xlu0 %735  ;;  %v3548_v12 = vpop.permute.xlu1 %840 }
 0x4f0   :  { %v738_v23 = vmul.f32 %v3546_v10, %v3500_v11 }
 0x4f3   :  { %v3550_v15 = vpop.permute.xlu0 %847 }
 0x4f4   :  { %v850_v31 = vmul.f32 %v3550_v15, %v3506_v14 }
 0x55a   :  { %v721_v37 = vpop.permute.xlu1 %720 }
 0x55b   :  { %v723_v3 = vmul.f32 %v721_v37, %v718_v13  ;;  %v3594_v37 = vld [vmem:[%s3954_s1 + $0x10] sm:$0xff] }
 0x55c   :  { %vm2264_vm7 = vcmp.gt.f32.partialorder %v3594_v37, 0.5 }
 0x55d   :  { %v725_v17 = vadd.f32 %v724_v16, %v723_v3  ;;  %v968_v3 = vsub.f32 1.0, %v3594_v37 }
 0x55e   :  { %v833_v22 = vpop.permute.xlu0 %832 }
 0x55f   :  { %v731_v24 = vmul.f32 %v3544_v9, %v725_v17  ;;  %v835_v26 = vmul.f32 %v833_v22, %v830_v20  ;;  %v3602_v17 = vld [vmem:[%s3954_s1 + $0x28] sm:$0xff] }
 0x560   :  { %v1080_v20 = vsub.f32 1.0, %v3602_v17  ;;  %vm2267_vm2 = vcmp.gt.f32.partialorder %v3602_v17, 0.5 }
 0x561   :  { %v837_v27 = vadd.f32 %v836_v25, %v835_v26  ;;  %v3557_v30 = vadd.f32 %v738_v23, %v731_v24 }
 0x563   :  { %v843_v32 = vmul.f32 %v3548_v12, %v837_v27  ;;  %853 = vrot.lane.b32.xlu1 %v3557_v30, %s3198_s16 }
 0x565   :  { %v3564_v34 = vadd.f32 %v850_v31, %v843_v32 }
 0x567   :  { %859 = vrot.lane.b32.xlu0 %v3564_v34, %s3198_s16 }
 0x5d5   :  { %v854_v11 = vpop.permute.xlu1 %853 }
 0x5d6   :  { %857 = vst.msk [vmem:[#allocation2 + $0x8] sm:$0xff] %vm118_vm0, %v854_v11  ;;  %2699 = vmatmul.mubr.msk.f32.vlgmr.msra.gmra.mrb[12].mxu0 %vm118_vm0, %v854_v11 }
 0x5d7   :  { %2876 = vmatpush3.bf16.msra.mxu0 %v3364_v18  ;;  %2720 = vmatprep.mubr.msk.f32.mxu0 %vm3194_vm1, %v3195_v33 }
 0x5d8   :  { %2877 = vmatprep.subr.bf16.mxu0 %v3193_v19 }
 0x5d9   :  { %v860_v14 = vpop.permute.xlu0 %859 }
 0x5da   :  { %863 = vst.msk [vmem:[#allocation3 + $0x30] sm:$0xff] %vm118_vm0, %v860_v14  ;;  %2710 = vmatmul.mubr.msk.f32.vlgmr.msra.gmra.mrb[12].mxu1 %vm118_vm0, %v860_v14 }
 0x5db   :  { %2879 = vmatpush3.bf16.msra.mxu0 %v3384_v28  ;;  %2882 = vmatpush3.bf16.msra.mxu1 %v3371_v21 }
 0x5dc   :  { %2883 = vmatprep.subr.bf16.mxu1 %v3193_v19  ;;  %2731 = vmatprep.mubr.msk.f32.mxu1 %vm3194_vm1, %v3195_v33 }
 0x5dd   :  { %2886 = vmatprep.subr.bf16.mxu0 %v3193_v19 }
 0x5df   :  { %2885 = vmatpush3.bf16.msra.mxu1 %v3388_v29 }
 0x5e0   :  { %2892 = vmatprep.subr.bf16.mxu1 %v3193_v19 }
 0x6a9   :  { %v932_v35 = vpop.f32.mrb[12].mxu0 }
 0x6aa   :  { %v933_v36 = vadd.f32 %v3467_v2, %v932_v35  ;;  %v2700_v38 = vpop.f32.mrb[13].mxu0 }
 0x6ac   :  { %944 = vrot.lane.b32.xlu1 %v933_v36, %s3197_s22  ;;  %v936_v45 = vadd.f32 %v933_v36, %v3446_v47 }
 0x6ad   :  { %v1044_v39 = vpop.f32.mrb[12].mxu1 }
 0x6ae   :  { %v1045_v41 = vadd.f32 %v3475_v8, %v1044_v39  ;;  %v2711_v43 = vpop.f32.mrb[13].mxu1  ;;  %v2478_v46 = vmul.f32 -1.442695, %v936_v45 }
 0x6b0   :  { %1056 = vrot.lane.b32.xlu0 %v1045_v41, %s3197_s22  ;;  %v1048_v54 = vadd.f32 %v1045_v41, %v3456_v56  ;;  %2973 = vpow2.f32 %v2478_v46 }
 0x6b2   :  { %v2480_v59 = vmul.f32 -1.442695, %v1048_v54 }
 0x6b4   :  { %2975 = vpow2.f32 %v2480_v59 }
 0x6ba   :  { %v2974_v61 = vpop.eup %2973 }
 0x6bb   :  { %v940_v62 = vadd.f32 1.0, %v2974_v61 }
 0x6bd   :  { %2977 = vrcp.f32 %v940_v62 }
 0x6be   :  { %v2976_v63 = vpop.eup %2975 }
 0x6bf   :  { %v1052_v1 = vadd.f32 1.0, %v2976_v63 }
 0x6c1   :  { %2979 = vrcp.f32 %v1052_v1 }
 0x6c7   :  { %v2978_v4 = vpop.eup %2977 }
 0x6c8   :  { %v954_v14 = vsub.f32 1.0, %v2978_v4  ;;  %v960_v36 = vmul.f32 %v2978_v4, %v3557_v30 }
 0x6cb   :  { %v2980_v7 = vpop.eup %2979 }
 0x6cc   :  { %v1066_v39 = vsub.f32 1.0, %v2980_v7  ;;  %v1072_v46 = vmul.f32 %v2980_v7, %v3564_v34 }
 0x71e   :  { %v945_v5 = vpop.permute.xlu1 %944 }
 0x71f   :  { %v947_v6 = vmul.f32 %v2978_v4, %v945_v5 }
 0x721   :  { %949 = vrot.lane.b32.xlu1 %v947_v6, %s3197_s22 }
 0x722   :  { %v1057_v13 = vpop.permute.xlu0 %1056 }
 0x723   :  { %v1059_v16 = vmul.f32 %v2980_v7, %v1057_v13 }
 0x725   :  { %1061 = vrot.lane.b32.xlu0 %v1059_v16, %s3197_s22  ;;  %964 = vperm.xlu1 %2948, %v3594_v37  }
 0x729   :  { %971 = vperm.xlu0 %2947, %v968_v3   ;;  %1076 = vperm.xlu1 %2948, %v3602_v17   ;;  %v3067_v17 = vld [vmem:[%s3954_s1] sm:$0xff] }
 0x72a   :  { %vm2262_vm8 = vcmp.gt.f32.partialorder %v3067_v17, 0.5 }
 0x72d   :  { %1083 = vperm.xlu0 %2947, %v1080_v20  }
 0x793   :  { %v950_v22 = vpop.permute.xlu1 %949 }
 0x794   :  { %v952_v23 = vadd.f32 %v950_v22, %v3446_v47 }
 0x796   :  { %2981 = vtanh.f32 %v952_v23 }
 0x797   :  { %v1062_v24 = vpop.permute.xlu0 %1061 }
 0x798   :  { %v1064_v25 = vadd.f32 %v1062_v24, %v3456_v56 }
 0x79a   :  { %2983 = vtanh.f32 %v1064_v25 }
 0x7a0   :  { %v2982_v26 = vpop.eup %2981 }
 0x7a1   :  { %956 = vrot.lane.b32.xlu1 %v2982_v26, %s3198_s16 }
 0x7a4   :  { %v2984_v27 = vpop.eup %2983  ;;  %v3610_v31 = vpop.permute.xlu1 %964 }
 0x7a5   :  { %1068 = vrot.lane.b32.xlu0 %v2984_v27, %s3198_s16 }
 0x7a8   :  { %v3612_v32 = vpop.permute.xlu0 %971  ;;  %v3614_v11 = vpop.permute.xlu1 %1076 }
 0x7a9   :  { %v974_v43 = vmul.f32 %v3612_v32, %v3557_v30 }
 0x7ac   :  { %v3616_v35 = vpop.permute.xlu0 %1083 }
 0x7ad   :  { %v1086_v62 = vmul.f32 %v3616_v35, %v3564_v34 }
 0x813   :  { %v957_v47 = vpop.permute.xlu1 %956 }
 0x814   :  { %v959_v56 = vmul.f32 %v957_v47, %v954_v14 }
 0x816   :  { %v961_v38 = vadd.f32 %v960_v36, %v959_v56 }
 0x817   :  { %v1069_v41 = vpop.permute.xlu0 %1068 }
 0x818   :  { %v967_v45 = vmul.f32 %v3610_v31, %v961_v38  ;;  %v1071_v54 = vmul.f32 %v1069_v41, %v1066_v39  ;;  %v3660_v39 = vld [vmem:[%s3954_s1 + $0x18] sm:$0xff] }
 0x819   :  { %vm2265_vm6 = vcmp.gt.f32.partialorder %v3660_v39, 0.5 }
 0x81a   :  { %v1073_v59 = vadd.f32 %v1072_v46, %v1071_v54  ;;  %v3623_v61 = vadd.f32 %v974_v43, %v967_v45  ;;  %v1204_v43 = vsub.f32 1.0, %v3660_v39  ;;  %v3668_v45 = vld [vmem:[%s3954_s1 + $0x20] sm:$0xff] }
 0x81b   :  { %v1316_v46 = vsub.f32 1.0, %v3668_v45  ;;  %vm2266_vm3 = vcmp.gt.f32.partialorder %v3668_v45, 0.5 }
 0x81c   :  { %v1079_v63 = vmul.f32 %v3614_v11, %v1073_v59  ;;  %1089 = vrot.lane.b32.xlu1 %v3623_v61, %s3198_s16 }
 0x81e   :  { %v3630_v1 = vadd.f32 %v1086_v62, %v1079_v63 }
 0x820   :  { %1095 = vrot.lane.b32.xlu0 %v3630_v1, %s3198_s16 }
 0x88e   :  { %v1090_v30 = vpop.permute.xlu1 %1089 }
 0x88f   :  { %1093 = vst.msk [vmem:[#allocation2 + $0x10] sm:$0xff] %vm118_vm0, %v1090_v30  ;;  %2721 = vmatmul.mubr.msk.f32.vlgmr.msra.gmra.mrb[14].mxu0 %vm118_vm0, %v1090_v30 }
 0x890   :  { %2888 = vmatpush3.bf16.msra.mxu0 %v3364_v18  ;;  %2742 = vmatprep.mubr.msk.f32.mxu0 %vm3194_vm1, %v3195_v33 }
 0x891   :  { %2889 = vmatprep.subr.bf16.mxu0 %v3193_v19 }
 0x892   :  { %v1096_v34 = vpop.permute.xlu0 %1095 }
 0x893   :  { %1099 = vst.msk [vmem:[#allocation3 + $0x28] sm:$0xff] %vm118_vm0, %v1096_v34  ;;  %2732 = vmatmul.mubr.msk.f32.vlgmr.msra.gmra.mrb[14].mxu1 %vm118_vm0, %v1096_v34 }
 0x894   :  { %2891 = vmatpush3.bf16.msra.mxu0 %v3384_v28  ;;  %2894 = vmatpush3.bf16.msra.mxu1 %v3371_v21 }
 0x895   :  { %2895 = vmatprep.subr.bf16.mxu1 %v3193_v19  ;;  %2753 = vmatprep.mubr.msk.f32.mxu1 %vm3194_vm1, %v3195_v33 }
 0x896   :  { %2898 = vmatprep.subr.bf16.mxu0 %v3193_v19 }
 0x898   :  { %2897 = vmatpush3.bf16.msra.mxu1 %v3388_v29 }
 0x899   :  { %2904 = vmatprep.subr.bf16.mxu1 %v3193_v19 }
 0x962   :  { %v1168_v4 = vpop.f32.mrb[14].mxu0 }
 0x963   :  { %v1169_v5 = vadd.f32 %v3467_v2, %v1168_v4  ;;  %v2722_v6 = vpop.f32.mrb[15].mxu0 }
 0x965   :  { %1180 = vrot.lane.b32.xlu1 %v1169_v5, %s3197_s22  ;;  %v1172_v3 = vadd.f32 %v1169_v5, %v3444_v44 }
 0x966   :  { %v1280_v7 = vpop.f32.mrb[14].mxu1 }
 0x967   :  { %v1281_v13 = vadd.f32 %v3475_v8, %v1280_v7  ;;  %v2733_v16 = vpop.f32.mrb[15].mxu1  ;;  %v2482_v20 = vmul.f32 -1.442695, %v1172_v3 }
 0x969   :  { %1292 = vrot.lane.b32.xlu0 %v1281_v13, %s3197_s22  ;;  %v1284_v22 = vadd.f32 %v1281_v13, %v3458_v58  ;;  %2985 = vpow2.f32 %v2482_v20 }
 0x96b   :  { %v2484_v23 = vmul.f32 -1.442695, %v1284_v22 }
 0x96d   :  { %2987 = vpow2.f32 %v2484_v23 }
 0x973   :  { %v2986_v24 = vpop.eup %2985 }
 0x974   :  { %v1176_v25 = vadd.f32 1.0, %v2986_v24 }
 0x976   :  { %2989 = vrcp.f32 %v1176_v25 }
 0x977   :  { %v2988_v26 = vpop.eup %2987 }
 0x978   :  { %v1288_v27 = vadd.f32 1.0, %v2988_v26 }
 0x97a   :  { %2991 = vrcp.f32 %v1288_v27 }
 0x980   :  { %v2990_v14 = vpop.eup %2989 }
 0x981   :  { %v1190_v7 = vsub.f32 1.0, %v2990_v14  ;;  %v1196_v16 = vmul.f32 %v2990_v14, %v3623_v61 }
 0x984   :  { %v2992_v56 = vpop.eup %2991 }
 0x985   :  { %v1302_v20 = vsub.f32 1.0, %v2992_v56  ;;  %v1308_v25 = vmul.f32 %v2992_v56, %v3630_v1 }
 0x9d7   :  { %v1181_v47 = vpop.permute.xlu1 %1180 }
 0x9d8   :  { %v1183_v36 = vmul.f32 %v2990_v14, %v1181_v47 }
 0x9da   :  { %1185 = vrot.lane.b32.xlu1 %v1183_v36, %s3197_s22 }
 0x9db   :  { %v1293_v38 = vpop.permute.xlu0 %1292 }
 0x9dc   :  { %v1295_v41 = vmul.f32 %v2992_v56, %v1293_v38 }
 0x9de   :  { %1297 = vrot.lane.b32.xlu0 %v1295_v41, %s3197_s22  ;;  %1200 = vperm.xlu1 %2948, %v3660_v39  }
 0x9e2   :  { %1207 = vperm.xlu0 %2947, %v1204_v43   ;;  %1312 = vperm.xlu1 %2948, %v3668_v45  }
 0x9e6   :  { %1319 = vperm.xlu0 %2947, %v1316_v46  }
 0xa4c   :  { %v1186_v54 = vpop.permute.xlu1 %1185 }
 0xa4d   :  { %v1188_v59 = vadd.f32 %v1186_v54, %v3444_v44 }
 0xa4f   :  { %2993 = vtanh.f32 %v1188_v59 }
 0xa50   :  { %v1298_v62 = vpop.permute.xlu0 %1297 }
 0xa51   :  { %v1300_v63 = vadd.f32 %v1298_v62, %v3458_v58 }
 0xa53   :  { %2995 = vtanh.f32 %v1300_v63 }
 0xa59   :  { %v2994_v30 = vpop.eup %2993 }
 0xa5a   :  { %1192 = vrot.lane.b32.xlu1 %v2994_v30, %s3198_s16 }
 0xa5d   :  { %v2996_v34 = vpop.eup %2995  ;;  %v3676_v4 = vpop.permute.xlu1 %1200 }
 0xa5e   :  { %1304 = vrot.lane.b32.xlu0 %v2996_v34, %s3198_s16 }
 0xa61   :  { %v3678_v5 = vpop.permute.xlu0 %1207  ;;  %v3680_v6 = vpop.permute.xlu1 %1312 }
 0xa62   :  { %v1210_v23 = vmul.f32 %v3678_v5, %v3623_v61 }
 0xa65   :  { %v3682_v13 = vpop.permute.xlu0 %1319 }
 0xa66   :  { %v1322_v36 = vmul.f32 %v3682_v13, %v3630_v1 }
 0xacc   :  { %v1193_v44 = vpop.permute.xlu1 %1192 }
 0xacd   :  { %v1195_v58 = vmul.f32 %v1193_v44, %v1190_v7 }
 0xacf   :  { %v1197_v3 = vadd.f32 %v1196_v16, %v1195_v58 }
 0xad0   :  { %v1305_v22 = vpop.permute.xlu0 %1304 }
 0xad1   :  { %v1203_v24 = vmul.f32 %v3676_v4, %v1197_v3  ;;  %v1307_v26 = vmul.f32 %v1305_v22, %v1302_v20 }
 0xad3   :  { %v1309_v27 = vadd.f32 %v1308_v25, %v1307_v26  ;;  %v3689_v47 = vadd.f32 %v1210_v23, %v1203_v24 }
 0xad5   :  { %v1315_v14 = vmul.f32 %v3680_v6, %v1309_v27  ;;  %1325 = vrot.lane.b32.xlu1 %v3689_v47, %s3198_s16 }
 0xad7   :  { %v3696_v38 = vadd.f32 %v1322_v36, %v1315_v14 }
 0xad9   :  { %1331 = vrot.lane.b32.xlu0 %v3696_v38, %s3198_s16 }
 0xb47   :  { %v1326_v61 = vpop.permute.xlu1 %1325 }
 0xb48   :  { %1329 = vst.msk [vmem:[#allocation2 + $0x18] sm:$0xff] %vm118_vm0, %v1326_v61  ;;  %2743 = vmatmul.mubr.msk.f32.vlgmr.msra.gmra.mrb[16].mxu0 %vm118_vm0, %v1326_v61 }
 0xb49   :  { %2900 = vmatpush3.bf16.msra.mxu0 %v3364_v18  ;;  %2764 = vmatprep.mubr.msk.f32.mxu0 %vm3194_vm1, %v3195_v33 }
 0xb4a   :  { %2901 = vmatprep.subr.bf16.mxu0 %v3193_v19 }
 0xb4b   :  { %v1332_v1 = vpop.permute.xlu0 %1331 }
 0xb4c   :  { %1335 = vst.msk [vmem:[#allocation3 + $0x20] sm:$0xff] %vm118_vm0, %v1332_v1  ;;  %2754 = vmatmul.mubr.msk.f32.vlgmr.msra.gmra.mrb[16].mxu1 %vm118_vm0, %v1332_v1 }
 0xb4d   :  { %2903 = vmatpush3.bf16.msra.mxu0 %v3384_v28  ;;  %2906 = vmatpush3.bf16.msra.mxu1 %v3371_v21 }
 0xb4e   :  { %2907 = vmatprep.subr.bf16.mxu1 %v3193_v19  ;;  %2775 = vmatprep.mubr.msk.f32.mxu1 %vm3194_vm1, %v3195_v33 }
 0xb4f   :  { %2910 = vmatprep.subr.bf16.mxu0 %v3193_v19 }
 0xb51   :  { %2909 = vmatpush3.bf16.msra.mxu1 %v3388_v29 }
 0xb52   :  { %2916 = vmatprep.subr.bf16.mxu1 %v3193_v19 }
 0xc1b   :  { %v1404_v56 = vpop.f32.mrb[16].mxu0 }
 0xc1c   :  { %v1405_v41 = vadd.f32 %v3467_v2, %v1404_v56  ;;  %v2744_v43 = vpop.f32.mrb[17].mxu0 }
 0xc1e   :  { %1416 = vrot.lane.b32.xlu1 %v1405_v41, %s3197_s22  ;;  %v1408_v62 = vadd.f32 %v1405_v41, %v3454_v55 }
 0xc1f   :  { %v1505_v46 = vpop.f32.mrb[16].mxu1 }
 0xc20   :  { %v1506_v54 = vadd.f32 %v3475_v8, %v1505_v46  ;;  %v2755_v59 = vpop.f32.mrb[17].mxu1  ;;  %v2486_v63 = vmul.f32 -1.442695, %v1408_v62 }
 0xc22   :  { %1517 = vrot.lane.b32.xlu0 %v1506_v54, %s3197_s22  ;;  %v1509_v30 = vadd.f32 %v1506_v54, %v3448_v48  ;;  %2997 = vpow2.f32 %v2486_v63 }
 0xc24   :  { %v2488_v34 = vmul.f32 -1.442695, %v1509_v30  ;;  %v1435_v30 = vmul.f32 %v3682_v13, %v3689_v47 }
 0xc26   :  { %2999 = vpow2.f32 %v2488_v34 }
 0xc2c   :  { %v2998_v7 = vpop.eup %2997 }
 0xc2d   :  { %v1412_v44 = vadd.f32 1.0, %v2998_v7 }
 0xc2f   :  { %3001 = vrcp.f32 %v1412_v44 }
 0xc30   :  { %v3000_v16 = vpop.eup %2999 }
 0xc31   :  { %v1513_v58 = vadd.f32 1.0, %v3000_v16  ;;  %v1536_v16 = vmul.f32 %v3696_v38, %v3678_v5 }
 0xc33   :  { %3003 = vrcp.f32 %v1513_v58 }
 0xc39   :  { %v3002_v3 = vpop.eup %3001 }
 0xc3a   :  { %v1426_v56 = vsub.f32 1.0, %v3002_v3  ;;  %v1432_v43 = vmul.f32 %v3002_v3, %v3689_v47 }
 0xc3d   :  { %v3004_v23 = vpop.eup %3003 }
 0xc3e   :  { %v1527_v59 = vsub.f32 1.0, %v3004_v23  ;;  %v1533_v63 = vmul.f32 %v3004_v23, %v3696_v38 }
 0xc90   :  { %v1417_v20 = vpop.permute.xlu1 %1416 }
 0xc91   :  { %v1419_v22 = vmul.f32 %v3002_v3, %v1417_v20 }
 0xc93   :  { %1421 = vrot.lane.b32.xlu1 %v1419_v22, %s3197_s22 }
 0xc94   :  { %v1518_v24 = vpop.permute.xlu0 %1517 }
 0xc95   :  { %v1520_v25 = vmul.f32 %v3004_v23, %v1518_v24 }
 0xc97   :  { %1522 = vrot.lane.b32.xlu0 %v1520_v25, %s3197_s22 }
 0xd05   :  { %v1422_v26 = vpop.permute.xlu1 %1421 }
 0xd06   :  { %v1424_v27 = vadd.f32 %v1422_v26, %v3454_v55 }
 0xd08   :  { %3005 = vtanh.f32 %v1424_v27 }
 0xd09   :  { %v1523_v36 = vpop.permute.xlu0 %1522 }
 0xd0a   :  { %v1525_v14 = vadd.f32 %v1523_v36, %v3448_v48 }
 0xd0c   :  { %3007 = vtanh.f32 %v1525_v14 }
 0xd12   :  { %v3006_v61 = vpop.eup %3005 }
 0xd13   :  { %1428 = vrot.lane.b32.xlu1 %v3006_v61, %s3198_s16 }
 0xd16   :  { %v3008_v1 = vpop.eup %3007 }
 0xd17   :  { %1529 = vrot.lane.b32.xlu0 %v3008_v1, %s3198_s16 }
 0xd85   :  { %v1429_v41 = vpop.permute.xlu1 %1428 }
 0xd86   :  { %v1431_v46 = vmul.f32 %v1429_v41, %v1426_v56 }
 0xd88   :  { %v1433_v54 = vadd.f32 %v1432_v43, %v1431_v46 }
 0xd89   :  { %v1530_v62 = vpop.permute.xlu0 %1529 }
 0xd8a   :  { %v1434_v55 = vmul.f32 %v1433_v54, %v3680_v6  ;;  %v1532_v48 = vmul.f32 %v1530_v62, %v1527_v59 }
 0xd8c   :  { %v1534_v34 = vadd.f32 %v1533_v63, %v1532_v48  ;;  %v3733_v7 = vadd.f32 %v1435_v30, %v1434_v55 }
 0xd8e   :  { %v1535_v44 = vmul.f32 %v1534_v34, %v3676_v4  ;;  %1539 = vrot.lane.b32.xlu1 %v3733_v7, %s3198_s16 }
 0xd90   :  { %v3740_v58 = vadd.f32 %v1536_v16, %v1535_v44 }
 0xd92   :  { %1545 = vrot.lane.b32.xlu0 %v3740_v58, %s3198_s16 }
 0xe00   :  { %v1540_v6 = vpop.permute.xlu1 %1539 }
 0xe01   :  { %1543 = vst.msk [vmem:[#allocation2 + $0x20] sm:$0xff] %vm118_vm0, %v1540_v6  ;;  %2765 = vmatmul.mubr.msk.f32.vlgmr.msra.gmra.mrb[18].mxu0 %vm118_vm0, %v1540_v6 }
 0xe02   :  { %2912 = vmatpush3.bf16.msra.mxu0 %v3364_v18  ;;  %2786 = vmatprep.mubr.msk.f32.mxu0 %vm3194_vm1, %v3195_v33 }
 0xe03   :  { %2913 = vmatprep.subr.bf16.mxu0 %v3193_v19 }
 0xe04   :  { %v1546_v4 = vpop.permute.xlu0 %1545 }
 0xe05   :  { %1549 = vst.msk [vmem:[#allocation3 + $0x18] sm:$0xff] %vm118_vm0, %v1546_v4  ;;  %2776 = vmatmul.mubr.msk.f32.vlgmr.msra.gmra.mrb[18].mxu1 %vm118_vm0, %v1546_v4 }
 0xe06   :  { %2915 = vmatpush3.bf16.msra.mxu0 %v3384_v28  ;;  %2918 = vmatpush3.bf16.msra.mxu1 %v3371_v21 }
 0xe07   :  { %2919 = vmatprep.subr.bf16.mxu1 %v3193_v19  ;;  %2797 = vmatprep.mubr.msk.f32.mxu1 %vm3194_vm1, %v3195_v33 }
 0xe08   :  { %2922 = vmatprep.subr.bf16.mxu0 %v3193_v19 }
 0xe0a   :  { %2921 = vmatpush3.bf16.msra.mxu1 %v3388_v29 }
 0xe0b   :  { %2928 = vmatprep.subr.bf16.mxu1 %v3193_v19 }
 0xed4   :  { %v1618_v5 = vpop.f32.mrb[18].mxu0 }
 0xed5   :  { %v1619_v13 = vadd.f32 %v3467_v2, %v1618_v5  ;;  %v2766_v47 = vpop.f32.mrb[19].mxu0 }
 0xed6   :  { %v1649_v47 = vmul.f32 %v3733_v7, %v3616_v35 }
 0xed7   :  { %1630 = vrot.lane.b32.xlu1 %v1619_v13, %s3197_s22  ;;  %v1622_v22 = vadd.f32 %v1619_v13, %v3452_v52 }
 0xed8   :  { %v1719_v38 = vpop.f32.mrb[18].mxu1 }
 0xed9   :  { %v1720_v3 = vadd.f32 %v3475_v8, %v1719_v38  ;;  %v2777_v20 = vpop.f32.mrb[19].mxu1  ;;  %v2490_v23 = vmul.f32 -1.442695, %v1622_v22  ;;  %v1750_v22 = vmul.f32 %v3740_v58, %v3612_v32 }
 0xedb   :  { %1731 = vrot.lane.b32.xlu0 %v1720_v3, %s3197_s22  ;;  %v1723_v24 = vadd.f32 %v1720_v3, %v3450_v50  ;;  %3009 = vpow2.f32 %v2490_v23 }
 0xedd   :  { %v2492_v25 = vmul.f32 -1.442695, %v1723_v24 }
 0xedf   :  { %3011 = vpow2.f32 %v2492_v25 }
 0xee5   :  { %v3010_v26 = vpop.eup %3009 }
 0xee6   :  { %v1626_v27 = vadd.f32 1.0, %v3010_v26 }
 0xee8   :  { %3013 = vrcp.f32 %v1626_v27 }
 0xee9   :  { %v3012_v36 = vpop.eup %3011 }
 0xeea   :  { %v1727_v14 = vadd.f32 1.0, %v3012_v36 }
 0xeec   :  { %3015 = vrcp.f32 %v1727_v14 }
 0xef2   :  { %v3014_v61 = vpop.eup %3013 }
 0xef3   :  { %v1640_v30 = vsub.f32 1.0, %v3014_v61  ;;  %v1646_v44 = vmul.f32 %v3014_v61, %v3733_v7 }
 0xef6   :  { %v3016_v41 = vpop.eup %3015 }
 0xef7   :  { %v1741_v4 = vsub.f32 1.0, %v3016_v41  ;;  %v1747_v13 = vmul.f32 %v3016_v41, %v3740_v58 }
 0xf49   :  { %v1631_v1 = vpop.permute.xlu1 %1630 }
 0xf4a   :  { %v1633_v56 = vmul.f32 %v3014_v61, %v1631_v1 }
 0xf4c   :  { %1635 = vrot.lane.b32.xlu1 %v1633_v56, %s3197_s22 }
 0xf4d   :  { %v1732_v43 = vpop.permute.xlu0 %1731 }
 0xf4e   :  { %v1734_v46 = vmul.f32 %v3016_v41, %v1732_v43 }
 0xf50   :  { %1736 = vrot.lane.b32.xlu0 %v1734_v46, %s3197_s22 }
 0xfbe   :  { %v1636_v54 = vpop.permute.xlu1 %1635 }
 0xfbf   :  { %v1638_v59 = vadd.f32 %v1636_v54, %v3452_v52 }
 0xfc1   :  { %3017 = vtanh.f32 %v1638_v59 }
 0xfc2   :  { %v1737_v62 = vpop.permute.xlu0 %1736 }
 0xfc3   :  { %v1739_v55 = vadd.f32 %v1737_v62, %v3450_v50 }
 0xfc5   :  { %3019 = vtanh.f32 %v1739_v55 }
 0xfcb   :  { %v3018_v63 = vpop.eup %3017 }
 0xfcc   :  { %1642 = vrot.lane.b32.xlu1 %v3018_v63, %s3198_s16 }
 0xfcf   :  { %v3020_v48 = vpop.eup %3019 }
 0xfd0   :  { %1743 = vrot.lane.b32.xlu0 %v3020_v48, %s3198_s16 }
0x103e   :  { %v1643_v34 = vpop.permute.xlu1 %1642 }
0x103f   :  { %v1645_v16 = vmul.f32 %v1643_v34, %v1640_v30 }
0x1041   :  { %v1647_v6 = vadd.f32 %v1646_v44, %v1645_v16 }
0x1042   :  { %v1744_v5 = vpop.permute.xlu0 %1743 }
0x1043   :  { %v1648_v52 = vmul.f32 %v1647_v6, %v3614_v11  ;;  %v1746_v50 = vmul.f32 %v1744_v5, %v1741_v4 }
0x1045   :  { %v1748_v38 = vadd.f32 %v1747_v13, %v1746_v50  ;;  %v3777_v3 = vadd.f32 %v1649_v47, %v1648_v52 }
0x1047   :  { %v1749_v20 = vmul.f32 %v1748_v38, %v3610_v31  ;;  %1753 = vrot.lane.b32.xlu1 %v3777_v3, %s3198_s16  ;;  %v1863_v6 = vmul.f32 %v3777_v3, %v3550_v15 }
0x1049   :  { %v3784_v23 = vadd.f32 %v1750_v22, %v1749_v20  ;;  %v3064_v20 = vld [vmem:[%s3963_s10] ss:$0 sm:$0xff] }
0x104b   :  { %1759 = vrot.lane.b32.xlu0 %v3784_v23, %s3198_s16  ;;  %v1964_v13 = vmul.f32 %v3784_v23, %v3546_v10  ;;  %v3063_v10 = vld [vmem:[%s3959_s6] ss:$0 sm:$0xff] }
0x10b9   :  { %v1754_v11 = vpop.permute.xlu1 %1753 }
0x10ba   :  { %1757 = vst.msk [vmem:[#allocation2 + $0x28] sm:$0xff] %vm118_vm0, %v1754_v11  ;;  %2787 = vmatmul.mubr.msk.f32.vlgmr.msra.gmra.mrb[20].mxu0 %vm118_vm0, %v1754_v11 }
0x10bb   :  { %2924 = vmatpush3.bf16.msra.mxu0 %v3364_v18  ;;  %2808 = vmatprep.mubr.msk.f32.mxu0 %vm3194_vm1, %v3195_v33 }
0x10bc   :  { %2925 = vmatprep.subr.bf16.mxu0 %v3193_v19 }
0x10bd   :  { %v1760_v31 = vpop.permute.xlu0 %1759 }
0x10be   :  { %1763 = vst.msk [vmem:[#allocation3 + $0x10] sm:$0xff] %vm118_vm0, %v1760_v31  ;;  %2798 = vmatmul.mubr.msk.f32.vlgmr.msra.gmra.mrb[20].mxu1 %vm118_vm0, %v1760_v31 }
0x10bf   :  { %2927 = vmatpush3.bf16.msra.mxu0 %v3384_v28  ;;  %2930 = vmatpush3.bf16.msra.mxu1 %v3371_v21 }
0x10c0   :  { %2931 = vmatprep.subr.bf16.mxu1 %v3193_v19  ;;  %2819 = vmatprep.mubr.msk.f32.mxu1 %vm3194_vm1, %v3195_v33 }
0x10c3   :  { %2933 = vmatpush3.bf16.msra.mxu1 %v3388_v29 }
0x118d   :  { %v1832_v18 = vpop.f32.mrb[20].mxu0 }
0x118e   :  { %v1833_v32 = vadd.f32 %v3467_v2, %v1832_v18  ;;  %v2788_v35 = vpop.f32.mrb[21].mxu0 }
0x1190   :  { %1844 = vrot.lane.b32.xlu1 %v1833_v32, %s3197_s22  ;;  %v1836_v21 = vadd.f32 %v1833_v32, %v3462_v0 }
0x1191   :  { %v1933_v7 = vpop.f32.mrb[20].mxu1 }
0x1192   :  { %v1934_v58 = vadd.f32 %v3475_v8, %v1933_v7  ;;  %v2799_v24 = vpop.f32.mrb[21].mxu1  ;;  %v2494_v19 = vmul.f32 -1.442695, %v1836_v21 }
0x1194   :  { %1945 = vrot.lane.b32.xlu0 %v1934_v58, %s3197_s22  ;;  %v1937_v28 = vadd.f32 %v1934_v58, %v3440_v40  ;;  %3021 = vpow2.f32 %v2494_v19 }
0x1196   :  { %v2496_v33 = vmul.f32 -1.442695, %v1937_v28 }
0x1198   :  { %3023 = vpow2.f32 %v2496_v33 }
0x119e   :  { %v3022_v29 = vpop.eup %3021 }
0x119f   :  { %v1840_v25 = vadd.f32 1.0, %v3022_v29 }
0x11a1   :  { %3025 = vrcp.f32 %v1840_v25 }
0x11a2   :  { %v3024_v2 = vpop.eup %3023 }
0x11a3   :  { %v1941_v26 = vadd.f32 1.0, %v3024_v2 }
0x11a5   :  { %3027 = vrcp.f32 %v1941_v26 }
0x11ab   :  { %v3026_v27 = vpop.eup %3025 }
0x11ac   :  { %v1854_v62 = vsub.f32 1.0, %v3026_v27  ;;  %v1860_v63 = vmul.f32 %v3026_v27, %v3777_v3 }
0x11af   :  { %v3028_v14 = vpop.eup %3027 }
0x11b0   :  { %v1955_v34 = vsub.f32 1.0, %v3028_v14  ;;  %v1961_v16 = vmul.f32 %v3028_v14, %v3784_v23 }
0x1202   :  { %v1845_v36 = vpop.permute.xlu1 %1844 }
0x1203   :  { %v1847_v8 = vmul.f32 %v3026_v27, %v1845_v36 }
0x1205   :  { %1849 = vrot.lane.b32.xlu1 %v1847_v8, %s3197_s22 }
0x1206   :  { %v1946_v61 = vpop.permute.xlu0 %1945 }
0x1207   :  { %v1948_v1 = vmul.f32 %v3028_v14, %v1946_v61 }
0x1209   :  { %1950 = vrot.lane.b32.xlu0 %v1948_v1, %s3197_s22 }
0x1277   :  { %v1850_v56 = vpop.permute.xlu1 %1849 }
0x1278   :  { %v1852_v41 = vadd.f32 %v1850_v56, %v3462_v0 }
0x127a   :  { %3029 = vtanh.f32 %v1852_v41 }
0x127b   :  { %v1951_v43 = vpop.permute.xlu0 %1950 }
0x127c   :  { %v1953_v46 = vadd.f32 %v1951_v43, %v3440_v40 }
0x127e   :  { %3031 = vtanh.f32 %v1953_v46 }
0x1284   :  { %v3030_v54 = vpop.eup %3029 }
0x1285   :  { %1856 = vrot.lane.b32.xlu1 %v3030_v54, %s3198_s16 }
0x1288   :  { %v3032_v59 = vpop.eup %3031 }
0x1289   :  { %1957 = vrot.lane.b32.xlu0 %v3032_v59, %s3198_s16 }
0x12f7   :  { %v1857_v55 = vpop.permute.xlu1 %1856 }
0x12f8   :  { %v1859_v48 = vmul.f32 %v1857_v55, %v1854_v62 }
0x12fa   :  { %v1861_v30 = vadd.f32 %v1860_v63, %v1859_v48 }
0x12fb   :  { %v1958_v44 = vpop.permute.xlu0 %1957 }
0x12fc   :  { %v1862_v0 = vmul.f32 %v1861_v30, %v3548_v12  ;;  %v1960_v40 = vmul.f32 %v1958_v44, %v1955_v34 }
0x12fe   :  { %v1962_v4 = vadd.f32 %v1961_v16, %v1960_v40  ;;  %v1864_v5 = vadd.f32 %v1863_v6, %v1862_v0  ;;  %v2202_v0 = vld [vmem:[#allocation3 + $0x18] sm:$0xff] }
0x12ff   :  { %v2194_v40 = vld [vmem:[#allocation2 + $0x18] sm:$0xff] }
0x1300   :  { %v1963_v52 = vmul.f32 %v1962_v4, %v3544_v9  ;;  %1967 = vrot.lane.b32.xlu1 %v1864_v5, %s3198_s16  ;;  %v2210_v6 = vadd.f32 %v2202_v0, %v2194_v40  ;;  %v2201_v4 = vld [vmem:[#allocation3 + $0x10] sm:$0xff] }
0x1302   :  { %v3823_v50 = vadd.f32 %v1964_v13, %v1963_v52 }
0x1304   :  { %1973 = vrot.lane.b32.xlu0 %v3823_v50, %s3198_s16  ;;  %v2178_v30 = vmul.f32 %v3823_v50, %v3490_v49  ;;  %v2501_v49 = vld [vmem:[%s3964_s11] ss:$0 sm:$0xff] }
0x1372   :  { %v1968_v12 = vpop.permute.xlu1 %1967 }
0x1373   :  { %1971 = vst.msk [vmem:[#allocation2 + $0x30] sm:$0xff] %vm118_vm0, %v1968_v12  ;;  %2809 = vmatmul.mubr.msk.f32.vlgmr.msra.gmra.mrb[22].mxu0 %vm118_vm0, %v1968_v12  ;;  %v2218_v12 = vmul.f32 0.5, %v2210_v6 }
0x1376   :  { %v1974_v15 = vpop.permute.xlu0 %1973 }
0x1377   :  { %1977 = vst.msk [vmem:[#allocation3 + $0x8] sm:$0xff] %vm118_vm0, %v1974_v15  ;;  %2820 = vmatmul.mubr.msk.f32.vlgmr.msra.gmra.mrb[22].mxu1 %vm118_vm0, %v1974_v15 }
0x137e   :  { %v2200_v44 = vld [vmem:[#allocation3 + $0x8] sm:$0xff] }
0x1446   :  { %v2046_v9 = vpop.f32.mrb[22].mxu0 }
0x1447   :  { %v2047_v47 = vadd.f32 %v3063_v10, %v2046_v9  ;;  %v2810_v38 = vpop.f32.mrb[23].mxu0  ;;  %v2195_v9 = vld [vmem:[#allocation2 + $0x20] sm:$0xff] }
0x1449   :  { %2058 = vrot.lane.b32.xlu1 %v2047_v47, %s3197_s22  ;;  %v2050_v11 = vadd.f32 %v2047_v47, %v3460_v60 }
0x144a   :  { %v2147_v3 = vpop.f32.mrb[22].mxu1 }
0x144b   :  { %v2148_v22 = vadd.f32 %v3064_v20, %v2147_v3  ;;  %v2821_v23 = vpop.f32.mrb[23].mxu1  ;;  %v2498_v31 = vmul.f32 -1.442695, %v2050_v11  ;;  %v2233_v3 = vmul.f32 %v2501_v49, %v2218_v12 }
0x144c   :  { %v2205_v23 = vld [vmem:[#allocation3 + $0x30] sm:$0xff] }
0x144d   :  { %2159 = vrot.lane.b32.xlu0 %v2148_v22, %s3197_s22  ;;  %v2151_v18 = vadd.f32 %v2148_v22, %v3442_v42  ;;  %3033 = vpow2.f32 %v2498_v31  ;;  %v2197_v22 = vld [vmem:[#allocation2 + $0x30] sm:$0xff] }
0x144f   :  { %v2500_v32 = vmul.f32 -1.442695, %v2151_v18 }
0x1451   :  { %3035 = vpow2.f32 %v2500_v32  ;;  %v2213_v32 = vadd.f32 %v2205_v23, %v2197_v22 }
0x1457   :  { %v3034_v35 = vpop.eup %3033 }
0x1458   :  { %v2054_v7 = vadd.f32 1.0, %v3034_v35  ;;  %v2247_v35 = vsel %vm118_vm0, %v2233_v3, 0.0 }
0x145a   :  { %3037 = vrcp.f32 %v2054_v7 }
0x145b   :  { %v3036_v58 = vpop.eup %3035 }
0x145c   :  { %v2155_v24 = vadd.f32 1.0, %v3036_v58 }
0x145e   :  { %3039 = vrcp.f32 %v2155_v24 }
0x1464   :  { %v3038_v21 = vpop.eup %3037 }
0x1465   :  { %v2068_v61 = vsub.f32 1.0, %v3038_v21  ;;  %v2074_v56 = vmul.f32 %v3038_v21, %v1864_v5 }
0x1468   :  { %v3040_v33 = vpop.eup %3039 }
0x1469   :  { %v2169_v46 = vsub.f32 1.0, %v3040_v33  ;;  %v2175_v59 = vmul.f32 %v3040_v33, %v3823_v50  ;;  %v2203_v50 = vld [vmem:[#allocation3 + $0x20] sm:$0xff] }
0x146a   :  { %v2211_v38 = vadd.f32 %v2203_v50, %v2195_v9 }
0x146c   :  { %v2219_v18 = vmul.f32 0.5, %v2211_v38 }
0x146e   :  { %v2234_v24 = vmul.f32 %v2501_v49, %v2219_v18 }
0x14bb   :  { %v2059_v19 = vpop.permute.xlu1 %2058 }
0x14bc   :  { %v2061_v28 = vmul.f32 %v3038_v21, %v2059_v19  ;;  %v2221_v21 = vmul.f32 0.5, %v2213_v32 }
0x14be   :  { %2063 = vrot.lane.b32.xlu1 %v2061_v28, %s3197_s22  ;;  %v2250_v28 = vsel %vm118_vm0, %v2234_v24, 0.0 }
0x14bf   :  { %v2160_v29 = vpop.permute.xlu0 %2159 }
0x14c0   :  { %v2162_v25 = vmul.f32 %v3040_v33, %v2160_v29  ;;  %v2236_v33 = vmul.f32 %v2501_v49, %v2221_v21 }
0x14c2   :  { %2164 = vrot.lane.b32.xlu0 %v2162_v25, %s3197_s22  ;;  %v2256_v29 = vsel %vm118_vm0, %v2236_v33, 0.0 }
0x1530   :  { %v2064_v2 = vpop.permute.xlu1 %2063 }
0x1531   :  { %v2066_v26 = vadd.f32 %v2064_v2, %v3460_v60 }
0x1533   :  { %3041 = vtanh.f32 %v2066_v26 }
0x1534   :  { %v2165_v27 = vpop.permute.xlu0 %2164 }
0x1535   :  { %v2167_v36 = vadd.f32 %v2165_v27, %v3442_v42  ;;  %v2077_v42 = vmul.f32 %v1864_v5, %v3496_v57  ;;  %v2196_v57 = vld [vmem:[#allocation2 + $0x28] sm:$0xff]  ;;  %v2193_v5 = vld [vmem:[#allocation2 + $0x10] sm:$0xff]  ;;  %v2206_v27 = vld [vmem:[#allocation3 + $0x38] sm:$0xff] }
0x1536   :  { %v2209_v13 = vadd.f32 %v2201_v4, %v2193_v5 }
0x1537   :  { %3043 = vtanh.f32 %v2167_v36 }
0x1538   :  { %v2217_v47 = vmul.f32 0.5, %v2209_v13 }
0x153a   :  { %v2232_v31 = vmul.f32 %v2501_v49, %v2217_v47 }
0x153c   :  { %v2244_v58 = vsel %vm118_vm0, %v2232_v31, 0.0 }
0x153d   :  { %v3042_v8 = vpop.eup %3041 }
0x153e   :  { %2070 = vrot.lane.b32.xlu1 %v3042_v8, %s3198_s16  ;;  %v2191_v8 = vld [vmem:[#allocation2] sm:$0xff] }
0x1541   :  { %v3044_v14 = vpop.eup %3043 }
0x1542   :  { %2171 = vrot.lane.b32.xlu0 %v3044_v14, %s3198_s16 }
0x15b0   :  { %v2071_v1 = vpop.permute.xlu1 %2070 }
0x15b1   :  { %v2073_v41 = vmul.f32 %v2071_v1, %v2068_v61 }
0x15b3   :  { %v2075_v43 = vadd.f32 %v2074_v56, %v2073_v41 }
0x15b4   :  { %v2172_v54 = vpop.permute.xlu0 %2171 }
0x15b5   :  { %v2076_v60 = vmul.f32 %v2075_v43, %v3494_v53  ;;  %v2174_v62 = vmul.f32 %v2172_v54, %v2169_v46  ;;  %v2192_v53 = vld [vmem:[#allocation2 + $0x8] sm:$0xff] }
0x15b6   :  { %v2208_v16 = vadd.f32 %v2200_v44, %v2192_v53  ;;  %v3068_v53 = vld [vmem:[%s3954_s1 + $0x38] sm:$0xff] }
0x15b7   :  { %v2176_v55 = vadd.f32 %v2175_v59, %v2174_v62  ;;  %v2078_v63 = vadd.f32 %v2077_v42, %v2076_v60  ;;  %vm2269_vm9 = vcmp.gt.f32.partialorder %v3068_v53, 0.5 }
0x15b8   :  { %v2216_v52 = vmul.f32 0.5, %v2208_v16 }
0x15b9   :  { %v2177_v48 = vmul.f32 %v2176_v55, %v3492_v51  ;;  %2181 = vrot.lane.b32.xlu1 %v2078_v63, %s3198_s16  ;;  %v2204_v51 = vld [vmem:[#allocation3 + $0x28] sm:$0xff]  ;;  %v3065_v63 = vld [vmem:[%s3954_s1 + $0x30] sm:$0xff] }
0x15ba   :  { %v2212_v15 = vadd.f32 %v2204_v51, %v2196_v57  ;;  %v2231_v10 = vmul.f32 %v2501_v49, %v2216_v52  ;;  %vm2268_vm4 = vcmp.gt.f32.partialorder %v3065_v63, 0.5 }
0x15bb   :  { %v2179_v34 = vadd.f32 %v2178_v30, %v2177_v48  ;;  %v3066_v30 = vld [vmem:[%s3954_s1 + $0x8] sm:$0xff] }
0x15bc   :  { %v2220_v20 = vmul.f32 0.5, %v2212_v15  ;;  %v2241_v11 = vsel %vm118_vm0, %v2231_v10, 0.0  ;;  %vm2263_vm5 = vcmp.gt.f32.partialorder %v3066_v30, 0.5 }
0x15bd   :  { %2187 = vrot.lane.b32.xlu0 %v2179_v34, %s3198_s16 }
0x15be   :  { %v2235_v7 = vmul.f32 %v2501_v49, %v2220_v20 }
0x15c0   :  { %v2253_v19 = vsel %vm118_vm0, %v2235_v7, 0.0 }
0x15dc   :  { %2242 = vadd.xlane.f32.xlu0 %v2241_v11 }
0x15dd   :  { %2248 = vadd.xlane.f32.xlu1 %v2247_v35 }
0x15e0   :  { %2245 = vadd.xlane.f32.xlu0 %v2244_v58 }
0x15e1   :  { %2254 = vadd.xlane.f32.xlu1 %v2253_v19 }
0x15e4   :  { %2251 = vadd.xlane.f32.xlu0 %v2250_v28 }
0x15e8   :  { %2257 = vadd.xlane.f32.xlu0 %v2256_v29 }
0x162b   :  { %v2182_v25 = vpop.permute.xlu1 %2181 }
0x162c   :  { %2185 = vst.msk [vmem:[#allocation2 + $0x38] sm:$0xff] %vm118_vm0, %v2182_v25 }
0x162f   :  { %v2188_v2 = vpop.permute.xlu0 %2187 }
0x1630   :  { %2190 = vst.msk [vmem:[#allocation3] sm:$0xff] %vm118_vm0, %v2188_v2 }
0x1633   :  { %v2198_v26 = vld [vmem:[#allocation2 + $0x38] sm:$0xff] }
0x1634   :  { %v2214_v36 = vadd.f32 %v2206_v27, %v2198_v26 }
0x1636   :  { %v2222_v56 = vmul.f32 0.5, %v2214_v36 }
0x1637   :  { %v2199_v14 = vld [vmem:[#allocation3] sm:$0xff] }
0x1638   :  { %v2207_v61 = vadd.f32 %v2199_v14, %v2191_v8  ;;  %v2237_v46 = vmul.f32 %v2501_v49, %v2222_v56 }
0x163a   :  { %v2215_v1 = vmul.f32 0.5, %v2207_v61  ;;  %v2259_v54 = vsel %vm118_vm0, %v2237_v46, 0.0 }
0x163c   :  { %v2230_v41 = vmul.f32 %v2501_v49, %v2215_v1 }
0x163e   :  { %v2238_v43 = vsel %vm118_vm0, %v2230_v41, 0.0 }
0x163f   :  { %2239 = vadd.xlane.f32.xlu1 %v2238_v43 }
0x1643   :  { %2260 = vadd.xlane.f32.xlu1 %v2259_v54 }
0x1669   :  { %v2243_v60 = vpop.xlane.xlu0 %2242 }
0x166a   :  { %v2249_v62 = vpop.xlane.xlu1 %2248  ;;  %v2271_v16 = vsel %vm2263_vm5, %v2243_v60, -10000.0 }
0x166b   :  { %v2273_v40 = vsel %vm2265_vm6, %v2249_v62, -10000.0  ;;  %v2279_v52 = vmul.f32 10.0, %v2271_v16 }
0x166c   :  { %v2281_v13 = vmul.f32 10.0, %v2273_v40 }
0x166d   :  { %v2246_v59 = vpop.xlane.xlu0 %2245  ;;  %v2288_v3 = vsel %vm2286_vm10, %v2279_v52, -inf }
0x166e   :  { %v2255_v55 = vpop.xlane.xlu1 %2254  ;;  %v2272_v6 = vsel %vm2264_vm7, %v2246_v59, -10000.0  ;;  %v2290_v20 = vsel %vm2286_vm10, %v2281_v13, -inf }
0x166f   :  { %v2275_v45 = vsel %vm2267_vm2, %v2255_v55, -10000.0  ;;  %v2280_v51 = vmul.f32 10.0, %v2272_v6 }
0x1670   :  { %v2283_v4 = vmul.f32 10.0, %v2275_v45 }
0x1671   :  { %v2252_v42 = vpop.xlane.xlu0 %2251  ;;  %v2289_v22 = vsel %vm2286_vm10, %v2280_v51, -inf }
0x1672   :  { %v2274_v34 = vsel %vm2266_vm3, %v2252_v42, -10000.0  ;;  %v2293_v49 = vsel %vm2286_vm10, %v2283_v4, -inf }
0x1673   :  { %v2282_v37 = vmul.f32 10.0, %v2274_v34  ;;  %v2294_v11 = vmax.f32 %v2288_v3, %v2293_v49  ;;  %v2358_v49 = vld [vmem:[#allocation4] sm:$0xff]  ;;  %v2360_v3 = vld [vmem:[#allocation4 + $0x10] sm:$0xff] }
0x1675   :  { %v2258_v48 = vpop.xlane.xlu0 %2257  ;;  %v2291_v50 = vsel %vm2286_vm10, %v2282_v37, -inf }
0x1676   :  { %v2276_v44 = vsel %vm2268_vm4, %v2258_v48, -10000.0 }
0x1677   :  { %v2284_v57 = vmul.f32 10.0, %v2276_v44 }
0x1679   :  { %v2295_v10 = vsel %vm2286_vm10, %v2284_v57, -inf }
0x167a   :  { %v2296_v31 = vmax.f32 %v2289_v22, %v2295_v10 }
0x16cc   :  { %v2240_v0 = vpop.xlane.xlu1 %2239 }
0x16cd   :  { %v2270_v39 = vsel %vm2262_vm8, %v2240_v0, -10000.0 }
0x16ce   :  { %v2278_v5 = vmul.f32 10.0, %v2270_v39 }
0x16d0   :  { %v2287_v12 = vsel %vm2286_vm10, %v2278_v5, -inf  ;;  %v2261_v15 = vpop.xlane.xlu1 %2260 }
0x16d1   :  { %v2277_v9 = vsel %vm2269_vm9, %v2261_v15, -10000.0  ;;  %v2292_v38 = vmax.f32 %v2287_v12, %v2291_v50 }
0x16d2   :  { %v2285_v47 = vmul.f32 10.0, %v2277_v9  ;;  %v2359_v9 = vld [vmem:[#allocation4 + $0x8] sm:$0xff] }
0x16d3   :  { %v2299_v32 = vmax.f32 %v2292_v38, %v2294_v11 }
0x16d4   :  { %v2297_v23 = vsel %vm2286_vm10, %v2285_v47, -inf }
0x16d5   :  { %v2298_v18 = vmax.f32 %v2290_v20, %v2297_v23  ;;  %v2361_v20 = vld [vmem:[#allocation4 + $0x18] sm:$0xff] }
0x16d7   :  { %v2300_v35 = vmax.f32 %v2296_v31, %v2298_v18 }
0x16d9   :  { %v2301_v7 = vmax.f32 %v2299_v32, %v2300_v35 }
0x16db   :  { %v2304_v58 = vsub.f32 %v2280_v51, %v2301_v7  ;;  %v2302_v24 = vsub.f32 %v2278_v5, %v2301_v7  ;;  %v2303_v21 = vsub.f32 %v2279_v52, %v2301_v7  ;;  %v2305_v19 = vsub.f32 %v2281_v13, %v2301_v7 }
0x16dc   :  { %v2306_v29 = vsub.f32 %v2282_v37, %v2301_v7  ;;  %v2307_v2 = vsub.f32 %v2283_v4, %v2301_v7  ;;  %v2308_v27 = vsub.f32 %v2284_v57, %v2301_v7  ;;  %v2309_v8 = vsub.f32 %v2285_v47, %v2301_v7  ;;  %v2362_v7 = vld [vmem:[#allocation4 + $0x20] sm:$0xff] }
0x16dd   :  { %v2314_v28 = vmul.f32 1.442695, %v2304_v58  ;;  %v2310_v33 = vmul.f32 1.442695, %v2302_v24  ;;  %v2312_v25 = vmul.f32 1.442695, %v2303_v21 }
0x16de   :  { %v2316_v26 = vmul.f32 1.442695, %v2305_v19  ;;  %v2318_v36 = vmul.f32 1.442695, %v2306_v29  ;;  %v2320_v14 = vmul.f32 1.442695, %v2307_v2 }
0x16df   :  { %3045 = vpow2.f32 %v2314_v28  ;;  %v2322_v61 = vmul.f32 1.442695, %v2308_v27  ;;  %v2324_v1 = vmul.f32 1.442695, %v2309_v8  ;;  %v2363_v58 = vld [vmem:[#allocation4 + $0x28] sm:$0xff]  ;;  %v2365_v27 = vld [vmem:[#allocation4 + $0x38] sm:$0xff] }
0x16e0   :  { %3047 = vpow2.f32 %v2310_v33 }
0x16e1   :  { %3049 = vpow2.f32 %v2312_v25 }
0x16e2   :  { %3051 = vpow2.f32 %v2316_v26  ;;  %v2364_v26 = vld [vmem:[#allocation4 + $0x30] sm:$0xff] }
0x16e3   :  { %3053 = vpow2.f32 %v2318_v36 }
0x16e4   :  { %3055 = vpow2.f32 %v2320_v14 }
0x16e5   :  { %3057 = vpow2.f32 %v2322_v61 }
0x16e6   :  { %3059 = vpow2.f32 %v2324_v1 }
0x16e9   :  { %v3046_v56 = vpop.eup %3045 }
0x16ea   :  { %v3048_v41 = vpop.eup %3047  ;;  %v2329_v62 = vsel %vm2286_vm10, %v3046_v56, 0.0 }
0x16eb   :  { %v3050_v43 = vpop.eup %3049  ;;  %v2326_v46 = vsel %vm2286_vm10, %v3048_v41, 0.0 }
0x16ec   :  { %v2327_v54 = vsel %vm2286_vm10, %v3050_v43, 0.0  ;;  %v3052_v60 = vpop.eup %3051 }
0x16ed   :  { %v2328_v59 = vadd.f32 %v2327_v54, %v2326_v46  ;;  %v3054_v42 = vpop.eup %3053  ;;  %v2331_v63 = vsel %vm2286_vm10, %v3052_v60, 0.0 }
0x16ee   :  { %v3056_v48 = vpop.eup %3055  ;;  %v2333_v17 = vsel %vm2286_vm10, %v3054_v42, 0.0 }
0x16ef   :  { %v2330_v55 = vadd.f32 %v2329_v62, %v2328_v59  ;;  %v3058_v45 = vpop.eup %3057  ;;  %v2335_v44 = vsel %vm2286_vm10, %v3056_v48, 0.0 }
0x16f0   :  { %v3060_v0 = vpop.eup %3059  ;;  %v2337_v16 = vsel %vm2286_vm10, %v3058_v45, 0.0 }
0x16f1   :  { %v2332_v30 = vadd.f32 %v2331_v63, %v2330_v55  ;;  %v2339_v6 = vsel %vm2286_vm10, %v3060_v0, 0.0 }
0x16f3   :  { %v2334_v34 = vadd.f32 %v2333_v17, %v2332_v30 }
0x16f5   :  { %v2336_v53 = vadd.f32 %v2335_v44, %v2334_v34 }
0x16f7   :  { %v2338_v40 = vadd.f32 %v2337_v16, %v2336_v53 }
0x16f9   :  { %v2340_v39 = vadd.f32 %v2339_v6, %v2338_v40 }
0x16fb   :  { %3061 = vrcp.f32 %v2340_v39 }
0x1705   :  { %v3062_v4 = vpop.eup %3061 }
0x1706   :  { %v2343_v37 = vmul.f32 %v3062_v4, %v3050_v43  ;;  %v2342_v57 = vmul.f32 %v3062_v4, %v3048_v41  ;;  %v2344_v5 = vmul.f32 %v3062_v4, %v3046_v56  ;;  %v2345_v52 = vmul.f32 %v3062_v4, %v3052_v60 }
0x1707   :  { %v2346_v13 = vmul.f32 %v3062_v4, %v3054_v42  ;;  %v2347_v51 = vmul.f32 %v3062_v4, %v3056_v48  ;;  %v2348_v12 = vmul.f32 %v3062_v4, %v3058_v45  ;;  %v2349_v15 = vmul.f32 %v3062_v4, %v3060_v0 }
0x1708   :  { %2373 = vperm.xlu1 %2948, %v2343_v37   ;;  %2351 = vst.msk [vmem:[%s3965_s12 + $0x8] sm:$0xff] %vm2286_vm10, %v2343_v37  ;;  %2368 = vperm.xlu0 %2947, %v2342_v57   ;;  %2350 = vst.msk [vmem:[%s3965_s12] sm:$0xff] %vm2286_vm10, %v2342_v57 }
0x1709   :  { %2352 = vst.msk [vmem:[%s3965_s12 + $0x10] sm:$0xff] %vm2286_vm10, %v2344_v5  ;;  %2353 = vst.msk [vmem:[%s3965_s12 + $0x18] sm:$0xff] %vm2286_vm10, %v2345_v52 }
0x170a   :  { %2354 = vst.msk [vmem:[%s3965_s12 + $0x20] sm:$0xff] %vm2286_vm10, %v2346_v13  ;;  %2355 = vst.msk [vmem:[%s3965_s12 + $0x28] sm:$0xff] %vm2286_vm10, %v2347_v51 }
0x170b   :  { %2356 = vst.msk [vmem:[%s3965_s12 + $0x30] sm:$0xff] %vm2286_vm10, %v2348_v12  ;;  %2357 = vst.msk [vmem:[%s3965_s12 + $0x38] sm:$0xff] %vm2286_vm10, %v2349_v15  ;;  %s3199_s12 = smov [#allocation12]  }
0x170c   :  { %2378 = vperm.xlu1 %2948, %v2344_v5   ;;  %2383 = vperm.xlu0 %2947, %v2345_v52   ;;  %s2438_s14 = sshll.u32 %s3199_s12, 4  ;;  %s2439_s14 = int_to_ptr.vmem [resolvable:$true] %s2438_s14 }
0x170d   :  { %s3157_s8 = scalar_lea.vmem %s2439_s14, 128  ;;  %p3162_p5 = scmp.lt.s32.totalorder %s2439_s14, %s2439_s14 }
0x170e   :  { %p3158_p4 = scmp.ne.s32.totalorder %s2439_s14, %s3157_s8  ;;  %p3163_p6 = scmp.lt.s32.totalorder %s3157_s8, %s3157_s8 }
0x1710   :  { %2388 = vperm.xlu1 %2948, %v2346_v13   ;;  %2393 = vperm.xlu0 %2947, %v2347_v51   ;;  %p3164_p7 = por %p3163_p6, %p3162_p5 }
0x1712   :  { %p3165_p8 = pnand %p3164_p7, %p3158_p4 }
0x1714   :  { %2398 = vperm.xlu1 %2948, %v2348_v12   ;;  %2403 = vperm.xlu0 %2947, %v2349_v15  }
0x1787   :  { %v2374_v50 = vpop.permute.xlu1 %2373  ;;  %v2369_v10 = vpop.permute.xlu0 %2368 }
0x1788   :  { %v2407_v47 = vmul.f32 %v2374_v50, %v2359_v9  ;;  %v2406_v38 = vmul.f32 %v2369_v10, %v2358_v49 }
0x178a   :  { %v2415_v22 = vsel %vm118_vm0, %v2407_v47, 0.0  ;;  %v2414_v23 = vsel %vm118_vm0, %v2406_v38, 0.0 }
0x178b   :  { %v2379_v11 = vpop.permute.xlu1 %2378  ;;  %v2384_v31 = vpop.permute.xlu0 %2383  ;;  %v2416_v35 = vadd.f32 %v2415_v22, %v2414_v23 }
0x178c   :  { %v2408_v18 = vmul.f32 %v2379_v11, %v2360_v3  ;;  %v2409_v32 = vmul.f32 %v2384_v31, %v2361_v20 }
0x178e   :  { %v2417_v24 = vsel %vm118_vm0, %v2408_v18, 0.0  ;;  %v2419_v33 = vsel %vm118_vm0, %v2409_v32, 0.0 }
0x178f   :  { %v2418_v21 = vadd.f32 %v2417_v24, %v2416_v35  ;;  %v2389_v19 = vpop.permute.xlu1 %2388  ;;  %v2394_v28 = vpop.permute.xlu0 %2393 }
0x1790   :  { %v2410_v29 = vmul.f32 %v2389_v19, %v2362_v7  ;;  %v2411_v25 = vmul.f32 %v2394_v28, %v2363_v58 }
0x1791   :  { %v2420_v2 = vadd.f32 %v2419_v33, %v2418_v21 }
0x1792   :  { %v2421_v36 = vsel %vm118_vm0, %v2410_v29, 0.0  ;;  %v2423_v1 = vsel %vm118_vm0, %v2411_v25, 0.0 }
0x1793   :  { %v2422_v8 = vadd.f32 %v2421_v36, %v2420_v2  ;;  %v2399_v14 = vpop.permute.xlu1 %2398  ;;  %v2404_v61 = vpop.permute.xlu0 %2403 }
0x1794   :  { %v2412_v56 = vmul.f32 %v2399_v14, %v2364_v26  ;;  %v2413_v41 = vmul.f32 %v2404_v61, %v2365_v27 }
0x1795   :  { %v2424_v43 = vadd.f32 %v2423_v1, %v2422_v8 }
0x1796   :  { %v2425_v46 = vsel %vm118_vm0, %v2412_v56, 0.0  ;;  %v2427_v60 = vsel %vm118_vm0, %v2413_v41, 0.0 }
0x1797   :  { %v2426_v54 = vadd.f32 %v2425_v46, %v2424_v43 }
0x1799   :  { %v2428_v59 = vadd.f32 %v2427_v60, %v2426_v54 }
0x179b   :  { %2429 = vst.msk [vmem:[#allocation12] sm:$0xff] %vm118_vm0, %v2428_v59 }
0x179c   :  { %3168 = shalt.err (!%p3165_p8)
}
0x179d   :  { %s3169_s10 = scalar_lea.hbm %s3966_s13, 128 }
0x179e   :  { %p3170_p9 = scmp.ne.s32.totalorder %s3966_s13, %s3169_s10  ;;  %p3173_p10 = scmp.lt.u32.totalorder %s3169_s10, %s3966_s13 }
0x17a0   :  { %p3175_p11 = pnand %p3173_p10, %p3170_p9 }
0x17a2   :  { %3178 = shalt.err (!%p3175_p11)
}
0x17a3   :  { %2441 = dma.vmem_to_hbm [thread:$0]  %s2439_s14, 128, %s3966_s13, [#allocation6]  }
0x17a4   :  { %3185 = dma.done.wait [#allocation6], 128  }
0x17a5   :  { %3186 = vsyncadd [#allocation6], 4294967168 }
0x17a6   :  { %2447 = vsyncpa [#allocation5], 1 }
0x17a7   :  { %2448 = vsyncpa [#allocation8], 1 }
0x17a8   :  { %2449 = vsyncpa [#allocation11], 1 }
0x17a9   :  { %2450 = vsyncpa [#allocation6], 1 }

</bundles_post_ra>
